<compile_context>
chip_gen: v6e
topology: v6e:2x2x1
jax: 0.10.0
libtpu: 0.0.40
codegen_flags: <defaults>
</compile_context>

<pallas_src>
import jax
import jax.numpy as jnp
from jax.experimental import pallas as pl
from jax.experimental.pallas import tpu as pltpu

LRELU_SLOPE = 0.2
BN_EPS = 1e-5                      # PyTorch BatchNorm2d default
LANE = 128                         # lane width -> Cout padding target
TM_MAX = 512                       # M-tile rows (safe on v7x 64 MiB VMEM)
FUSE_Y_BYTES = 8 * 1024 * 1024     # keep y resident in VMEM below this size


def _cparams(semantics):
    return pltpu.CompilerParams(
        dimension_semantics=semantics,
        vmem_limit_bytes=64 * 1024 * 1024,
    )


def _round_up(x, m):
    return (x + m - 1) // m * m


# ---------------- Pallas kernels --------------------------------------------

def _gemm_bias_lrelu_kernel(p_ref, w_ref, b_ref, o_ref):
    # [TM, K] bf16 @ [K, Cpad] bf16 -> f32, + bias, LeakyReLU, store bf16.
    y = jnp.dot(p_ref[...], w_ref[...], preferred_element_type=jnp.float32)
    y = y + b_ref[...]
    o_ref[...] = jnp.where(y >= 0, y, LRELU_SLOPE * y).astype(o_ref.dtype)


def _make_fused_bn_kernel(m_true):
    """conv (bias cancelled by BN) + BatchNorm(batch stats) + LeakyReLU.

    grid = (2, mt): sweep 0 = GEMM into VMEM scratch + channel sum/sumsq,
    scale/shift formed at the end of sweep 0, sweep 1 = normalize + LeakyReLU.
    """
    inv_m = 1.0 / float(m_true)

    def kernel(p_ref, w_ref, g_ref, b_ref, o_ref,
               y_sc, sum_sc, sq_sc, scale_sc, shift_sc):
        s = pl.program_id(0)
        i = pl.program_id(1)
        last = pl.num_programs(1) - 1
        tm = o_ref.shape[0]
        off = pl.multiple_of(i * tm, tm)

        @pl.when((s == 0) & (i == 0))
        def _():
            sum_sc[...] = jnp.zeros_like(sum_sc)
            sq_sc[...] = jnp.zeros_like(sq_sc)

        @pl.when(s == 0)
        def _():
            y = jnp.dot(p_ref[...], w_ref[...],
                        preferred_element_type=jnp.float32)
            y_sc[pl.ds(off, tm), :] = y
            sum_sc[...] += jnp.sum(y, axis=0, keepdims=True)
            sq_sc[...] += jnp.sum(y * y, axis=0, keepdims=True)

        @pl.when((s == 0) & (i == last))
        def _():
            mean = sum_sc[...] * inv_m
            var = jnp.maximum(sq_sc[...] * inv_m - mean * mean, 0.0)
            scale = g_ref[...] * jax.lax.rsqrt(var + BN_EPS)
            scale_sc[...] = scale
            shift_sc[...] = b_ref[...] - mean * scale

        @pl.when(s == 1)
        def _():
            z = y_sc[pl.ds(off, tm), :] * scale_sc[...] + shift_sc[...]
            o_ref[...] = jnp.where(z >= 0, z, LRELU_SLOPE * z).astype(o_ref.dtype)

    return kernel


def _make_gemm_stats_kernel(m_true):
    """Fallback pass A: GEMM -> bf16 y, resident channel stats accumulation,
    scale/shift emitted from the last tile (no host-side reduction)."""
    inv_m = 1.0 / float(m_true)

    def kernel(p_ref, w_ref, g_ref, b_ref, y_ref, sc_ref, sh_ref,
               sum_sc, sq_sc):
        i = pl.program_id(0)

        @pl.when(i == 0)
        def _():
            sum_sc[...] = jnp.zeros_like(sum_sc)
            sq_sc[...] = jnp.zeros_like(sq_sc)

        y = jnp.dot(p_ref[...], w_ref[...], preferred_element_type=jnp.float32)
        y_ref[...] = y.astype(y_ref.dtype)
        sum_sc[...] += jnp.sum(y, axis=0, keepdims=True)
        sq_sc[...] += jnp.sum(y * y, axis=0, keepdims=True)

        @pl.when(i == pl.num_programs(0) - 1)
        def _():
            mean = sum_sc[...] * inv_m
            var = jnp.maximum(sq_sc[...] * inv_m - mean * mean, 0.0)
            scale = g_ref[...] * jax.lax.rsqrt(var + BN_EPS)
            sc_ref[...] = scale
            sh_ref[...] = b_ref[...] - mean * scale

    return kernel


def _bn_lrelu_kernel(y_ref, sc_ref, sh_ref, o_ref):
    # Fallback pass B: y * scale + shift, LeakyReLU, bf16 in/out.
    z = y_ref[...].astype(jnp.float32) * sc_ref[...] + sh_ref[...]
    o_ref[...] = jnp.where(z >= 0, z, LRELU_SLOPE * z).astype(o_ref.dtype)


def _dot_sigmoid_kernel(x_ref, w_ref, b_ref, o_ref):
    # conv5 head: per-row dot over all (spatial, channel) features + sigmoid.
    s = jnp.sum(x_ref[...].astype(jnp.float32) * w_ref[...],
                axis=1, keepdims=True) + b_ref[...]
    o_ref[...] = 1.0 / (1.0 + jnp.exp(-s))


# ---------------- JAX glue ----------------------------------------------------

def im2col_nhwc(x, kh, kw, stride, pad):
    # x: [N, H, W, C] -> patches [N*OH*OW, kh*kw*C], feature order (kh, kw, C).
    n, h, w, c = x.shape
    xp = jnp.pad(x, ((0, 0), (pad, pad), (pad, pad), (0, 0)))
    oh = (h + 2 * pad - kh) // stride + 1
    ow = (w + 2 * pad - kw) // stride + 1
    cols = []
    for i in range(kh):
        for j in range(kw):
            cols.append(xp[:, i:i + stride * (oh - 1) + 1:stride,
                              j:j + stride * (ow - 1) + 1:stride, :])
    patches = jnp.stack(cols, axis=3)                 # [N, OH, OW, kh*kw, C]
    patches = patches.reshape(n * oh * ow, kh * kw * c)
    return patches, oh, ow


def _prep_gemm_inputs(x_nhwc, w, stride, pad):
    cout, cin, kh, kw = w.shape
    patches, oh, ow = im2col_nhwc(x_nhwc, kh, kw, stride, pad)
    m, k = patches.shape
    cpad = _round_up(cout, LANE)
    tm = min(TM_MAX, _round_up(m, 16))
    mpad = _round_up(m, tm)
    if mpad != m:
        patches = jnp.pad(patches, ((0, mpad - m), (0, 0)))
    patches = patches.astype(jnp.bfloat16)
    w2 = w.transpose(2, 3, 1, 0).reshape(k, cout)                 # (kh,kw,cin) x cout
    if cpad != cout:
        w2 = jnp.pad(w2, ((0, 0), (0, cpad - cout)))
    w2 = w2.astype(jnp.bfloat16)
    return patches, w2, m, k, mpad, tm, cpad, cout, oh, ow


def _strip(out, n, oh, ow, cout, m):
    # Remove lane/row padding only when it exists (no-op at d=128).
    if out.shape[0] != m or out.shape[1] != cout:
        out = out[:m, :cout]
    return out.reshape(n, oh, ow, cout)


def conv_lrelu(x_nhwc, w, b, stride, pad):
    n = x_nhwc.shape[0]
    patches, w2, m, k, mpad, tm, cpad, cout, oh, ow = _prep_gemm_inputs(
        x_nhwc, w, stride, pad)
    b2 = jnp.pad(b.reshape(1, cout), ((0, 0), (0, cpad - cout))).astype(jnp.float32)
    mt = mpad // tm
    out = pl.pallas_call(
        _gemm_bias_lrelu_kernel,
        grid=(mt,),
        in_specs=[pl.BlockSpec((tm, k), lambda i: (i, 0)),
                  pl.BlockSpec((k, cpad), lambda i: (0, 0)),
                  pl.BlockSpec((1, cpad), lambda i: (0, 0))],
        out_specs=pl.BlockSpec((tm, cpad), lambda i: (i, 0)),
        out_shape=jax.ShapeDtypeStruct((mpad, cpad), jnp.bfloat16),
        compiler_params=_cparams(("parallel",)),
    )(patches, w2, b2)
    return _strip(out, n, oh, ow, cout, m)


def conv_bn_lrelu(x_nhwc, w, gamma, beta, stride, pad):
    n = x_nhwc.shape[0]
    patches, w2, m, k, mpad, tm, cpad, cout, oh, ow = _prep_gemm_inputs(
        x_nhwc, w, stride, pad)
    mt = mpad // tm
    g2 = jnp.pad(gamma.reshape(1, cout), ((0, 0), (0, cpad - cout))).astype(jnp.float32)
    be2 = jnp.pad(beta.reshape(1, cout), ((0, 0), (0, cpad - cout))).astype(jnp.float32)

    if mpad * cpad * 4 <= FUSE_Y_BYTES:
        # Fully fused: GEMM + batch stats + normalize + LeakyReLU, y in VMEM.
        out = pl.pallas_call(
            _make_fused_bn_kernel(m),
            grid=(2, mt),
            in_specs=[
                # sweep 1 pins the patch window to block 0 (fetched once, unused)
                pl.BlockSpec((tm, k), lambda s, i: (i * (1 - s), 0)),
                pl.BlockSpec((k, cpad), lambda s, i: (0, 0)),
                pl.BlockSpec((1, cpad), lambda s, i: (0, 0)),
                pl.BlockSpec((1, cpad), lambda s, i: (0, 0)),
            ],
            # sweep 0 never stores; pinning its output index to block 0 means
            # only the correct sweep-1 tiles ever hit HBM.
            out_specs=pl.BlockSpec((tm, cpad), lambda s, i: (i * s, 0)),
            out_shape=jax.ShapeDtypeStruct((mpad, cpad), jnp.bfloat16),
            scratch_shapes=[pltpu.VMEM((mpad, cpad), jnp.float32),   # y
                            pltpu.VMEM((1, cpad), jnp.float32),      # sum
                            pltpu.VMEM((1, cpad), jnp.float32),      # sumsq
                            pltpu.VMEM((1, cpad), jnp.float32),      # scale
                            pltpu.VMEM((1, cpad), jnp.float32)],     # shift
            compiler_params=_cparams(("arbitrary", "arbitrary")),
        )(patches, w2, g2, be2)
        return _strip(out, n, oh, ow, cout, m)

    # Fallback for large y: two passes over M; y round-trips HBM as bf16,
    # stats accumulate into resident scratch, scale/shift come out of pass A.
    y, scale, shift = pl.pallas_call(
        _make_gemm_stats_kernel(m),
        grid=(mt,),
        in_specs=[pl.BlockSpec((tm, k), lambda i: (i, 0)),
                  pl.BlockSpec((k, cpad), lambda i: (0, 0)),
                  pl.BlockSpec((1, cpad), lambda i: (0, 0)),
                  pl.BlockSpec((1, cpad), lambda i: (0, 0))],
        out_specs=(pl.BlockSpec((tm, cpad), lambda i: (i, 0)),
                   pl.BlockSpec((1, cpad), lambda i: (0, 0)),
                   pl.BlockSpec((1, cpad), lambda i: (0, 0))),
        out_shape=(jax.ShapeDtypeStruct((mpad, cpad), jnp.bfloat16),
                   jax.ShapeDtypeStruct((1, cpad), jnp.float32),
                   jax.ShapeDtypeStruct((1, cpad), jnp.float32)),
        scratch_shapes=[pltpu.VMEM((1, cpad), jnp.float32),
                        pltpu.VMEM((1, cpad), jnp.float32)],
        compiler_params=_cparams(("arbitrary",)),
    )(patches, w2, g2, be2)

    out = pl.pallas_call(
        _bn_lrelu_kernel,
        grid=(mt,),
        in_specs=[pl.BlockSpec((tm, cpad), lambda i: (i, 0)),
                  pl.BlockSpec((1, cpad), lambda i: (0, 0)),
                  pl.BlockSpec((1, cpad), lambda i: (0, 0))],
        out_specs=pl.BlockSpec((tm, cpad), lambda i: (i, 0)),
        out_shape=jax.ShapeDtypeStruct((mpad, cpad), jnp.bfloat16),
        compiler_params=_cparams(("parallel",)),
    )(y, scale, shift)
    return _strip(out, n, oh, ow, cout, m)


def conv_sigmoid_head(x_nhwc, w, b):
    # conv5: kernel 4x4, stride 1, pad 0 over a 4x4 map -> full contraction per
    # sample, done as a VPU row-dot + exact sigmoid (no 1-lane MXU GEMM).
    n, oh, ow, cin = x_nhwc.shape
    _, _, kh, kw = w.shape
    assert oh == kh and ow == kw, "conv5 expects spatial extent == kernel size"
    xf = x_nhwc.reshape(n, oh * ow * cin)                        # (oh, ow, cin) order
    wf = w.transpose(2, 3, 1, 0).reshape(1, kh * kw * cin)       # (kh, kw, cin) order
    out = pl.pallas_call(
        _dot_sigmoid_kernel,
        out_shape=jax.ShapeDtypeStruct((n, 1), jnp.float32),
        in_specs=[pl.BlockSpec(memory_space=pltpu.MemorySpace.VMEM)] * 3,
        out_specs=pl.BlockSpec(memory_space=pltpu.MemorySpace.VMEM),
    )(xf, wf.astype(jnp.float32), b.reshape(1, 1).astype(jnp.float32))
    return out[:, 0]


def discriminator_forward(params, x_nchw):
    # x: [N, 1, 64, 64]; single layout transpose, NHWC end-to-end afterwards.
    x = x_nchw.transpose(0, 2, 3, 1)
    x = conv_lrelu(x, params["w1"], params["b1"], 2, 1)
    x = conv_bn_lrelu(x, params["w2"], params["g2"], params["be2"], 2, 1)
    x = conv_bn_lrelu(x, params["w3"], params["g3"], params["be3"], 2, 1)
    x = conv_bn_lrelu(x, params["w4"], params["g4"], params["be4"], 2, 1)
    return conv_sigmoid_head(x, params["w5"], params["b5"])     # [N], like .squeeze()


# ---------------- Deterministic parameter init -------------------------------

def init_params(key, d=8):
    ks = jax.random.split(key, 5)

    def conv_w(k, cout, cin):
        # mirrors weight_init(mean=0, std=0.02) of the reference module
        return 0.02 * jax.random.normal(k, (cout, cin, 4, 4), jnp.float32)

    p = {}
    p["w1"], p["b1"] = conv_w(ks[0], d, 1), jnp.zeros((d,), jnp.float32)
    p["w2"], p["b2"] = conv_w(ks[1], 2 * d, d), jnp.zeros((2 * d,), jnp.float32)
    p["g2"], p["be2"] = jnp.ones((2 * d,), jnp.float32), jnp.zeros((2 * d,), jnp.float32)
    p["w3"], p["b3"] = conv_w(ks[2], 4 * d, 2 * d), jnp.zeros((4 * d,), jnp.float32)
    p["g3"], p["be3"] = jnp.ones((4 * d,), jnp.float32), jnp.zeros((4 * d,), jnp.float32)
    p["w4"], p["b4"] = conv_w(ks[3], 8 * d, 4 * d), jnp.zeros((8 * d,), jnp.float32)
    p["g4"], p["be4"] = jnp.ones((8 * d,), jnp.float32), jnp.zeros((8 * d,), jnp.float32)
    p["w5"], p["b5"] = conv_w(ks[4], 1, 8 * d), jnp.zeros((1,), jnp.float32)
    return p


if __name__ == "__main__":
    key = jax.random.PRNGKey(0)
    k_x, k_p = jax.random.split(key)
    # small d=8 (instead of 128); spatial must be 64 so conv5's 4x4/s1/p0 -> 1x1
    params = init_params(k_p, d=8)
    x = jax.random.normal(k_x, (2, 1, 64, 64), jnp.float32)

    fwd = jax.jit(discriminator_forward)
    out = jax.block_until_ready(fwd(params, x))
    assert out.shape == (2,), out.shape
    assert bool(jnp.all((out >= 0.0) & (out <= 1.0)))
    print("KERNEL_OK")
</pallas_src>

<mosaic_0001>
module attributes {stable_mosaic.version = 11 : i64} {
  func.func @_gemm_bias_lrelu_kernel(%arg0: i32, %arg1: memref<512x16xbf16, #tpu.memory_space<vmem>>, %arg2: memref<16x128xbf16, #tpu.memory_space<vmem>>, %arg3: memref<1x128xf32, #tpu.memory_space<vmem>>, %arg4: memref<512x128xbf16, #tpu.memory_space<vmem>>) attributes {dimension_semantics = [#tpu.dimension_semantics<parallel>], iteration_bounds = array<i64: 4>, scalar_prefetch = 0 : i64, scratch_operands = 0 : i64, tpu.core_type = #tpu.core_type<tc>, window_params = [{transform_indices = @transform_0, window_bounds = array<i64: 512, 16>}, {pipeline_mode = #tpu.pipeline_mode<synchronous>, transform_indices = @transform_1, window_bounds = array<i64: 16, 128>}, {pipeline_mode = #tpu.pipeline_mode<synchronous>, transform_indices = @transform_2, window_bounds = array<i64: 1, 128>}, {transform_indices = @transform_3, window_bounds = array<i64: 512, 128>}]} {
    %c0 = arith.constant 0 : index
    %c0_0 = arith.constant 0 : index
    %0 = vector.load %arg1[%c0, %c0_0] : memref<512x16xbf16, #tpu.memory_space<vmem>>, vector<512x16xbf16>
    %c0_1 = arith.constant 0 : index
    %c0_2 = arith.constant 0 : index
    %1 = vector.load %arg2[%c0_1, %c0_2] : memref<16x128xbf16, #tpu.memory_space<vmem>>, vector<16x128xbf16>
    %cst = arith.constant dense<0.000000e+00> : vector<512x128xf32>
    %2 = tpu.matmul %0, %1, %cst {dimension_numbers = #tpu.dot_dimension_numbers<[1], [0], [0], [1], [0, 0, 1, 1], [], []>} : vector<512x16xbf16>, vector<16x128xbf16>, vector<512x128xf32> -> vector<512x128xf32>
    %c0_3 = arith.constant 0 : index
    %c0_4 = arith.constant 0 : index
    %3 = vector.load %arg3[%c0_3, %c0_4] : memref<1x128xf32, #tpu.memory_space<vmem>>, vector<1x128xf32>
    %4 = vector.broadcast %3 : vector<1x128xf32> to vector<512x128xf32>
    %5 = arith.addf %2, %4 : vector<512x128xf32>
    %cst_5 = arith.constant 0.000000e+00 : f32
    %6 = vector.broadcast %cst_5 : f32 to vector<512x128xf32>
    %7 = arith.cmpf oge, %5, %6 : vector<512x128xf32>
    %cst_6 = arith.constant 2.000000e-01 : f32
    %8 = vector.broadcast %cst_6 : f32 to vector<512x128xf32>
    %9 = arith.mulf %8, %5 : vector<512x128xf32>
    %10 = arith.select %7, %5, %9 : vector<512x128xi1>, vector<512x128xf32>
    %11 = arith.truncf %10 : vector<512x128xf32> to vector<512x128xbf16>
    %c0_7 = arith.constant 0 : index
    %c0_8 = arith.constant 0 : index
    %12 = vector.load %arg4[%c0_7, %c0_8] : memref<512x128xbf16, #tpu.memory_space<vmem>>, vector<512x128xbf16>
    tpu.vector_store %arg4[%c0_7, %c0_8], %11 {strides = array<i32>} : memref<512x128xbf16, #tpu.memory_space<vmem>>, vector<512x128xbf16>,
    return
  }
  func.func @transform_0(%arg0: i32) -> (i32, i32) {
    %c0_i32 = arith.constant 0 : i32
    %c0_i32_0 = arith.constant 0 : i32
    return %arg0, %c0_i32 : i32, i32
  }
  func.func @transform_1(%arg0: i32) -> (i32, i32) {
    %c0_i32 = arith.constant 0 : i32
    %c0_i32_0 = arith.constant 0 : i32
    %c0_i32_1 = arith.constant 0 : i32
    return %c0_i32, %c0_i32_0 : i32, i32
  }
  func.func @transform_2(%arg0: i32) -> (i32, i32) {
    %c0_i32 = arith.constant 0 : i32
    %c0_i32_0 = arith.constant 0 : i32
    %c0_i32_1 = arith.constant 0 : i32
    return %c0_i32, %c0_i32_0 : i32, i32
  }
  func.func @transform_3(%arg0: i32) -> (i32, i32) {
    %c0_i32 = arith.constant 0 : i32
    %c0_i32_0 = arith.constant 0 : i32
    return %arg0, %c0_i32 : i32, i32
  }
}

module attributes {stable_mosaic.version = 11 : i64} {
  func.func @kernel(%arg0: i32, %arg1: i32, %arg2: memref<512x128xbf16, #tpu.memory_space<vmem>>, %arg3: memref<128x128xbf16, #tpu.memory_space<vmem>>, %arg4: memref<1x128xf32, #tpu.memory_space<vmem>>, %arg5: memref<1x128xf32, #tpu.memory_space<vmem>>, %arg6: memref<512x128xbf16, #tpu.memory_space<vmem>>, %arg7: memref<512x128xf32, #tpu.memory_space<vmem>>, %arg8: memref<1x128xf32, #tpu.memory_space<vmem>>, %arg9: memref<1x128xf32, #tpu.memory_space<vmem>>, %arg10: memref<1x128xf32, #tpu.memory_space<vmem>>, %arg11: memref<1x128xf32, #tpu.memory_space<vmem>>) attributes {dimension_semantics = [#tpu.dimension_semantics<arbitrary>, #tpu.dimension_semantics<arbitrary>], iteration_bounds = array<i64: 2, 1>, scalar_prefetch = 0 : i64, scratch_operands = 5 : i64, tpu.core_type = #tpu.core_type<tc>, window_params = [{transform_indices = @transform_0, window_bounds = array<i64: 512, 128>}, {pipeline_mode = #tpu.pipeline_mode<synchronous>, transform_indices = @transform_1, window_bounds = array<i64: 128, 128>}, {pipeline_mode = #tpu.pipeline_mode<synchronous>, transform_indices = @transform_2, window_bounds = array<i64: 1, 128>}, {pipeline_mode = #tpu.pipeline_mode<synchronous>, transform_indices = @transform_3, window_bounds = array<i64: 1, 128>}, {transform_indices = @transform_4, window_bounds = array<i64: 512, 128>}]} {
    %c512_i32 = arith.constant 512 : i32
    %0 = arith.muli %arg1, %c512_i32 : i32
    %1 = tpu.assume_multiple %0, 512 : i32
    %c0_i32 = arith.constant 0 : i32
    %2 = arith.cmpi eq, %arg0, %c0_i32 : i32
    %c0_i32_0 = arith.constant 0 : i32
    %3 = arith.cmpi eq, %arg1, %c0_i32_0 : i32
    %4 = arith.andi %2, %3 : i1
    %5 = arith.extui %4 : i1 to i32
    %c0_i32_1 = arith.constant 0 : i32
    %6 = arith.cmpi ne, %5, %c0_i32_1 : i32
    scf.if %6 {
      %cst = arith.constant 0.000000e+00 : f32
      %18 = vector.broadcast %cst : f32 to vector<1x128xf32>
      %c0 = arith.constant 0 : index
      %c0_8 = arith.constant 0 : index
      %19 = vector.load %arg8[%c0, %c0_8] : memref<1x128xf32, #tpu.memory_space<vmem>>, vector<1x128xf32>
      tpu.vector_store %arg8[%c0, %c0_8], %18 {strides = array<i32>} : memref<1x128xf32, #tpu.memory_space<vmem>>, vector<1x128xf32>,
      %cst_9 = arith.constant 0.000000e+00 : f32
      %20 = vector.broadcast %cst_9 : f32 to vector<1x128xf32>
      %c0_10 = arith.constant 0 : index
      %c0_11 = arith.constant 0 : index
      %21 = vector.load %arg9[%c0_10, %c0_11] : memref<1x128xf32, #tpu.memory_space<vmem>>, vector<1x128xf32>
      tpu.vector_store %arg9[%c0_10, %c0_11], %20 {strides = array<i32>} : memref<1x128xf32, #tpu.memory_space<vmem>>, vector<1x128xf32>,
    } else {
    }
    %c0_i32_2 = arith.constant 0 : i32
    %7 = arith.cmpi eq, %arg0, %c0_i32_2 : i32
    %8 = arith.extui %7 : i1 to i32
    %c0_i32_3 = arith.constant 0 : i32
    %9 = arith.cmpi ne, %8, %c0_i32_3 : i32
    scf.if %9 {
      %c0 = arith.constant 0 : index
      %c0_8 = arith.constant 0 : index
      %18 = vector.load %arg2[%c0, %c0_8] : memref<512x128xbf16, #tpu.memory_space<vmem>>, vector<512x128xbf16>
      %c0_9 = arith.constant 0 : index
      %c0_10 = arith.constant 0 : index
      %19 = vector.load %arg3[%c0_9, %c0_10] : memref<128x128xbf16, #tpu.memory_space<vmem>>, vector<128x128xbf16>
      %cst = arith.constant dense<0.000000e+00> : vector<512x128xf32>
      %20 = tpu.matmul %18, %19, %cst {dimension_numbers = #tpu.dot_dimension_numbers<[1], [0], [0], [1], [0, 0, 1, 1], [], []>} : vector<512x128xbf16>, vector<128x128xbf16>, vector<512x128xf32> -> vector<512x128xf32>
      %21 = arith.index_cast %1 : i32 to index
      %c0_11 = arith.constant 0 : index
      %22 = vector.load %arg7[%21, %c0_11] : memref<512x128xf32, #tpu.memory_space<vmem>>, vector<512x128xf32>
      tpu.vector_store %arg7[%21, %c0_11], %20 {strides = array<i32>} : memref<512x128xf32, #tpu.memory_space<vmem>>, vector<512x128xf32>,
      %c0_12 = arith.constant 0 : index
      %c0_13 = arith.constant 0 : index
      %23 = vector.load %arg8[%c0_12, %c0_13] : memref<1x128xf32, #tpu.memory_space<vmem>>, vector<1x128xf32>
      %cst_14 = arith.constant dense<0.000000e+00> : vector<128xf32>
      %24 = vector.multi_reduction <add>, %20, %cst_14 [0] : vector<512x128xf32> to vector<128xf32>
      %25 = vector.shape_cast %24 : vector<128xf32> to vector<1x128xf32>
      %26 = arith.addf %23, %25 : vector<1x128xf32>
      %c0_15 = arith.constant 0 : index
      %c0_16 = arith.constant 0 : index
      %27 = vector.load %arg8[%c0_15, %c0_16] : memref<1x128xf32, #tpu.memory_space<vmem>>, vector<1x128xf32>
      tpu.vector_store %arg8[%c0_15, %c0_16], %26 {strides = array<i32>} : memref<1x128xf32, #tpu.memory_space<vmem>>, vector<1x128xf32>,
      %c0_17 = arith.constant 0 : index
      %c0_18 = arith.constant 0 : index
      %28 = vector.load %arg9[%c0_17, %c0_18] : memref<1x128xf32, #tpu.memory_space<vmem>>, vector<1x128xf32>
      %29 = arith.mulf %20, %20 : vector<512x128xf32>
      %cst_19 = arith.constant dense<0.000000e+00> : vector<128xf32>
      %30 = vector.multi_reduction <add>, %29, %cst_19 [0] : vector<512x128xf32> to vector<128xf32>
      %31 = vector.shape_cast %30 : vector<128xf32> to vector<1x128xf32>
      %32 = arith.addf %28, %31 : vector<1x128xf32>
      %c0_20 = arith.constant 0 : index
      %c0_21 = arith.constant 0 : index
      %33 = vector.load %arg9[%c0_20, %c0_21] : memref<1x128xf32, #tpu.memory_space<vmem>>, vector<1x128xf32>
      tpu.vector_store %arg9[%c0_20, %c0_21], %32 {strides = array<i32>} : memref<1x128xf32, #tpu.memory_space<vmem>>, vector<1x128xf32>,
    } else {
    }
    %c0_i32_4 = arith.constant 0 : i32
    %10 = arith.cmpi eq, %arg0, %c0_i32_4 : i32
    %c0_i32_5 = arith.constant 0 : i32
    %11 = arith.cmpi eq, %arg1, %c0_i32_5 : i32
    %12 = arith.andi %10, %11 : i1
    %13 = arith.extui %12 : i1 to i32
    %c0_i32_6 = arith.constant 0 : i32
    %14 = arith.cmpi ne, %13, %c0_i32_6 : i32
    scf.if %14 {
      %c0 = arith.constant 0 : index
      %c0_8 = arith.constant 0 : index
      %18 = vector.load %arg8[%c0, %c0_8] : memref<1x128xf32, #tpu.memory_space<vmem>>, vector<1x128xf32>
      %cst = arith.constant 0.001953125 : f32
      %19 = vector.broadcast %cst : f32 to vector<1x128xf32>
      %20 = arith.mulf %18, %19 : vector<1x128xf32>
      %c0_9 = arith.constant 0 : index
      %c0_10 = arith.constant 0 : index
      %21 = vector.load %arg9[%c0_9, %c0_10] : memref<1x128xf32, #tpu.memory_space<vmem>>, vector<1x128xf32>
      %cst_11 = arith.constant 0.001953125 : f32
      %22 = vector.broadcast %cst_11 : f32 to vector<1x128xf32>
      %23 = arith.mulf %21, %22 : vector<1x128xf32>
      %24 = arith.mulf %20, %20 : vector<1x128xf32>
      %25 = arith.subf %23, %24 : vector<1x128xf32>
      %cst_12 = arith.constant 0.000000e+00 : f32
      %26 = vector.broadcast %cst_12 : f32 to vector<1x128xf32>
      %27 = arith.maximumf %25, %26 : vector<1x128xf32>
      %c0_13 = arith.constant 0 : index
      %c0_14 = arith.constant 0 : index
      %28 = vector.load %arg4[%c0_13, %c0_14] : memref<1x128xf32, #tpu.memory_space<vmem>>, vector<1x128xf32>
      %cst_15 = arith.constant 9.99999974E-6 : f32
      %29 = vector.broadcast %cst_15 : f32 to vector<1x128xf32>
      %30 = arith.addf %27, %29 : vector<1x128xf32>
      %31 = math.rsqrt %30 : vector<1x128xf32>
      %32 = arith.mulf %28, %31 : vector<1x128xf32>
      %c0_16 = arith.constant 0 : index
      %c0_17 = arith.constant 0 : index
      %33 = vector.load %arg10[%c0_16, %c0_17] : memref<1x128xf32, #tpu.memory_space<vmem>>, vector<1x128xf32>
      tpu.vector_store %arg10[%c0_16, %c0_17], %32 {strides = array<i32>} : memref<1x128xf32, #tpu.memory_space<vmem>>, vector<1x128xf32>,
      %c0_18 = arith.constant 0 : index
      %c0_19 = arith.constant 0 : index
      %34 = vector.load %arg5[%c0_18, %c0_19] : memref<1x128xf32, #tpu.memory_space<vmem>>, vector<1x128xf32>
      %35 = arith.mulf %20, %32 : vector<1x128xf32>
      %36 = arith.subf %34, %35 : vector<1x128xf32>
      %c0_20 = arith.constant 0 : index
      %c0_21 = arith.constant 0 : index
      %37 = vector.load %arg11[%c0_20, %c0_21] : memref<1x128xf32, #tpu.memory_space<vmem>>, vector<1x128xf32>
      tpu.vector_store %arg11[%c0_20, %c0_21], %36 {strides = array<i32>} : memref<1x128xf32, #tpu.memory_space<vmem>>, vector<1x128xf32>,
    } else {
    }
    %c1_i32 = arith.constant 1 : i32
    %15 = arith.cmpi eq, %arg0, %c1_i32 : i32
    %16 = arith.extui %15 : i1 to i32
    %c0_i32_7 = arith.constant 0 : i32
    %17 = arith.cmpi ne, %16, %c0_i32_7 : i32
    scf.if %17 {
      %18 = arith.index_cast %1 : i32 to index
      %c0 = arith.constant 0 : index
      %19 = vector.load %arg7[%18, %c0] : memref<512x128xf32, #tpu.memory_space<vmem>>, vector<512x128xf32>
      %c0_8 = arith.constant 0 : index
      %c0_9 = arith.constant 0 : index
      %20 = vector.load %arg10[%c0_8, %c0_9] : memref<1x128xf32, #tpu.memory_space<vmem>>, vector<1x128xf32>
      %21 = vector.broadcast %20 : vector<1x128xf32> to vector<512x128xf32>
      %22 = arith.mulf %19, %21 : vector<512x128xf32>
      %c0_10 = arith.constant 0 : index
      %c0_11 = arith.constant 0 : index
      %23 = vector.load %arg11[%c0_10, %c0_11] : memref<1x128xf32, #tpu.memory_space<vmem>>, vector<1x128xf32>
      %24 = vector.broadcast %23 : vector<1x128xf32> to vector<512x128xf32>
      %25 = arith.addf %22, %24 : vector<512x128xf32>
      %cst = arith.constant 0.000000e+00 : f32
      %26 = vector.broadcast %cst : f32 to vector<512x128xf32>
      %27 = arith.cmpf oge, %25, %26 : vector<512x128xf32>
      %cst_12 = arith.constant 2.000000e-01 : f32
      %28 = vector.broadcast %cst_12 : f32 to vector<512x128xf32>
      %29 = arith.mulf %28, %25 : vector<512x128xf32>
      %30 = arith.select %27, %25, %29 : vector<512x128xi1>, vector<512x128xf32>
      %31 = arith.truncf %30 : vector<512x128xf32> to vector<512x128xbf16>
      %c0_13 = arith.constant 0 : index
      %c0_14 = arith.constant 0 : index
      %32 = vector.load %arg6[%c0_13, %c0_14] : memref<512x128xbf16, #tpu.memory_space<vmem>>, vector<512x128xbf16>
      tpu.vector_store %arg6[%c0_13, %c0_14], %31 {strides = array<i32>} : memref<512x128xbf16, #tpu.memory_space<vmem>>, vector<512x128xbf16>,
    } else {
    }
    return
  }
  func.func @transform_0(%arg0: i32, %arg1: i32) -> (i32, i32) {
    %c1_i32 = arith.constant 1 : i32
    %0 = arith.subi %c1_i32, %arg0 : i32
    %1 = arith.muli %arg1, %0 : i32
    %c0_i32 = arith.constant 0 : i32
    %c0_i32_0 = arith.constant 0 : i32
    return %1, %c0_i32 : i32, i32
  }
  func.func @transform_1(%arg0: i32, %arg1: i32) -> (i32, i32) {
    %c0_i32 = arith.constant 0 : i32
    %c0_i32_0 = arith.constant 0 : i32
    %c0_i32_1 = arith.constant 0 : i32
    return %c0_i32, %c0_i32_0 : i32, i32
  }
  func.func @transform_2(%arg0: i32, %arg1: i32) -> (i32, i32) {
    %c0_i32 = arith.constant 0 : i32
    %c0_i32_0 = arith.constant 0 : i32
    %c0_i32_1 = arith.constant 0 : i32
    return %c0_i32, %c0_i32_0 : i32, i32
  }
  func.func @transform_3(%arg0: i32, %arg1: i32) -> (i32, i32) {
    %c0_i32 = arith.constant 0 : i32
    %c0_i32_0 = arith.constant 0 : i32
    %c0_i32_1 = arith.constant 0 : i32
    return %c0_i32, %c0_i32_0 : i32, i32
  }
  func.func @transform_4(%arg0: i32, %arg1: i32) -> (i32, i32) {
    %0 = arith.muli %arg1, %arg0 : i32
    %c0_i32 = arith.constant 0 : i32
    %c0_i32_0 = arith.constant 0 : i32
    return %0, %c0_i32 : i32, i32
  }
}

module attributes {stable_mosaic.version = 11 : i64} {
  func.func @kernel(%arg0: i32, %arg1: i32, %arg2: memref<128x256xbf16, #tpu.memory_space<vmem>>, %arg3: memref<256x128xbf16, #tpu.memory_space<vmem>>, %arg4: memref<1x128xf32, #tpu.memory_space<vmem>>, %arg5: memref<1x128xf32, #tpu.memory_space<vmem>>, %arg6: memref<128x128xbf16, #tpu.memory_space<vmem>>, %arg7: memref<128x128xf32, #tpu.memory_space<vmem>>, %arg8: memref<1x128xf32, #tpu.memory_space<vmem>>, %arg9: memref<1x128xf32, #tpu.memory_space<vmem>>, %arg10: memref<1x128xf32, #tpu.memory_space<vmem>>, %arg11: memref<1x128xf32, #tpu.memory_space<vmem>>) attributes {dimension_semantics = [#tpu.dimension_semantics<arbitrary>, #tpu.dimension_semantics<arbitrary>], iteration_bounds = array<i64: 2, 1>, scalar_prefetch = 0 : i64, scratch_operands = 5 : i64, tpu.core_type = #tpu.core_type<tc>, window_params = [{transform_indices = @transform_0, window_bounds = array<i64: 128, 256>}, {pipeline_mode = #tpu.pipeline_mode<synchronous>, transform_indices = @transform_1, window_bounds = array<i64: 256, 128>}, {pipeline_mode = #tpu.pipeline_mode<synchronous>, transform_indices = @transform_2, window_bounds = array<i64: 1, 128>}, {pipeline_mode = #tpu.pipeline_mode<synchronous>, transform_indices = @transform_3, window_bounds = array<i64: 1, 128>}, {transform_indices = @transform_4, window_bounds = array<i64: 128, 128>}]} {
    %c128_i32 = arith.constant 128 : i32
    %0 = arith.muli %arg1, %c128_i32 : i32
    %1 = tpu.assume_multiple %0, 128 : i32
    %c0_i32 = arith.constant 0 : i32
    %2 = arith.cmpi eq, %arg0, %c0_i32 : i32
    %c0_i32_0 = arith.constant 0 : i32
    %3 = arith.cmpi eq, %arg1, %c0_i32_0 : i32
    %4 = arith.andi %2, %3 : i1
    %5 = arith.extui %4 : i1 to i32
    %c0_i32_1 = arith.constant 0 : i32
    %6 = arith.cmpi ne, %5, %c0_i32_1 : i32
    scf.if %6 {
      %cst = arith.constant 0.000000e+00 : f32
      %18 = vector.broadcast %cst : f32 to vector<1x128xf32>
      %c0 = arith.constant 0 : index
      %c0_8 = arith.constant 0 : index
      %19 = vector.load %arg8[%c0, %c0_8] : memref<1x128xf32, #tpu.memory_space<vmem>>, vector<1x128xf32>
      tpu.vector_store %arg8[%c0, %c0_8], %18 {strides = array<i32>} : memref<1x128xf32, #tpu.memory_space<vmem>>, vector<1x128xf32>,
      %cst_9 = arith.constant 0.000000e+00 : f32
      %20 = vector.broadcast %cst_9 : f32 to vector<1x128xf32>
      %c0_10 = arith.constant 0 : index
      %c0_11 = arith.constant 0 : index
      %21 = vector.load %arg9[%c0_10, %c0_11] : memref<1x128xf32, #tpu.memory_space<vmem>>, vector<1x128xf32>
      tpu.vector_store %arg9[%c0_10, %c0_11], %20 {strides = array<i32>} : memref<1x128xf32, #tpu.memory_space<vmem>>, vector<1x128xf32>,
    } else {
    }
    %c0_i32_2 = arith.constant 0 : i32
    %7 = arith.cmpi eq, %arg0, %c0_i32_2 : i32
    %8 = arith.extui %7 : i1 to i32
    %c0_i32_3 = arith.constant 0 : i32
    %9 = arith.cmpi ne, %8, %c0_i32_3 : i32
    scf.if %9 {
      %c0 = arith.constant 0 : index
      %c0_8 = arith.constant 0 : index
      %18 = vector.load %arg2[%c0, %c0_8] : memref<128x256xbf16, #tpu.memory_space<vmem>>, vector<128x256xbf16>
      %c0_9 = arith.constant 0 : index
      %c0_10 = arith.constant 0 : index
      %19 = vector.load %arg3[%c0_9, %c0_10] : memref<256x128xbf16, #tpu.memory_space<vmem>>, vector<256x128xbf16>
      %cst = arith.constant dense<0.000000e+00> : vector<128x128xf32>
      %20 = tpu.matmul %18, %19, %cst {dimension_numbers = #tpu.dot_dimension_numbers<[1], [0], [0], [1], [0, 0, 1, 1], [], []>} : vector<128x256xbf16>, vector<256x128xbf16>, vector<128x128xf32> -> vector<128x128xf32>
      %21 = arith.index_cast %1 : i32 to index
      %c0_11 = arith.constant 0 : index
      %22 = vector.load %arg7[%21, %c0_11] : memref<128x128xf32, #tpu.memory_space<vmem>>, vector<128x128xf32>
      tpu.vector_store %arg7[%21, %c0_11], %20 {strides = array<i32>} : memref<128x128xf32, #tpu.memory_space<vmem>>, vector<128x128xf32>,
      %c0_12 = arith.constant 0 : index
      %c0_13 = arith.constant 0 : index
      %23 = vector.load %arg8[%c0_12, %c0_13] : memref<1x128xf32, #tpu.memory_space<vmem>>, vector<1x128xf32>
      %cst_14 = arith.constant dense<0.000000e+00> : vector<128xf32>
      %24 = vector.multi_reduction <add>, %20, %cst_14 [0] : vector<128x128xf32> to vector<128xf32>
      %25 = vector.shape_cast %24 : vector<128xf32> to vector<1x128xf32>
      %26 = arith.addf %23, %25 : vector<1x128xf32>
      %c0_15 = arith.constant 0 : index
      %c0_16 = arith.constant 0 : index
      %27 = vector.load %arg8[%c0_15, %c0_16] : memref<1x128xf32, #tpu.memory_space<vmem>>, vector<1x128xf32>
      tpu.vector_store %arg8[%c0_15, %c0_16], %26 {strides = array<i32>} : memref<1x128xf32, #tpu.memory_space<vmem>>, vector<1x128xf32>,
      %c0_17 = arith.constant 0 : index
      %c0_18 = arith.constant 0 : index
      %28 = vector.load %arg9[%c0_17, %c0_18] : memref<1x128xf32, #tpu.memory_space<vmem>>, vector<1x128xf32>
      %29 = arith.mulf %20, %20 : vector<128x128xf32>
      %cst_19 = arith.constant dense<0.000000e+00> : vector<128xf32>
      %30 = vector.multi_reduction <add>, %29, %cst_19 [0] : vector<128x128xf32> to vector<128xf32>
      %31 = vector.shape_cast %30 : vector<128xf32> to vector<1x128xf32>
      %32 = arith.addf %28, %31 : vector<1x128xf32>
      %c0_20 = arith.constant 0 : index
      %c0_21 = arith.constant 0 : index
      %33 = vector.load %arg9[%c0_20, %c0_21] : memref<1x128xf32, #tpu.memory_space<vmem>>, vector<1x128xf32>
      tpu.vector_store %arg9[%c0_20, %c0_21], %32 {strides = array<i32>} : memref<1x128xf32, #tpu.memory_space<vmem>>, vector<1x128xf32>,
    } else {
    }
    %c0_i32_4 = arith.constant 0 : i32
    %10 = arith.cmpi eq, %arg0, %c0_i32_4 : i32
    %c0_i32_5 = arith.constant 0 : i32
    %11 = arith.cmpi eq, %arg1, %c0_i32_5 : i32
    %12 = arith.andi %10, %11 : i1
    %13 = arith.extui %12 : i1 to i32
    %c0_i32_6 = arith.constant 0 : i32
    %14 = arith.cmpi ne, %13, %c0_i32_6 : i32
    scf.if %14 {
      %c0 = arith.constant 0 : index
      %c0_8 = arith.constant 0 : index
      %18 = vector.load %arg8[%c0, %c0_8] : memref<1x128xf32, #tpu.memory_space<vmem>>, vector<1x128xf32>
      %cst = arith.constant 7.812500e-03 : f32
      %19 = vector.broadcast %cst : f32 to vector<1x128xf32>
      %20 = arith.mulf %18, %19 : vector<1x128xf32>
      %c0_9 = arith.constant 0 : index
      %c0_10 = arith.constant 0 : index
      %21 = vector.load %arg9[%c0_9, %c0_10] : memref<1x128xf32, #tpu.memory_space<vmem>>, vector<1x128xf32>
      %cst_11 = arith.constant 7.812500e-03 : f32
      %22 = vector.broadcast %cst_11 : f32 to vector<1x128xf32>
      %23 = arith.mulf %21, %22 : vector<1x128xf32>
      %24 = arith.mulf %20, %20 : vector<1x128xf32>
      %25 = arith.subf %23, %24 : vector<1x128xf32>
      %cst_12 = arith.constant 0.000000e+00 : f32
      %26 = vector.broadcast %cst_12 : f32 to vector<1x128xf32>
      %27 = arith.maximumf %25, %26 : vector<1x128xf32>
      %c0_13 = arith.constant 0 : index
      %c0_14 = arith.constant 0 : index
      %28 = vector.load %arg4[%c0_13, %c0_14] : memref<1x128xf32, #tpu.memory_space<vmem>>, vector<1x128xf32>
      %cst_15 = arith.constant 9.99999974E-6 : f32
      %29 = vector.broadcast %cst_15 : f32 to vector<1x128xf32>
      %30 = arith.addf %27, %29 : vector<1x128xf32>
      %31 = math.rsqrt %30 : vector<1x128xf32>
      %32 = arith.mulf %28, %31 : vector<1x128xf32>
      %c0_16 = arith.constant 0 : index
      %c0_17 = arith.constant 0 : index
      %33 = vector.load %arg10[%c0_16, %c0_17] : memref<1x128xf32, #tpu.memory_space<vmem>>, vector<1x128xf32>
      tpu.vector_store %arg10[%c0_16, %c0_17], %32 {strides = array<i32>} : memref<1x128xf32, #tpu.memory_space<vmem>>, vector<1x128xf32>,
      %c0_18 = arith.constant 0 : index
      %c0_19 = arith.constant 0 : index
      %34 = vector.load %arg5[%c0_18, %c0_19] : memref<1x128xf32, #tpu.memory_space<vmem>>, vector<1x128xf32>
      %35 = arith.mulf %20, %32 : vector<1x128xf32>
      %36 = arith.subf %34, %35 : vector<1x128xf32>
      %c0_20 = arith.constant 0 : index
      %c0_21 = arith.constant 0 : index
      %37 = vector.load %arg11[%c0_20, %c0_21] : memref<1x128xf32, #tpu.memory_space<vmem>>, vector<1x128xf32>
      tpu.vector_store %arg11[%c0_20, %c0_21], %36 {strides = array<i32>} : memref<1x128xf32, #tpu.memory_space<vmem>>, vector<1x128xf32>,
    } else {
    }
    %c1_i32 = arith.constant 1 : i32
    %15 = arith.cmpi eq, %arg0, %c1_i32 : i32
    %16 = arith.extui %15 : i1 to i32
    %c0_i32_7 = arith.constant 0 : i32
    %17 = arith.cmpi ne, %16, %c0_i32_7 : i32
    scf.if %17 {
      %18 = arith.index_cast %1 : i32 to index
      %c0 = arith.constant 0 : index
      %19 = vector.load %arg7[%18, %c0] : memref<128x128xf32, #tpu.memory_space<vmem>>, vector<128x128xf32>
      %c0_8 = arith.constant 0 : index
      %c0_9 = arith.constant 0 : index
      %20 = vector.load %arg10[%c0_8, %c0_9] : memref<1x128xf32, #tpu.memory_space<vmem>>, vector<1x128xf32>
      %21 = vector.broadcast %20 : vector<1x128xf32> to vector<128x128xf32>
      %22 = arith.mulf %19, %21 : vector<128x128xf32>
      %c0_10 = arith.constant 0 : index
      %c0_11 = arith.constant 0 : index
      %23 = vector.load %arg11[%c0_10, %c0_11] : memref<1x128xf32, #tpu.memory_space<vmem>>, vector<1x128xf32>
      %24 = vector.broadcast %23 : vector<1x128xf32> to vector<128x128xf32>
      %25 = arith.addf %22, %24 : vector<128x128xf32>
      %cst = arith.constant 0.000000e+00 : f32
      %26 = vector.broadcast %cst : f32 to vector<128x128xf32>
      %27 = arith.cmpf oge, %25, %26 : vector<128x128xf32>
      %cst_12 = arith.constant 2.000000e-01 : f32
      %28 = vector.broadcast %cst_12 : f32 to vector<128x128xf32>
      %29 = arith.mulf %28, %25 : vector<128x128xf32>
      %30 = arith.select %27, %25, %29 : vector<128x128xi1>, vector<128x128xf32>
      %31 = arith.truncf %30 : vector<128x128xf32> to vector<128x128xbf16>
      %c0_13 = arith.constant 0 : index
      %c0_14 = arith.constant 0 : index
      %32 = vector.load %arg6[%c0_13, %c0_14] : memref<128x128xbf16, #tpu.memory_space<vmem>>, vector<128x128xbf16>
      tpu.vector_store %arg6[%c0_13, %c0_14], %31 {strides = array<i32>} : memref<128x128xbf16, #tpu.memory_space<vmem>>, vector<128x128xbf16>,
    } else {
    }
    return
  }
  func.func @transform_0(%arg0: i32, %arg1: i32) -> (i32, i32) {
    %c1_i32 = arith.constant 1 : i32
    %0 = arith.subi %c1_i32, %arg0 : i32
    %1 = arith.muli %arg1, %0 : i32
    %c0_i32 = arith.constant 0 : i32
    %c0_i32_0 = arith.constant 0 : i32
    return %1, %c0_i32 : i32, i32
  }
  func.func @transform_1(%arg0: i32, %arg1: i32) -> (i32, i32) {
    %c0_i32 = arith.constant 0 : i32
    %c0_i32_0 = arith.constant 0 : i32
    %c0_i32_1 = arith.constant 0 : i32
    return %c0_i32, %c0_i32_0 : i32, i32
  }
  func.func @transform_2(%arg0: i32, %arg1: i32) -> (i32, i32) {
    %c0_i32 = arith.constant 0 : i32
    %c0_i32_0 = arith.constant 0 : i32
    %c0_i32_1 = arith.constant 0 : i32
    return %c0_i32, %c0_i32_0 : i32, i32
  }
  func.func @transform_3(%arg0: i32, %arg1: i32) -> (i32, i32) {
    %c0_i32 = arith.constant 0 : i32
    %c0_i32_0 = arith.constant 0 : i32
    %c0_i32_1 = arith.constant 0 : i32
    return %c0_i32, %c0_i32_0 : i32, i32
  }
  func.func @transform_4(%arg0: i32, %arg1: i32) -> (i32, i32) {
    %0 = arith.muli %arg1, %arg0 : i32
    %c0_i32 = arith.constant 0 : i32
    %c0_i32_0 = arith.constant 0 : i32
    return %0, %c0_i32 : i32, i32
  }
}

module attributes {stable_mosaic.version = 11 : i64} {
  func.func @kernel(%arg0: i32, %arg1: i32, %arg2: memref<32x512xbf16, #tpu.memory_space<vmem>>, %arg3: memref<512x128xbf16, #tpu.memory_space<vmem>>, %arg4: memref<1x128xf32, #tpu.memory_space<vmem>>, %arg5: memref<1x128xf32, #tpu.memory_space<vmem>>, %arg6: memref<32x128xbf16, #tpu.memory_space<vmem>>, %arg7: memref<32x128xf32, #tpu.memory_space<vmem>>, %arg8: memref<1x128xf32, #tpu.memory_space<vmem>>, %arg9: memref<1x128xf32, #tpu.memory_space<vmem>>, %arg10: memref<1x128xf32, #tpu.memory_space<vmem>>, %arg11: memref<1x128xf32, #tpu.memory_space<vmem>>) attributes {dimension_semantics = [#tpu.dimension_semantics<arbitrary>, #tpu.dimension_semantics<arbitrary>], iteration_bounds = array<i64: 2, 1>, scalar_prefetch = 0 : i64, scratch_operands = 5 : i64, tpu.core_type = #tpu.core_type<tc>, window_params = [{transform_indices = @transform_0, window_bounds = array<i64: 32, 512>}, {pipeline_mode = #tpu.pipeline_mode<synchronous>, transform_indices = @transform_1, window_bounds = array<i64: 512, 128>}, {pipeline_mode = #tpu.pipeline_mode<synchronous>, transform_indices = @transform_2, window_bounds = array<i64: 1, 128>}, {pipeline_mode = #tpu.pipeline_mode<synchronous>, transform_indices = @transform_3, window_bounds = array<i64: 1, 128>}, {transform_indices = @transform_4, window_bounds = array<i64: 32, 128>}]} {
    %c32_i32 = arith.constant 32 : i32
    %0 = arith.muli %arg1, %c32_i32 : i32
    %1 = tpu.assume_multiple %0, 32 : i32
    %c0_i32 = arith.constant 0 : i32
    %2 = arith.cmpi eq, %arg0, %c0_i32 : i32
    %c0_i32_0 = arith.constant 0 : i32
    %3 = arith.cmpi eq, %arg1, %c0_i32_0 : i32
    %4 = arith.andi %2, %3 : i1
    %5 = arith.extui %4 : i1 to i32
    %c0_i32_1 = arith.constant 0 : i32
    %6 = arith.cmpi ne, %5, %c0_i32_1 : i32
    scf.if %6 {
      %cst = arith.constant 0.000000e+00 : f32
      %18 = vector.broadcast %cst : f32 to vector<1x128xf32>
      %c0 = arith.constant 0 : index
      %c0_8 = arith.constant 0 : index
      %19 = vector.load %arg8[%c0, %c0_8] : memref<1x128xf32, #tpu.memory_space<vmem>>, vector<1x128xf32>
      tpu.vector_store %arg8[%c0, %c0_8], %18 {strides = array<i32>} : memref<1x128xf32, #tpu.memory_space<vmem>>, vector<1x128xf32>,
      %cst_9 = arith.constant 0.000000e+00 : f32
      %20 = vector.broadcast %cst_9 : f32 to vector<1x128xf32>
      %c0_10 = arith.constant 0 : index
      %c0_11 = arith.constant 0 : index
      %21 = vector.load %arg9[%c0_10, %c0_11] : memref<1x128xf32, #tpu.memory_space<vmem>>, vector<1x128xf32>
      tpu.vector_store %arg9[%c0_10, %c0_11], %20 {strides = array<i32>} : memref<1x128xf32, #tpu.memory_space<vmem>>, vector<1x128xf32>,
    } else {
    }
    %c0_i32_2 = arith.constant 0 : i32
    %7 = arith.cmpi eq, %arg0, %c0_i32_2 : i32
    %8 = arith.extui %7 : i1 to i32
    %c0_i32_3 = arith.constant 0 : i32
    %9 = arith.cmpi ne, %8, %c0_i32_3 : i32
    scf.if %9 {
      %c0 = arith.constant 0 : index
      %c0_8 = arith.constant 0 : index
      %18 = vector.load %arg2[%c0, %c0_8] : memref<32x512xbf16, #tpu.memory_space<vmem>>, vector<32x512xbf16>
      %c0_9 = arith.constant 0 : index
      %c0_10 = arith.constant 0 : index
      %19 = vector.load %arg3[%c0_9, %c0_10] : memref<512x128xbf16, #tpu.memory_space<vmem>>, vector<512x128xbf16>
      %cst = arith.constant dense<0.000000e+00> : vector<32x128xf32>
      %20 = tpu.matmul %18, %19, %cst {dimension_numbers = #tpu.dot_dimension_numbers<[1], [0], [0], [1], [0, 0, 1, 1], [], []>} : vector<32x512xbf16>, vector<512x128xbf16>, vector<32x128xf32> -> vector<32x128xf32>
      %21 = arith.index_cast %1 : i32 to index
      %c0_11 = arith.constant 0 : index
      %22 = vector.load %arg7[%21, %c0_11] : memref<32x128xf32, #tpu.memory_space<vmem>>, vector<32x128xf32>
      tpu.vector_store %arg7[%21, %c0_11], %20 {strides = array<i32>} : memref<32x128xf32, #tpu.memory_space<vmem>>, vector<32x128xf32>,
      %c0_12 = arith.constant 0 : index
      %c0_13 = arith.constant 0 : index
      %23 = vector.load %arg8[%c0_12, %c0_13] : memref<1x128xf32, #tpu.memory_space<vmem>>, vector<1x128xf32>
      %cst_14 = arith.constant dense<0.000000e+00> : vector<128xf32>
      %24 = vector.multi_reduction <add>, %20, %cst_14 [0] : vector<32x128xf32> to vector<128xf32>
      %25 = vector.shape_cast %24 : vector<128xf32> to vector<1x128xf32>
      %26 = arith.addf %23, %25 : vector<1x128xf32>
      %c0_15 = arith.constant 0 : index
      %c0_16 = arith.constant 0 : index
      %27 = vector.load %arg8[%c0_15, %c0_16] : memref<1x128xf32, #tpu.memory_space<vmem>>, vector<1x128xf32>
      tpu.vector_store %arg8[%c0_15, %c0_16], %26 {strides = array<i32>} : memref<1x128xf32, #tpu.memory_space<vmem>>, vector<1x128xf32>,
      %c0_17 = arith.constant 0 : index
      %c0_18 = arith.constant 0 : index
      %28 = vector.load %arg9[%c0_17, %c0_18] : memref<1x128xf32, #tpu.memory_space<vmem>>, vector<1x128xf32>
      %29 = arith.mulf %20, %20 : vector<32x128xf32>
      %cst_19 = arith.constant dense<0.000000e+00> : vector<128xf32>
      %30 = vector.multi_reduction <add>, %29, %cst_19 [0] : vector<32x128xf32> to vector<128xf32>
      %31 = vector.shape_cast %30 : vector<128xf32> to vector<1x128xf32>
      %32 = arith.addf %28, %31 : vector<1x128xf32>
      %c0_20 = arith.constant 0 : index
      %c0_21 = arith.constant 0 : index
      %33 = vector.load %arg9[%c0_20, %c0_21] : memref<1x128xf32, #tpu.memory_space<vmem>>, vector<1x128xf32>
      tpu.vector_store %arg9[%c0_20, %c0_21], %32 {strides = array<i32>} : memref<1x128xf32, #tpu.memory_space<vmem>>, vector<1x128xf32>,
    } else {
    }
    %c0_i32_4 = arith.constant 0 : i32
    %10 = arith.cmpi eq, %arg0, %c0_i32_4 : i32
    %c0_i32_5 = arith.constant 0 : i32
    %11 = arith.cmpi eq, %arg1, %c0_i32_5 : i32
    %12 = arith.andi %10, %11 : i1
    %13 = arith.extui %12 : i1 to i32
    %c0_i32_6 = arith.constant 0 : i32
    %14 = arith.cmpi ne, %13, %c0_i32_6 : i32
    scf.if %14 {
      %c0 = arith.constant 0 : index
      %c0_8 = arith.constant 0 : index
      %18 = vector.load %arg8[%c0, %c0_8] : memref<1x128xf32, #tpu.memory_space<vmem>>, vector<1x128xf32>
      %cst = arith.constant 3.125000e-02 : f32
      %19 = vector.broadcast %cst : f32 to vector<1x128xf32>
      %20 = arith.mulf %18, %19 : vector<1x128xf32>
      %c0_9 = arith.constant 0 : index
      %c0_10 = arith.constant 0 : index
      %21 = vector.load %arg9[%c0_9, %c0_10] : memref<1x128xf32, #tpu.memory_space<vmem>>, vector<1x128xf32>
      %cst_11 = arith.constant 3.125000e-02 : f32
      %22 = vector.broadcast %cst_11 : f32 to vector<1x128xf32>
      %23 = arith.mulf %21, %22 : vector<1x128xf32>
      %24 = arith.mulf %20, %20 : vector<1x128xf32>
      %25 = arith.subf %23, %24 : vector<1x128xf32>
      %cst_12 = arith.constant 0.000000e+00 : f32
      %26 = vector.broadcast %cst_12 : f32 to vector<1x128xf32>
      %27 = arith.maximumf %25, %26 : vector<1x128xf32>
      %c0_13 = arith.constant 0 : index
      %c0_14 = arith.constant 0 : index
      %28 = vector.load %arg4[%c0_13, %c0_14] : memref<1x128xf32, #tpu.memory_space<vmem>>, vector<1x128xf32>
      %cst_15 = arith.constant 9.99999974E-6 : f32
      %29 = vector.broadcast %cst_15 : f32 to vector<1x128xf32>
      %30 = arith.addf %27, %29 : vector<1x128xf32>
      %31 = math.rsqrt %30 : vector<1x128xf32>
      %32 = arith.mulf %28, %31 : vector<1x128xf32>
      %c0_16 = arith.constant 0 : index
      %c0_17 = arith.constant 0 : index
      %33 = vector.load %arg10[%c0_16, %c0_17] : memref<1x128xf32, #tpu.memory_space<vmem>>, vector<1x128xf32>
      tpu.vector_store %arg10[%c0_16, %c0_17], %32 {strides = array<i32>} : memref<1x128xf32, #tpu.memory_space<vmem>>, vector<1x128xf32>,
      %c0_18 = arith.constant 0 : index
      %c0_19 = arith.constant 0 : index
      %34 = vector.load %arg5[%c0_18, %c0_19] : memref<1x128xf32, #tpu.memory_space<vmem>>, vector<1x128xf32>
      %35 = arith.mulf %20, %32 : vector<1x128xf32>
      %36 = arith.subf %34, %35 : vector<1x128xf32>
      %c0_20 = arith.constant 0 : index
      %c0_21 = arith.constant 0 : index
      %37 = vector.load %arg11[%c0_20, %c0_21] : memref<1x128xf32, #tpu.memory_space<vmem>>, vector<1x128xf32>
      tpu.vector_store %arg11[%c0_20, %c0_21], %36 {strides = array<i32>} : memref<1x128xf32, #tpu.memory_space<vmem>>, vector<1x128xf32>,
    } else {
    }
    %c1_i32 = arith.constant 1 : i32
    %15 = arith.cmpi eq, %arg0, %c1_i32 : i32
    %16 = arith.extui %15 : i1 to i32
    %c0_i32_7 = arith.constant 0 : i32
    %17 = arith.cmpi ne, %16, %c0_i32_7 : i32
    scf.if %17 {
      %18 = arith.index_cast %1 : i32 to index
      %c0 = arith.constant 0 : index
      %19 = vector.load %arg7[%18, %c0] : memref<32x128xf32, #tpu.memory_space<vmem>>, vector<32x128xf32>
      %c0_8 = arith.constant 0 : index
      %c0_9 = arith.constant 0 : index
      %20 = vector.load %arg10[%c0_8, %c0_9] : memref<1x128xf32, #tpu.memory_space<vmem>>, vector<1x128xf32>
      %21 = vector.broadcast %20 : vector<1x128xf32> to vector<32x128xf32>
      %22 = arith.mulf %19, %21 : vector<32x128xf32>
      %c0_10 = arith.constant 0 : index
      %c0_11 = arith.constant 0 : index
      %23 = vector.load %arg11[%c0_10, %c0_11] : memref<1x128xf32, #tpu.memory_space<vmem>>, vector<1x128xf32>
      %24 = vector.broadcast %23 : vector<1x128xf32> to vector<32x128xf32>
      %25 = arith.addf %22, %24 : vector<32x128xf32>
      %cst = arith.constant 0.000000e+00 : f32
      %26 = vector.broadcast %cst : f32 to vector<32x128xf32>
      %27 = arith.cmpf oge, %25, %26 : vector<32x128xf32>
      %cst_12 = arith.constant 2.000000e-01 : f32
      %28 = vector.broadcast %cst_12 : f32 to vector<32x128xf32>
      %29 = arith.mulf %28, %25 : vector<32x128xf32>
      %30 = arith.select %27, %25, %29 : vector<32x128xi1>, vector<32x128xf32>
      %31 = arith.truncf %30 : vector<32x128xf32> to vector<32x128xbf16>
      %c0_13 = arith.constant 0 : index
      %c0_14 = arith.constant 0 : index
      %32 = vector.load %arg6[%c0_13, %c0_14] : memref<32x128xbf16, #tpu.memory_space<vmem>>, vector<32x128xbf16>
      tpu.vector_store %arg6[%c0_13, %c0_14], %31 {strides = array<i32>} : memref<32x128xbf16, #tpu.memory_space<vmem>>, vector<32x128xbf16>,
    } else {
    }
    return
  }
  func.func @transform_0(%arg0: i32, %arg1: i32) -> (i32, i32) {
    %c1_i32 = arith.constant 1 : i32
    %0 = arith.subi %c1_i32, %arg0 : i32
    %1 = arith.muli %arg1, %0 : i32
    %c0_i32 = arith.constant 0 : i32
    %c0_i32_0 = arith.constant 0 : i32
    return %1, %c0_i32 : i32, i32
  }
  func.func @transform_1(%arg0: i32, %arg1: i32) -> (i32, i32) {
    %c0_i32 = arith.constant 0 : i32
    %c0_i32_0 = arith.constant 0 : i32
    %c0_i32_1 = arith.constant 0 : i32
    return %c0_i32, %c0_i32_0 : i32, i32
  }
  func.func @transform_2(%arg0: i32, %arg1: i32) -> (i32, i32) {
    %c0_i32 = arith.constant 0 : i32
    %c0_i32_0 = arith.constant 0 : i32
    %c0_i32_1 = arith.constant 0 : i32
    return %c0_i32, %c0_i32_0 : i32, i32
  }
  func.func @transform_3(%arg0: i32, %arg1: i32) -> (i32, i32) {
    %c0_i32 = arith.constant 0 : i32
    %c0_i32_0 = arith.constant 0 : i32
    %c0_i32_1 = arith.constant 0 : i32
    return %c0_i32, %c0_i32_0 : i32, i32
  }
  func.func @transform_4(%arg0: i32, %arg1: i32) -> (i32, i32) {
    %0 = arith.muli %arg1, %arg0 : i32
    %c0_i32 = arith.constant 0 : i32
    %c0_i32_0 = arith.constant 0 : i32
    return %0, %c0_i32 : i32, i32
  }
}

module attributes {stable_mosaic.version = 11 : i64} {
  func.func @_dot_sigmoid_kernel(%arg0: memref<2x1024xbf16, #tpu.memory_space<vmem>>, %arg1: memref<1x1024xf32, #tpu.memory_space<vmem>>, %arg2: memref<1x1xf32, #tpu.memory_space<vmem>>, %arg3: memref<2x1xf32, #tpu.memory_space<vmem>>) attributes {dimension_semantics = [], scalar_prefetch = 0 : i64, scratch_operands = 0 : i64, tpu.core_type = #tpu.core_type<tc>} {
    %c0 = arith.constant 0 : index
    %c0_0 = arith.constant 0 : index
    %0 = vector.load %arg0[%c0, %c0_0] : memref<2x1024xbf16, #tpu.memory_space<vmem>>, vector<2x1024xbf16>
    %1 = arith.extf %0 : vector<2x1024xbf16> to vector<2x1024xf32>
    %c0_1 = arith.constant 0 : index
    %c0_2 = arith.constant 0 : index
    %2 = vector.load %arg1[%c0_1, %c0_2] : memref<1x1024xf32, #tpu.memory_space<vmem>>, vector<1x1024xf32>
    %3 = vector.broadcast %2 : vector<1x1024xf32> to vector<2x1024xf32>
    %4 = arith.mulf %1, %3 : vector<2x1024xf32>
    %cst = arith.constant dense<0.000000e+00> : vector<2xf32>
    %5 = vector.multi_reduction <add>, %4, %cst [1] : vector<2x1024xf32> to vector<2xf32>
    %6 = vector.shape_cast %5 : vector<2xf32> to vector<2x1xf32>
    %c0_3 = arith.constant 0 : index
    %c0_4 = arith.constant 0 : index
    %7 = vector.load %arg2[%c0_3, %c0_4] : memref<1x1xf32, #tpu.memory_space<vmem>>, vector<1x1xf32>
    %8 = vector.broadcast %7 : vector<1x1xf32> to vector<2x1xf32>
    %9 = arith.addf %6, %8 : vector<2x1xf32>
    %cst_5 = arith.constant 0.000000e+00 : f32
    %10 = vector.broadcast %cst_5 : f32 to vector<2x1xf32>
    %11 = arith.subf %10, %9 : vector<2x1xf32>
    %12 = math.exp %11 : vector<2x1xf32>
    %cst_6 = arith.constant 1.000000e+00 : f32
    %13 = vector.broadcast %cst_6 : f32 to vector<2x1xf32>
    %14 = arith.addf %13, %12 : vector<2x1xf32>
    %cst_7 = arith.constant 1.000000e+00 : f32
    %15 = vector.broadcast %cst_7 : f32 to vector<2x1xf32>
    %16 = arith.divf %15, %14 : vector<2x1xf32>
    %c0_8 = arith.constant 0 : index
    %c0_9 = arith.constant 0 : index
    %17 = vector.load %arg3[%c0_8, %c0_9] : memref<2x1xf32, #tpu.memory_space<vmem>>, vector<2x1xf32>
    tpu.vector_store %arg3[%c0_8, %c0_9], %16 {strides = array<i32>} : memref<2x1xf32, #tpu.memory_space<vmem>>, vector<2x1xf32>,
    return
  }
}

</mosaic_0001>

<bundles_post_ra>
// kernel: discriminator_forward.5
= control target key start
LH: loop header
LB: loop body
LE: loop exit
PB: predicated region body
PF: predicated region fallthrough
CT: control target
= control target key end

     0   :  { %s1934_s12 = smov 0   ;;  %s2136_s0 = inlined_call_operand.vmem [shape: bf16[2048,16], index: 0, kind: input, shape index: {}]   ;;  %s2137_s1 = inlined_call_operand.vmem [shape: bf16[16,128], index: 1, kind: input, shape index: {}]   ;;  %s2138_s2 = inlined_call_operand.vmem [shape: f32[1,128], index: 2, kind: input, shape index: {}]   ;;  %s2139_s3 = inlined_call_operand.vmem [shape: bf16[2048,128], index: 3, kind: output, shape index: {}]  }
   0x1 LB: > { %s1368_s13 = sadd.s32 4294967295, %s1912_s12   ;;  %p1372_p0 = scmp.ge.s32.totalorder %s1912_s12, 1  ;;  %s1912_s12 = sphi %s1934_s12, %s13_s12  }
   0x2   : > { %p138_p1 = scmp.lt.s32.totalorder %s1912_s12, 5 }
   0x4   : > { %p139_p2 = pnand %p1372_p0, %p138_p1 }
   0x5   : > { %s1373_s16 = sshll.u32 (!%p139_p2), %s1368_s13, 6 }
   0x6   : > { %142 = sbr.rel (%p139_p2) target bundleno = 286 (0x11e), region = 32  ;;  %p163_p3 = scmp.lt.s32.totalorder (!%p139_p2), %s1373_s16, 255 }
   0xb   : > { %v1873_v0 = vld [vmem:[%s2137_s1] sm:$0xff]   ;;  %s2141_s16 = smov (!%p163_p3, %s1373_s16), 255  ;;  %vm414_vm0 = vcmask 130048  }
   0xc   : > { %1797 = vmatprep.subr.bf16.mxu0 %v1873_v0  ;;  %1863 = vmatprep.subr.bf16.mxu1 %v1873_v0  ;;  %s1374_s17 = sshll.u32 %s2141_s16, 2  ;;  %v2022_v33 = vld [vmem:[%s2138_s2] ss:$0 sm:$0xff] }
   0xd   : > { %1798 = vmatpush3.bf16.msra.mxu0 %v1873_v0  ;;  %1864 = vmatpush3.bf16.msra.mxu1 %v1873_v0  ;;  %s1953_s20 = scalar_lea.vmem %s2136_s0, %s1374_s17  ;;  %s2037_s25 = scalar_lea.vmem %s2139_s3, %s1374_s17 }
   0xe   : > { %v1874_v1 = vld [vmem:[%s1953_s20] sm:$0xff]   ;;  %v1876_v3 = vld [vmem:[%s1953_s20 + $0x8] sm:$0xff]   ;;  %v1878_v5 = vld [vmem:[%s1953_s20 + $0x10] sm:$0xff]  }
   0xf   : > { %v1875_v2 = vld [vmem:[%s1953_s20 + $0x80] sm:$0xff]   ;;  %1799 = vmatprep.mubr.msk.bf16.mxu0 %vm414_vm0, %v1874_v1  ;;  %v1877_v4 = vld [vmem:[%s1953_s20 + $0x88] sm:$0xff]   ;;  %v1879_v6 = vld [vmem:[%s1953_s20 + $0x90] sm:$0xff]  }
  0x10   : > { %1831 = vmatprep.mubr.msk.bf16.mxu1 %vm414_vm0, %v1875_v2  ;;  %1800 = vmatmul.mubr.msk.bf16.vlgmr.msra.gmra.mxu0 %vm414_vm0, %v1876_v3  ;;  %v1880_v7 = vld [vmem:[%s1953_s20 + $0x18] sm:$0xff]   ;;  %v1882_v9 = vld [vmem:[%s1953_s20 + $0x20] sm:$0xff]   ;;  %v1884_v11 = vld [vmem:[%s1953_s20 + $0x28] sm:$0xff]  }
  0x11   : > { %1832 = vmatmul.mubr.msk.bf16.vlgmr.msra.gmra.mxu1 %vm414_vm0, %v1877_v4  ;;  %1803 = vmatprep.mubr.msk.bf16.mxu0 %vm414_vm0, %v1878_v5  ;;  %v1881_v8 = vld [vmem:[%s1953_s20 + $0x98] sm:$0xff]   ;;  %v1883_v10 = vld [vmem:[%s1953_s20 + $0xa0] sm:$0xff]   ;;  %v1885_v12 = vld [vmem:[%s1953_s20 + $0xa8] sm:$0xff]  }
  0x12   : > { %1835 = vmatprep.mubr.msk.bf16.mxu1 %vm414_vm0, %v1879_v6  ;;  %v1886_v13 = vld [vmem:[%s1953_s20 + $0x30] sm:$0xff]   ;;  %v1888_v15 = vld [vmem:[%s1953_s20 + $0x38] sm:$0xff]   ;;  %v1890_v17 = vld [vmem:[%s1953_s20 + $0x40] sm:$0xff]  }
  0x13   : > { %v1887_v14 = vld [vmem:[%s1953_s20 + $0xb0] sm:$0xff]   ;;  %v1889_v16 = vld [vmem:[%s1953_s20 + $0xb8] sm:$0xff]   ;;  %v1891_v18 = vld [vmem:[%s1953_s20 + $0xc0] sm:$0xff]  }
  0x14   : > { %v1892_v19 = vld [vmem:[%s1953_s20 + $0x48] sm:$0xff]   ;;  %v1894_v21 = vld [vmem:[%s1953_s20 + $0x50] sm:$0xff]   ;;  %v1896_v23 = vld [vmem:[%s1953_s20 + $0x58] sm:$0xff]  }
  0x15   : > { %v1893_v20 = vld [vmem:[%s1953_s20 + $0xc8] sm:$0xff]   ;;  %v1895_v22 = vld [vmem:[%s1953_s20 + $0xd0] sm:$0xff]   ;;  %v1897_v24 = vld [vmem:[%s1953_s20 + $0xd8] sm:$0xff]  }
  0x16   : > { %v1898_v25 = vld [vmem:[%s1953_s20 + $0x60] sm:$0xff]   ;;  %v1900_v27 = vld [vmem:[%s1953_s20 + $0x68] sm:$0xff]   ;;  %v1902_v29 = vld [vmem:[%s1953_s20 + $0x70] sm:$0xff]  }
  0x17   : > { %v1899_v26 = vld [vmem:[%s1953_s20 + $0xe0] sm:$0xff]   ;;  %v1901_v28 = vld [vmem:[%s1953_s20 + $0xe8] sm:$0xff]   ;;  %v1903_v30 = vld [vmem:[%s1953_s20 + $0xf0] sm:$0xff]  }
  0x18   : > { %1804 = vmatmul.mubr.msk.bf16.gmra.mxu0 %vm414_vm0, %v1880_v7  ;;  %v1904_v31 = vld [vmem:[%s1953_s20 + $0x78] sm:$0xff]  }
  0x19   : > { %1836 = vmatmul.mubr.msk.bf16.gmra.mxu1 %vm414_vm0, %v1881_v8  ;;  %1807 = vmatprep.mubr.msk.bf16.mxu0 %vm414_vm0, %v1882_v9  ;;  %v1905_v32 = vld [vmem:[%s1953_s20 + $0xf8] sm:$0xff]  }
  0x1a   : > { %1839 = vmatprep.mubr.msk.bf16.mxu1 %vm414_vm0, %v1883_v10 }
  0x20   : > { %1808 = vmatmul.mubr.msk.bf16.gmra.mxu0 %vm414_vm0, %v1884_v11 }
  0x21   : > { %1840 = vmatmul.mubr.msk.bf16.gmra.mxu1 %vm414_vm0, %v1885_v12  ;;  %1811 = vmatprep.mubr.msk.bf16.mxu0 %vm414_vm0, %v1886_v13 }
  0x22   : > { %1843 = vmatprep.mubr.msk.bf16.mxu1 %vm414_vm0, %v1887_v14 }
  0x28   : > { %1812 = vmatmul.mubr.msk.bf16.gmra.mxu0 %vm414_vm0, %v1888_v15 }
  0x29   : > { %1844 = vmatmul.mubr.msk.bf16.gmra.mxu1 %vm414_vm0, %v1889_v16  ;;  %1815 = vmatprep.mubr.msk.bf16.mxu0 %vm414_vm0, %v1890_v17 }
  0x2a   : > { %1847 = vmatprep.mubr.msk.bf16.mxu1 %vm414_vm0, %v1891_v18 }
  0x30   : > { %1816 = vmatmul.mubr.msk.bf16.gmra.mxu0 %vm414_vm0, %v1892_v19 }
  0x31   : > { %1848 = vmatmul.mubr.msk.bf16.gmra.mxu1 %vm414_vm0, %v1893_v20  ;;  %1819 = vmatprep.mubr.msk.bf16.mxu0 %vm414_vm0, %v1894_v21 }
  0x32   : > { %1851 = vmatprep.mubr.msk.bf16.mxu1 %vm414_vm0, %v1895_v22 }
  0x38   : > { %1820 = vmatmul.mubr.msk.bf16.gmra.mxu0 %vm414_vm0, %v1896_v23 }
  0x39   : > { %1852 = vmatmul.mubr.msk.bf16.gmra.mxu1 %vm414_vm0, %v1897_v24  ;;  %1823 = vmatprep.mubr.msk.bf16.mxu0 %vm414_vm0, %v1898_v25 }
  0x3a   : > { %1855 = vmatprep.mubr.msk.bf16.mxu1 %vm414_vm0, %v1899_v26 }
  0x40   : > { %1824 = vmatmul.mubr.msk.bf16.gmra.mxu0 %vm414_vm0, %v1900_v27 }
  0x41   : > { %1856 = vmatmul.mubr.msk.bf16.gmra.mxu1 %vm414_vm0, %v1901_v28  ;;  %1827 = vmatprep.mubr.msk.bf16.mxu0 %vm414_vm0, %v1902_v29 }
  0x42   : > { %1859 = vmatprep.mubr.msk.bf16.mxu1 %vm414_vm0, %v1903_v30 }
  0x48   : > { %1828 = vmatmul.mubr.msk.bf16.gmra.mxu0 %vm414_vm0, %v1904_v31 }
  0x49   : > { %1860 = vmatmul.mubr.msk.bf16.gmra.mxu1 %vm414_vm0, %v1905_v32 }
  0xd0   : > { %v1801_v34 = vpop.f32.mrf.mxu0 }
  0xd1   : > { %v554_v35 = vadd.f32 %v1801_v34, %v2022_v33  ;;  %v1833_v36 = vpop.f32.mrf.mxu1 }
  0xd2   : > { %v682_v37 = vadd.f32 %v1833_v36, %v2022_v33  ;;  %v545_v38 = vpop.f32.mrf.mxu0 }
  0xd3   : > { %vm802_vm1 = vcmp.ge.f32.partialorder %v554_v35, 0.0  ;;  %v866_v39 = vmul.f32 0.2, %v554_v35  ;;  %v546_v40 = vadd.f32 %v2022_v33, %v545_v38  ;;  %v673_v41 = vpop.f32.mrf.mxu1 }
  0xd4   : > { %vm834_vm2 = vcmp.ge.f32.partialorder %v682_v37, 0.0  ;;  %v898_v42 = vmul.f32 0.2, %v682_v37  ;;  %v674_v43 = vadd.f32 %v2022_v33, %v673_v41  ;;  %v1802_v44 = vpop.f32.mrf.mxu0 }
  0xd5   : > { %v930_v45 = vsel %vm802_vm1, %v554_v35, %v866_v39  ;;  %vm800_vm3 = vcmp.ge.f32.partialorder %v546_v40, 0.0  ;;  %v864_v46 = vmul.f32 0.2, %v546_v40  ;;  %v557_v47 = vadd.f32 %v1802_v44, %v2022_v33  ;;  %v1834_v48 = vpop.f32.mrf.mxu1 }
  0xd6   : > { %v962_v49 = vsel %vm834_vm2, %v682_v37, %v898_v42  ;;  %vm832_vm4 = vcmp.ge.f32.partialorder %v674_v43, 0.0  ;;  %v896_v50 = vmul.f32 0.2, %v674_v43  ;;  %v685_v51 = vadd.f32 %v1834_v48, %v2022_v33  ;;  %v548_v52 = vpop.f32.mrf.mxu0 }
  0xd7   : > { %v928_v53 = vsel %vm800_vm3, %v546_v40, %v864_v46  ;;  %vm803_vm5 = vcmp.ge.f32.partialorder %v557_v47, 0.0  ;;  %v867_v54 = vmul.f32 0.2, %v557_v47  ;;  %v549_v55 = vadd.f32 %v2022_v33, %v548_v52  ;;  %v676_v56 = vpop.f32.mrf.mxu1 }
  0xd8   : > { %v960_v57 = vsel %vm832_vm4, %v674_v43, %v896_v50  ;;  %vm835_vm6 = vcmp.ge.f32.partialorder %v685_v51, 0.0  ;;  %v899_v58 = vmul.f32 0.2, %v685_v51  ;;  %v677_v59 = vadd.f32 %v2022_v33, %v676_v56  ;;  %v1805_v60 = vpop.f32.mrf.mxu0 }
  0xd9   : > { %v931_v61 = vsel %vm803_vm5, %v557_v47, %v867_v54  ;;  %vm801_vm7 = vcmp.ge.f32.partialorder %v549_v55, 0.0  ;;  %v865_v62 = vmul.f32 0.2, %v549_v55  ;;  %v570_v63 = vadd.f32 %v1805_v60, %v2022_v33  ;;  %v1837_v0 = vpop.f32.mrf.mxu1 }
  0xda   : > { %v1581_v1 = vpack.c.bf16 %v931_v61, %v930_v45  ;;  %v963_v2 = vsel %vm835_vm6, %v685_v51, %v899_v58  ;;  %vm833_vm8 = vcmp.ge.f32.partialorder %v677_v59, 0.0  ;;  %v897_v3 = vmul.f32 0.2, %v677_v59  ;;  %v561_v4 = vpop.f32.mrf.mxu0 }
  0xdb   : > { %v1661_v5 = vpack.c.bf16 %v963_v2, %v962_v49  ;;  %v929_v6 = vsel %vm801_vm7, %v549_v55, %v865_v62  ;;  %vm806_vm9 = vcmp.ge.f32.partialorder %v570_v63, 0.0  ;;  %v870_v7 = vmul.f32 0.2, %v570_v63  ;;  %v689_v8 = vpop.f32.mrf.mxu1 }
  0xdc   : > { %1733 = vst [vmem:[%s2037_s25 + $0x8] sm:$0xff] %v1581_v1   ;;  %v1576_v9 = vpack.c.bf16 %v929_v6, %v928_v53  ;;  %v961_v10 = vsel %vm833_vm8, %v677_v59, %v897_v3  ;;  %v698_v11 = vadd.f32 %v1837_v0, %v2022_v33  ;;  %v562_v12 = vadd.f32 %v2022_v33, %v561_v4  ;;  %v1806_v13 = vpop.f32.mrf.mxu0 }
  0xdd   : > { %1749 = vst [vmem:[%s2037_s25 + $0x88] sm:$0xff] %v1661_v5   ;;  %v1656_v14 = vpack.c.bf16 %v961_v10, %v960_v57  ;;  %v934_v15 = vsel %vm806_vm9, %v570_v63, %v870_v7  ;;  %v690_v16 = vadd.f32 %v2022_v33, %v689_v8  ;;  %v573_v17 = vadd.f32 %v1806_v13, %v2022_v33  ;;  %v1838_v18 = vpop.f32.mrf.mxu1 }
  0xde   : > { %1577 = vst [vmem:[%s2037_s25] sm:$0xff] %v1576_v9   ;;  %vm838_vm10 = vcmp.ge.f32.partialorder %v698_v11, 0.0  ;;  %v902_v19 = vmul.f32 0.2, %v698_v11  ;;  %vm804_vm11 = vcmp.ge.f32.partialorder %v562_v12, 0.0  ;;  %v868_v20 = vmul.f32 0.2, %v562_v12  ;;  %v564_v21 = vpop.f32.mrf.mxu0 }
  0xdf   : > { %1748 = vst [vmem:[%s2037_s25 + $0x80] sm:$0xff] %v1656_v14   ;;  %vm836_vm12 = vcmp.ge.f32.partialorder %v690_v16, 0.0  ;;  %v900_v22 = vmul.f32 0.2, %v690_v16  ;;  %vm807_vm13 = vcmp.ge.f32.partialorder %v573_v17, 0.0  ;;  %v692_v24 = vpop.f32.mrf.mxu1  ;;  %v701_v27 = vadd.f32 %v1838_v18, %v2022_v33 }
  0xe0   : > { %v871_v23 = vmul.f32 0.2, %v573_v17  ;;  %v966_v25 = vsel %vm838_vm10, %v698_v11, %v902_v19  ;;  %v932_v26 = vsel %vm804_vm11, %v562_v12, %v868_v20  ;;  %v565_v28 = vadd.f32 %v2022_v33, %v564_v21  ;;  %v1809_v29 = vpop.f32.mrf.mxu0 }
  0xe1   : > { %v964_v30 = vsel %vm836_vm12, %v690_v16, %v900_v22  ;;  %v693_v32 = vadd.f32 %v2022_v33, %v692_v24  ;;  %v586_v34 = vadd.f32 %v1809_v29, %v2022_v33  ;;  %v1841_v35 = vpop.f32.mrf.mxu1  ;;  %vm839_vm14 = vcmp.ge.f32.partialorder %v701_v27, 0.0 }
  0xe2   : > { %v935_v31 = vsel %vm807_vm13, %v573_v17, %v871_v23  ;;  %v903_v37 = vmul.f32 0.2, %v701_v27  ;;  %vm805_vm15 = vcmp.ge.f32.partialorder %v565_v28, 0.0  ;;  %v577_v38 = vpop.f32.mrf.mxu0  ;;  %v869_v39 = vmul.f32 0.2, %v565_v28 }
  0xe3   : > { %v1591_v36 = vpack.c.bf16 %v935_v31, %v934_v15  ;;  %vm837_vm0 = vcmp.ge.f32.partialorder %v693_v32, 0.0  ;;  %v901_v40 = vmul.f32 0.2, %v693_v32  ;;  %vm810_vm1 = vcmp.ge.f32.partialorder %v586_v34, 0.0  ;;  %v705_v41 = vpop.f32.mrf.mxu1 }
  0xe4   : > { %v967_v42 = vsel %vm839_vm14, %v701_v27, %v903_v37  ;;  %v874_v43 = vmul.f32 0.2, %v586_v34  ;;  %v714_v44 = vadd.f32 %v1841_v35, %v2022_v33  ;;  %v578_v45 = vadd.f32 %v2022_v33, %v577_v38  ;;  %v1810_v46 = vpop.f32.mrf.mxu0 }
  0xe5   : > { %1735 = vst [vmem:[%s2037_s25 + $0x18] sm:$0xff] %v1591_v36   ;;  %v1671_v47 = vpack.c.bf16 %v967_v42, %v966_v25  ;;  %v933_v48 = vsel %vm805_vm15, %v565_v28, %v869_v39  ;;  %v965_v49 = vsel %vm837_vm0, %v693_v32, %v901_v40  ;;  %v706_v50 = vadd.f32 %v2022_v33, %v705_v41  ;;  %v1842_v51 = vpop.f32.mrf.mxu1 }
  0xe6   : > { %v1586_v52 = vpack.c.bf16 %v933_v48, %v932_v26  ;;  %v1666_v53 = vpack.c.bf16 %v965_v49, %v964_v30  ;;  %v938_v54 = vsel %vm810_vm1, %v586_v34, %v874_v43  ;;  %vm842_vm2 = vcmp.ge.f32.partialorder %v714_v44, 0.0  ;;  %v580_v55 = vpop.f32.mrf.mxu0 }
  0xe7   : > { %1751 = vst [vmem:[%s2037_s25 + $0x98] sm:$0xff] %v1671_v47   ;;  %v906_v56 = vmul.f32 0.2, %v714_v44  ;;  %vm808_vm3 = vcmp.ge.f32.partialorder %v578_v45, 0.0  ;;  %v872_v57 = vmul.f32 0.2, %v578_v45  ;;  %v708_v58 = vpop.f32.mrf.mxu1  ;;  %v589_v60 = vadd.f32 %v1810_v46, %v2022_v33 }
  0xe8   : > { %vm840_vm4 = vcmp.ge.f32.partialorder %v706_v50, 0.0  ;;  %1734 = vst [vmem:[%s2037_s25 + $0x10] sm:$0xff] %v1586_v52   ;;  %1750 = vst [vmem:[%s2037_s25 + $0x90] sm:$0xff] %v1666_v53   ;;  %v904_v59 = vmul.f32 0.2, %v706_v50  ;;  %v717_v61 = vadd.f32 %v1842_v51, %v2022_v33  ;;  %v581_v62 = vadd.f32 %v2022_v33, %v580_v55  ;;  %v1813_v63 = vpop.f32.mrf.mxu0 }
  0xe9   : > { %v970_v0 = vsel %vm842_vm2, %v714_v44, %v906_v56  ;;  %v936_v1 = vsel %vm808_vm3, %v578_v45, %v872_v57  ;;  %v709_v2 = vadd.f32 %v2022_v33, %v708_v58  ;;  %v602_v3 = vadd.f32 %v1813_v63, %v2022_v33  ;;  %v1845_v4 = vpop.f32.mrf.mxu1 }
  0xea   : > { %v968_v5 = vsel %vm840_vm4, %v706_v50, %v904_v59  ;;  %vm811_vm5 = vcmp.ge.f32.partialorder %v589_v60, 0.0  ;;  %v875_v6 = vmul.f32 0.2, %v589_v60  ;;  %vm843_vm6 = vcmp.ge.f32.partialorder %v717_v61, 0.0  ;;  %v593_v7 = vpop.f32.mrf.mxu0 }
  0xeb   : > { %v907_v8 = vmul.f32 0.2, %v717_v61  ;;  %vm809_vm7 = vcmp.ge.f32.partialorder %v581_v62, 0.0  ;;  %v873_v9 = vmul.f32 0.2, %v581_v62  ;;  %vm841_vm8 = vcmp.ge.f32.partialorder %v709_v2, 0.0  ;;  %v721_v10 = vpop.f32.mrf.mxu1 }
  0xec   : > { %v939_v11 = vsel %vm811_vm5, %v589_v60, %v875_v6  ;;  %v905_v12 = vmul.f32 0.2, %v709_v2  ;;  %vm814_vm9 = vcmp.ge.f32.partialorder %v602_v3, 0.0  ;;  %v878_v13 = vmul.f32 0.2, %v602_v3  ;;  %v1814_v14 = vpop.f32.mrf.mxu0 }
  0xed   : > { %v1601_v15 = vpack.c.bf16 %v939_v11, %v938_v54  ;;  %v971_v16 = vsel %vm843_vm6, %v717_v61, %v907_v8  ;;  %v937_v17 = vsel %vm809_vm7, %v581_v62, %v873_v9  ;;  %v730_v18 = vadd.f32 %v1845_v4, %v2022_v33  ;;  %v1846_v19 = vpop.f32.mrf.mxu1 }
  0xee   : > { %v1681_v20 = vpack.c.bf16 %v971_v16, %v970_v0  ;;  %v1596_v21 = vpack.c.bf16 %v937_v17, %v936_v1  ;;  %v969_v22 = vsel %vm841_vm8, %v709_v2, %v905_v12  ;;  %v942_v23 = vsel %vm814_vm9, %v602_v3, %v878_v13  ;;  %v596_v24 = vpop.f32.mrf.mxu0 }
  0xef   : > { %1737 = vst [vmem:[%s2037_s25 + $0x28] sm:$0xff] %v1601_v15   ;;  %v1676_v25 = vpack.c.bf16 %v969_v22, %v968_v5  ;;  %vm846_vm10 = vcmp.ge.f32.partialorder %v730_v18, 0.0  ;;  %v910_v26 = vmul.f32 0.2, %v730_v18  ;;  %v594_v27 = vadd.f32 %v2022_v33, %v593_v7  ;;  %v724_v28 = vpop.f32.mrf.mxu1 }
  0xf0   : > { %1753 = vst [vmem:[%s2037_s25 + $0xa8] sm:$0xff] %v1681_v20   ;;  %1736 = vst [vmem:[%s2037_s25 + $0x20] sm:$0xff] %v1596_v21   ;;  %v722_v29 = vadd.f32 %v2022_v33, %v721_v10  ;;  %v605_v30 = vadd.f32 %v1814_v14, %v2022_v33  ;;  %v733_v31 = vadd.f32 %v1846_v19, %v2022_v33  ;;  %v1817_v34 = vpop.f32.mrf.mxu0 }
  0xf1   : > { %v597_v32 = vadd.f32 %v2022_v33, %v596_v24  ;;  %1752 = vst [vmem:[%s2037_s25 + $0xa0] sm:$0xff] %v1676_v25   ;;  %v974_v35 = vsel %vm846_vm10, %v730_v18, %v910_v26  ;;  %vm812_vm11 = vcmp.ge.f32.partialorder %v594_v27, 0.0  ;;  %v876_v36 = vmul.f32 0.2, %v594_v27  ;;  %v1849_v38 = vpop.f32.mrf.mxu1 }
  0xf2   : > { %v725_v37 = vadd.f32 %v2022_v33, %v724_v28  ;;  %vm844_vm12 = vcmp.ge.f32.partialorder %v722_v29, 0.0  ;;  %v908_v39 = vmul.f32 0.2, %v722_v29  ;;  %vm815_vm13 = vcmp.ge.f32.partialorder %v605_v30, 0.0  ;;  %v609_v41 = vpop.f32.mrf.mxu0 }
  0xf3   : > { %v879_v40 = vmul.f32 0.2, %v605_v30  ;;  %v940_v42 = vsel %vm812_vm11, %v594_v27, %v876_v36  ;;  %vm847_vm14 = vcmp.ge.f32.partialorder %v733_v31, 0.0  ;;  %v911_v43 = vmul.f32 0.2, %v733_v31  ;;  %v737_v44 = vpop.f32.mrf.mxu1 }
  0xf4   : > { %vm813_vm15 = vcmp.ge.f32.partialorder %v597_v32, 0.0  ;;  %v972_v45 = vsel %vm844_vm12, %v722_v29, %v908_v39  ;;  %v877_v47 = vmul.f32 0.2, %v597_v32  ;;  %vm845_vm0 = vcmp.ge.f32.partialorder %v725_v37, 0.0  ;;  %v1818_v48 = vpop.f32.mrf.mxu0 }
  0xf5   : > { %v943_v46 = vsel %vm815_vm13, %v605_v30, %v879_v40  ;;  %v975_v50 = vsel %vm847_vm14, %v733_v31, %v911_v43  ;;  %v909_v51 = vmul.f32 0.2, %v725_v37  ;;  %v618_v52 = vadd.f32 %v1817_v34, %v2022_v33  ;;  %v1850_v53 = vpop.f32.mrf.mxu1 }
  0xf6   : > { %v1611_v49 = vpack.c.bf16 %v943_v46, %v942_v23  ;;  %v1691_v54 = vpack.c.bf16 %v975_v50, %v974_v35  ;;  %v941_v55 = vsel %vm813_vm15, %v597_v32, %v877_v47  ;;  %v746_v56 = vadd.f32 %v1849_v38, %v2022_v33  ;;  %v612_v58 = vpop.f32.mrf.mxu0 }
  0xf7   : > { %v610_v57 = vadd.f32 %v2022_v33, %v609_v41  ;;  %v1606_v59 = vpack.c.bf16 %v941_v55, %v940_v42  ;;  %v973_v60 = vsel %vm845_vm0, %v725_v37, %v909_v51  ;;  %vm818_vm1 = vcmp.ge.f32.partialorder %v618_v52, 0.0  ;;  %v740_v62 = vpop.f32.mrf.mxu1 }
  0xf8   : > { %1739 = vst [vmem:[%s2037_s25 + $0x38] sm:$0xff] %v1611_v49   ;;  %v882_v61 = vmul.f32 0.2, %v618_v52  ;;  %1755 = vst [vmem:[%s2037_s25 + $0xb8] sm:$0xff] %v1691_v54   ;;  %v1686_v63 = vpack.c.bf16 %v973_v60, %v972_v45  ;;  %vm850_vm2 = vcmp.ge.f32.partialorder %v746_v56, 0.0  ;;  %v1821_v1 = vpop.f32.mrf.mxu0  ;;  %v738_v4 = vadd.f32 %v2022_v33, %v737_v44 }
  0xf9   : > { %v914_v0 = vmul.f32 0.2, %v746_v56  ;;  %vm816_vm3 = vcmp.ge.f32.partialorder %v610_v57, 0.0  ;;  %1738 = vst [vmem:[%s2037_s25 + $0x30] sm:$0xff] %v1606_v59   ;;  %v880_v3 = vmul.f32 0.2, %v610_v57  ;;  %v621_v5 = vadd.f32 %v1818_v48, %v2022_v33  ;;  %v1853_v6 = vpop.f32.mrf.mxu1 }
  0xfa   : > { %v946_v2 = vsel %vm818_vm1, %v618_v52, %v882_v61  ;;  %1754 = vst [vmem:[%s2037_s25 + $0xb0] sm:$0xff] %v1686_v63   ;;  %v749_v8 = vadd.f32 %v1850_v53, %v2022_v33  ;;  %v613_v9 = vadd.f32 %v2022_v33, %v612_v58  ;;  %v741_v10 = vadd.f32 %v2022_v33, %v740_v62  ;;  %v625_v11 = vpop.f32.mrf.mxu0 }
  0xfb   : > { %v978_v7 = vsel %vm850_vm2, %v746_v56, %v914_v0  ;;  %v944_v12 = vsel %vm816_vm3, %v610_v57, %v880_v3  ;;  %vm848_vm4 = vcmp.ge.f32.partialorder %v738_v4, 0.0  ;;  %v912_v13 = vmul.f32 0.2, %v738_v4  ;;  %v753_v14 = vpop.f32.mrf.mxu1 }
  0xfc   : > { %vm819_vm5 = vcmp.ge.f32.partialorder %v621_v5, 0.0  ;;  %v883_v15 = vmul.f32 0.2, %v621_v5  ;;  %vm851_vm6 = vcmp.ge.f32.partialorder %v749_v8, 0.0  ;;  %v915_v16 = vmul.f32 0.2, %v749_v8  ;;  %v1822_v17 = vpop.f32.mrf.mxu0 }
  0xfd   : > { %vm817_vm7 = vcmp.ge.f32.partialorder %v613_v9, 0.0  ;;  %v976_v18 = vsel %vm848_vm4, %v738_v4, %v912_v13  ;;  %v881_v19 = vmul.f32 0.2, %v613_v9  ;;  %vm849_vm8 = vcmp.ge.f32.partialorder %v741_v10, 0.0  ;;  %v1854_v21 = vpop.f32.mrf.mxu1 }
  0xfe   : > { %v913_v20 = vmul.f32 0.2, %v741_v10  ;;  %v947_v22 = vsel %vm819_vm5, %v621_v5, %v883_v15  ;;  %v979_v23 = vsel %vm851_vm6, %v749_v8, %v915_v16  ;;  %v634_v24 = vadd.f32 %v1821_v1, %v2022_v33  ;;  %v628_v26 = vpop.f32.mrf.mxu0 }
  0xff   : > { %v762_v25 = vadd.f32 %v1853_v6, %v2022_v33  ;;  %v1621_v27 = vpack.c.bf16 %v947_v22, %v946_v2  ;;  %v1701_v28 = vpack.c.bf16 %v979_v23, %v978_v7  ;;  %v945_v29 = vsel %vm817_vm7, %v613_v9, %v881_v19  ;;  %v756_v31 = vpop.f32.mrf.mxu1 }
 0x100   : > { %v977_v30 = vsel %vm849_vm8, %v741_v10, %v913_v20  ;;  %v1616_v32 = vpack.c.bf16 %v945_v29, %v944_v12  ;;  %vm822_vm9 = vcmp.ge.f32.partialorder %v634_v24, 0.0  ;;  %v886_v35 = vmul.f32 0.2, %v634_v24  ;;  %v1825_v36 = vpop.f32.mrf.mxu0 }
 0x101   : > { %v1696_v34 = vpack.c.bf16 %v977_v30, %v976_v18  ;;  %1741 = vst [vmem:[%s2037_s25 + $0x48] sm:$0xff] %v1621_v27   ;;  %1757 = vst [vmem:[%s2037_s25 + $0xc8] sm:$0xff] %v1701_v28   ;;  %vm854_vm10 = vcmp.ge.f32.partialorder %v762_v25, 0.0  ;;  %v918_v37 = vmul.f32 0.2, %v762_v25  ;;  %v626_v38 = vadd.f32 %v2022_v33, %v625_v11  ;;  %v1857_v40 = vpop.f32.mrf.mxu1 }
 0x102   : > { %v754_v39 = vadd.f32 %v2022_v33, %v753_v14  ;;  %1740 = vst [vmem:[%s2037_s25 + $0x40] sm:$0xff] %v1616_v32   ;;  %v950_v41 = vsel %vm822_vm9, %v634_v24, %v886_v35  ;;  %v637_v42 = vadd.f32 %v1822_v17, %v2022_v33  ;;  %v765_v43 = vadd.f32 %v1854_v21, %v2022_v33  ;;  %v641_v45 = vpop.f32.mrf.mxu0 }
 0x103   : > { %1756 = vst [vmem:[%s2037_s25 + $0xc0] sm:$0xff] %v1696_v34   ;;  %v629_v44 = vadd.f32 %v2022_v33, %v628_v26  ;;  %v982_v46 = vsel %vm854_vm10, %v762_v25, %v918_v37  ;;  %vm820_vm11 = vcmp.ge.f32.partialorder %v626_v38, 0.0  ;;  %v884_v47 = vmul.f32 0.2, %v626_v38  ;;  %v769_v48 = vpop.f32.mrf.mxu1 }
 0x104   : > { %vm852_vm12 = vcmp.ge.f32.partialorder %v754_v39, 0.0  ;;  %v916_v49 = vmul.f32 0.2, %v754_v39  ;;  %vm823_vm13 = vcmp.ge.f32.partialorder %v637_v42, 0.0  ;;  %v887_v50 = vmul.f32 0.2, %v637_v42  ;;  %v1826_v51 = vpop.f32.mrf.mxu0 }
 0x105   : > { %vm855_vm14 = vcmp.ge.f32.partialorder %v765_v43, 0.0  ;;  %v948_v52 = vsel %vm820_vm11, %v626_v38, %v884_v47  ;;  %v919_v53 = vmul.f32 0.2, %v765_v43  ;;  %vm821_vm15 = vcmp.ge.f32.partialorder %v629_v44, 0.0  ;;  %v1858_v55 = vpop.f32.mrf.mxu1 }
 0x106   : > { %v885_v54 = vmul.f32 0.2, %v629_v44  ;;  %v980_v56 = vsel %vm852_vm12, %v754_v39, %v916_v49  ;;  %v951_v57 = vsel %vm823_vm13, %v637_v42, %v887_v50  ;;  %v757_v58 = vadd.f32 %v2022_v33, %v756_v31  ;;  %v644_v60 = vpop.f32.mrf.mxu0 }
 0x107   : > { %v650_v59 = vadd.f32 %v1825_v36, %v2022_v33  ;;  %v1631_v61 = vpack.c.bf16 %v951_v57, %v950_v41  ;;  %v983_v62 = vsel %vm855_vm14, %v765_v43, %v919_v53  ;;  %v778_v0 = vadd.f32 %v1857_v40, %v2022_v33  ;;  %v772_v1 = vpop.f32.mrf.mxu1 }
 0x108   : > { %v949_v63 = vsel %vm821_vm15, %v629_v44, %v885_v54  ;;  %v1711_v2 = vpack.c.bf16 %v983_v62, %v982_v46  ;;  %vm853_vm0 = vcmp.ge.f32.partialorder %v757_v58, 0.0  ;;  %v917_v4 = vmul.f32 0.2, %v757_v58  ;;  %v1829_v5 = vpop.f32.mrf.mxu0 }
 0x109   : > { %v1626_v3 = vpack.c.bf16 %v949_v63, %v948_v52  ;;  %1743 = vst [vmem:[%s2037_s25 + $0x58] sm:$0xff] %v1631_v61   ;;  %vm826_vm1 = vcmp.ge.f32.partialorder %v650_v59, 0.0  ;;  %v890_v6 = vmul.f32 0.2, %v650_v59  ;;  %vm858_vm2 = vcmp.ge.f32.partialorder %v778_v0, 0.0  ;;  %v1861_v8 = vpop.f32.mrf.mxu1 }
 0x10a   : > { %v922_v7 = vmul.f32 0.2, %v778_v0  ;;  %1759 = vst [vmem:[%s2037_s25 + $0xd8] sm:$0xff] %v1711_v2   ;;  %v981_v9 = vsel %vm853_vm0, %v757_v58, %v917_v4  ;;  %v642_v10 = vadd.f32 %v2022_v33, %v641_v45  ;;  %v770_v11 = vadd.f32 %v2022_v33, %v769_v48  ;;  %v657_v15 = vpop.f32.mrf.mxu0 }
 0x10b   : > { %1742 = vst [vmem:[%s2037_s25 + $0x50] sm:$0xff] %v1626_v3   ;;  %v653_v12 = vadd.f32 %v1826_v51, %v2022_v33  ;;  %v1706_v13 = vpack.c.bf16 %v981_v9, %v980_v56  ;;  %v781_v14 = vadd.f32 %v1858_v55, %v2022_v33  ;;  %v785_v16 = vpop.f32.mrf.mxu1  ;;  %v954_v17 = vsel %vm826_vm1, %v650_v59, %v890_v6 }
 0x10c   : > { %v986_v18 = vsel %vm858_vm2, %v778_v0, %v922_v7  ;;  %vm824_vm3 = vcmp.ge.f32.partialorder %v642_v10, 0.0  ;;  %v888_v19 = vmul.f32 0.2, %v642_v10  ;;  %vm856_vm6 = vcmp.ge.f32.partialorder %v770_v11, 0.0  ;;  %v1830_v29 = vpop.f32.mrf.mxu0 }
 0x10d   : > { %1758 = vst [vmem:[%s2037_s25 + $0xd0] sm:$0xff] %v1706_v13   ;;  %vm827_vm4 = vcmp.ge.f32.partialorder %v653_v12, 0.0  ;;  %v891_v20 = vmul.f32 0.2, %v653_v12  ;;  %vm859_vm5 = vcmp.ge.f32.partialorder %v781_v14, 0.0  ;;  %v645_v23 = vadd.f32 %v2022_v33, %v644_v60  ;;  %v1862_v30 = vpop.f32.mrf.mxu1 }
 0x10e   : > { %v923_v21 = vmul.f32 0.2, %v781_v14  ;;  %v920_v22 = vmul.f32 0.2, %v770_v11  ;;  %v773_v24 = vadd.f32 %v2022_v33, %v772_v1  ;;  %v666_v27 = vadd.f32 %v1829_v5, %v2022_v33  ;;  %v660_v43 = vpop.f32.mrf.mxu0 }
 0x10f   : > { %v955_v25 = vsel %vm827_vm4, %v653_v12, %v891_v20  ;;  %v794_v28 = vadd.f32 %v1861_v8, %v2022_v33  ;;  %vm825_vm7 = vcmp.ge.f32.partialorder %v645_v23, 0.0  ;;  %v889_v34 = vmul.f32 0.2, %v645_v23  ;;  %v788_v44 = vpop.f32.mrf.mxu1 }
 0x110   : > { %v987_v26 = vsel %vm859_vm5, %v781_v14, %v923_v21  ;;  %v1641_v31 = vpack.c.bf16 %v955_v25, %v954_v17  ;;  %vm857_vm8 = vcmp.ge.f32.partialorder %v773_v24, 0.0  ;;  %v921_v35 = vmul.f32 0.2, %v773_v24 }
 0x111   : > { %v1721_v32 = vpack.c.bf16 %v987_v26, %v986_v18  ;;  %v952_v36 = vsel %vm824_vm3, %v642_v10, %v888_v19  ;;  %v953_v37 = vsel %vm825_vm7, %v645_v23, %v889_v34  ;;  %v658_v38 = vadd.f32 %v2022_v33, %v657_v15 }
 0x112   : > { %1745 = vst [vmem:[%s2037_s25 + $0x68] sm:$0xff] %v1641_v31   ;;  %v984_v39 = vsel %vm856_vm6, %v770_v11, %v920_v22  ;;  %v1636_v40 = vpack.c.bf16 %v953_v37, %v952_v36  ;;  %v985_v41 = vsel %vm857_vm8, %v773_v24, %v921_v35  ;;  %v786_v42 = vadd.f32 %v2022_v33, %v785_v16 }
 0x113   : > { %1761 = vst [vmem:[%s2037_s25 + $0xe8] sm:$0xff] %v1721_v32   ;;  %v1716_v45 = vpack.c.bf16 %v985_v41, %v984_v39  ;;  %vm830_vm9 = vcmp.ge.f32.partialorder %v666_v27, 0.0  ;;  %v894_v46 = vmul.f32 0.2, %v666_v27  ;;  %vm862_vm10 = vcmp.ge.f32.partialorder %v794_v28, 0.0 }
 0x114   : > { %1744 = vst [vmem:[%s2037_s25 + $0x60] sm:$0xff] %v1636_v40   ;;  %v926_v47 = vmul.f32 0.2, %v794_v28  ;;  %vm828_vm11 = vcmp.ge.f32.partialorder %v658_v38, 0.0  ;;  %v669_v48 = vadd.f32 %v1830_v29, %v2022_v33  ;;  %v797_v49 = vadd.f32 %v1862_v30, %v2022_v33 }
 0x115   : > { %1760 = vst [vmem:[%s2037_s25 + $0xe0] sm:$0xff] %v1716_v45   ;;  %v892_v50 = vmul.f32 0.2, %v658_v38  ;;  %vm860_vm12 = vcmp.ge.f32.partialorder %v786_v42, 0.0  ;;  %v661_v51 = vadd.f32 %v2022_v33, %v660_v43  ;;  %v789_v52 = vadd.f32 %v2022_v33, %v788_v44 }
 0x116   : > { %v924_v53 = vmul.f32 0.2, %v786_v42  ;;  %vm831_vm13 = vcmp.ge.f32.partialorder %v669_v48, 0.0  ;;  %v895_v54 = vmul.f32 0.2, %v669_v48  ;;  %vm863_vm14 = vcmp.ge.f32.partialorder %v797_v49, 0.0 }
 0x117   : > { %v927_v55 = vmul.f32 0.2, %v797_v49  ;;  %vm829_vm15 = vcmp.ge.f32.partialorder %v661_v51, 0.0  ;;  %v893_v56 = vmul.f32 0.2, %v661_v51  ;;  %vm861_vm0 = vcmp.ge.f32.partialorder %v789_v52, 0.0 }
 0x118   : > { %v958_v57 = vsel %vm830_vm9, %v666_v27, %v894_v46  ;;  %v990_v58 = vsel %vm862_vm10, %v794_v28, %v926_v47  ;;  %v959_v59 = vsel %vm831_vm13, %v669_v48, %v895_v54  ;;  %v925_v60 = vmul.f32 0.2, %v789_v52 }
 0x119   : > { %v956_v33 = vsel %vm828_vm11, %v658_v38, %v892_v50  ;;  %v1651_v61 = vpack.c.bf16 %v959_v59, %v958_v57  ;;  %v991_v62 = vsel %vm863_vm14, %v797_v49, %v927_v55  ;;  %v957_v63 = vsel %vm829_vm15, %v661_v51, %v893_v56 }
 0x11a   : > { %v988_v0 = vsel %vm860_vm12, %v786_v42, %v924_v53  ;;  %v1731_v1 = vpack.c.bf16 %v991_v62, %v990_v58  ;;  %v1646_v2 = vpack.c.bf16 %v957_v63, %v956_v33  ;;  %v989_v3 = vsel %vm861_vm0, %v789_v52, %v925_v60 }
 0x11b   : > { %1747 = vst [vmem:[%s2037_s25 + $0x78] sm:$0xff] %v1651_v61   ;;  %v1726_v4 = vpack.c.bf16 %v989_v3, %v988_v0 }
 0x11c   : > { %1763 = vst [vmem:[%s2037_s25 + $0xf8] sm:$0xff] %v1731_v1   ;;  %1746 = vst [vmem:[%s2037_s25 + $0x70] sm:$0xff] %v1646_v2  }
 0x11d   : > { %1762 = vst [vmem:[%s2037_s25 + $0xf0] sm:$0xff] %v1726_v4  }
 0x11e PF: > { %s13_s12 = sadd.s32 1, %s1912_s12  }
 0x11f   : > { %p10_p4 = scmp.ge.s32.totalorder %s13_s12, 6  }
 0x121   :  { %12 = sbr.rel (!%p10_p4) target bundleno = 1 (0x1), region = 62 }

// kernel: discriminator_forward.6
= control target key start
LH: loop header
LB: loop body
LE: loop exit
PB: predicated region body
PF: predicated region fallthrough
CT: control target
= control target key end

     0   :  { %s2568_s15 = smov 0   ;;  %s2570_s16 = smov 0   ;;  %s3150_s0 = inlined_call_operand.vmem [shape: bf16[512,128], index: 0, kind: input, shape index: {}]   ;;  %s3151_s1 = inlined_call_operand.vmem [shape: bf16[128,128], index: 1, kind: input, shape index: {}]   ;;  %s3152_s2 = inlined_call_operand.vmem [shape: f32[1,128], index: 2, kind: input, shape index: {}]   ;;  %s3153_s3 = inlined_call_operand.vmem [shape: f32[1,128], index: 3, kind: input, shape index: {}]   ;;  %s3154_s4 = inlined_call_operand.vmem [shape: bf16[512,128], index: 4, kind: output, shape index: {}]  }
   0x1   :  { %s2572_s17 = smov 0  }
   0x2 LB: > { %s26_s18 = sadd.s32 1, %s2536_s16  ;;  %p1945_p0 = scmp.ge.s32.totalorder %s2540_s17, 1  ;;  %s2540_s17 = sphi %s2572_s17, %s14_s17   ;;  %s2536_s16 = sphi %s2570_s16, %s3156_s16   ;;  %s2532_s15 = sphi %s2568_s15, %s3155_s15  }
   0x3   : > { %p28_p1 = scmp.ge.s32.totalorder %s26_s18, 2  ;;  %p185_p2 = scmp.lt.s32.totalorder %s2540_s17, 3 }
   0x5   : > { %s3158_s18 = smov (%p28_p1, %s26_s18), 0  ;;  %p186_p3 = pnand %p1945_p0, %p185_p2 }
   0x6   : > { %p234_p4 = scmp.eq.s32.totalorder (!%p186_p3), %s2532_s15, 0 }
   0x7   : > { %189 = sbr.rel (%p186_p3) target bundleno = 537 (0x219), region = 36 }
   0xc   : > { %239 = sbr.rel (!%p234_p4) target bundleno = 17 (0x11), region = 40  ;;  %v2542_v0 = vmov (%p234_p4), 0.0  }
   0xd   : > { %240 = vst [vmem:[#allocation3] sm:$0x1] (%p234_p4), %v2542_v0  ;;  %241 = vst [vmem:[#allocation4] sm:$0x1] (%p234_p4), %v2542_v0 }
  0x11 PF: > { %p1947_p5 = scmp.ne.s32.totalorder %s2532_s15, 0 }
  0x13   : > { %244 = sbr.rel (%p1947_p5) target bundleno = 399 (0x18f), region = 44 }
  0x18   : > { %v2476_v1 = vld [vmem:[%s3151_s1 + $0x38] sm:$0xff]   ;;  %v2477_v2 = vld [vmem:[%s3151_s1 + $0x30] sm:$0xff]   ;;  %v2478_v3 = vld [vmem:[%s3151_s1 + $0x28] sm:$0xff]  }
  0x19   : > { %2355 = vmatprep.subr.bf16.mxu0 %v2476_v1  ;;  %2435 = vmatprep.subr.bf16.mxu1 %v2476_v1  ;;  %v2479_v4 = vld [vmem:[%s3151_s1 + $0x20] sm:$0xff]   ;;  %v2480_v6 = vld [vmem:[%s3151_s1 + $0x18] sm:$0xff]   ;;  %v2481_v7 = vld [vmem:[%s3151_s1 + $0x10] sm:$0xff]  }
  0x1a   : > { %2356 = vmatpush3.bf16.msra.mxu0 %v2476_v1  ;;  %2443 = vmatpush3.bf16.msra.mxu1 %v2476_v1  ;;  %v2484_v5 = vld [vmem:[%s3150_s0] sm:$0xff]   ;;  %v2482_v8 = vld [vmem:[%s3151_s1 + $0x8] sm:$0xff]   ;;  %v2486_v12 = vld [vmem:[%s3150_s0 + $0x10] sm:$0xff]  }
  0x1b   : > { %2357 = vmatprep.subr.bf16.mxu0 %v2477_v2  ;;  %2436 = vmatprep.subr.bf16.mxu1 %v2477_v2  ;;  %v2483_v9 = vld [vmem:[%s3151_s1] sm:$0xff]   ;;  %v2485_v11 = vld [vmem:[%s3150_s0 + $0x8] sm:$0xff]   ;;  %v2502_v14 = vld [vmem:[%s3150_s0 + $0x90] sm:$0xff]  }
  0x1c   : > { %2371 = vmatprep.mubr.bf16.mxu0 %v2484_v5  ;;  %v2500_v10 = vld [vmem:[%s3150_s0 + $0x80] sm:$0xff]   ;;  %v2501_v13 = vld [vmem:[%s3150_s0 + $0x88] sm:$0xff]   ;;  %v2487_v15 = vld [vmem:[%s3150_s0 + $0x18] sm:$0xff]  }
  0x1d   : > { %2403 = vmatprep.mubr.bf16.mxu1 %v2500_v10  ;;  %v2488_v16 = vld [vmem:[%s3150_s0 + $0x20] sm:$0xff]   ;;  %v2503_v17 = vld [vmem:[%s3150_s0 + $0x98] sm:$0xff]   ;;  %v2489_v19 = vld [vmem:[%s3150_s0 + $0x28] sm:$0xff]  }
  0x1e   : > { %2358 = vmatpush3.bf16.msra.mxu0 %v2477_v2  ;;  %2444 = vmatpush3.bf16.msra.mxu1 %v2477_v2  ;;  %v2504_v18 = vld [vmem:[%s3150_s0 + $0xa0] sm:$0xff]   ;;  %v2505_v20 = vld [vmem:[%s3150_s0 + $0xa8] sm:$0xff]   ;;  %v2490_v21 = vld [vmem:[%s3150_s0 + $0x30] sm:$0xff]  }
  0x1f   : > { %2359 = vmatprep.subr.bf16.mxu0 %v2478_v3  ;;  %2437 = vmatprep.subr.bf16.mxu1 %v2478_v3  ;;  %v2506_v22 = vld [vmem:[%s3150_s0 + $0xb0] sm:$0xff]   ;;  %v2491_v23 = vld [vmem:[%s3150_s0 + $0x38] sm:$0xff]   ;;  %v2492_v25 = vld [vmem:[%s3150_s0 + $0x40] sm:$0xff]  }
  0x20   : > { %v2507_v24 = vld [vmem:[%s3150_s0 + $0xb8] sm:$0xff]   ;;  %v2508_v26 = vld [vmem:[%s3150_s0 + $0xc0] sm:$0xff]   ;;  %v2493_v27 = vld [vmem:[%s3150_s0 + $0x48] sm:$0xff]  }
  0x21   : > { %v2509_v28 = vld [vmem:[%s3150_s0 + $0xc8] sm:$0xff]   ;;  %v2494_v29 = vld [vmem:[%s3150_s0 + $0x50] sm:$0xff]   ;;  %v2495_v31 = vld [vmem:[%s3150_s0 + $0x58] sm:$0xff]  }
  0x22   : > { %2360 = vmatpush3.bf16.msra.mxu0 %v2478_v3  ;;  %2445 = vmatpush3.bf16.msra.mxu1 %v2478_v3  ;;  %v2510_v30 = vld [vmem:[%s3150_s0 + $0xd0] sm:$0xff]   ;;  %v2511_v32 = vld [vmem:[%s3150_s0 + $0xd8] sm:$0xff]   ;;  %v2496_v33 = vld [vmem:[%s3150_s0 + $0x60] sm:$0xff]  }
  0x23   : > { %2361 = vmatprep.subr.bf16.mxu0 %v2479_v4  ;;  %2438 = vmatprep.subr.bf16.mxu1 %v2479_v4  ;;  %v2512_v34 = vld [vmem:[%s3150_s0 + $0xe0] sm:$0xff]   ;;  %v2497_v35 = vld [vmem:[%s3150_s0 + $0x68] sm:$0xff]   ;;  %v2498_v37 = vld [vmem:[%s3150_s0 + $0x70] sm:$0xff]  }
  0x24   : > { %v2513_v36 = vld [vmem:[%s3150_s0 + $0xe8] sm:$0xff]   ;;  %v2514_v38 = vld [vmem:[%s3150_s0 + $0xf0] sm:$0xff]   ;;  %v2499_v39 = vld [vmem:[%s3150_s0 + $0x78] sm:$0xff]  }
  0x25   : > { %v2515_v40 = vld [vmem:[%s3150_s0 + $0xf8] sm:$0xff]  }
  0x26   : > { %2362 = vmatpush3.bf16.msra.mxu0 %v2479_v4  ;;  %2446 = vmatpush3.bf16.msra.mxu1 %v2479_v4 }
  0x27   : > { %2363 = vmatprep.subr.bf16.mxu0 %v2480_v6  ;;  %2439 = vmatprep.subr.bf16.mxu1 %v2480_v6 }
  0x2a   : > { %2364 = vmatpush3.bf16.msra.mxu0 %v2480_v6  ;;  %2447 = vmatpush3.bf16.msra.mxu1 %v2480_v6 }
  0x2b   : > { %2365 = vmatprep.subr.bf16.mxu0 %v2481_v7  ;;  %2440 = vmatprep.subr.bf16.mxu1 %v2481_v7 }
  0x2e   : > { %2366 = vmatpush3.bf16.msra.mxu0 %v2481_v7  ;;  %2448 = vmatpush3.bf16.msra.mxu1 %v2481_v7 }
  0x2f   : > { %2367 = vmatprep.subr.bf16.mxu0 %v2482_v8  ;;  %2441 = vmatprep.subr.bf16.mxu1 %v2482_v8 }
  0x32   : > { %2368 = vmatpush3.bf16.msra.mxu0 %v2482_v8  ;;  %2449 = vmatpush3.bf16.msra.mxu1 %v2482_v8 }
  0x33   : > { %2369 = vmatprep.subr.bf16.mxu0 %v2483_v9  ;;  %2442 = vmatprep.subr.bf16.mxu1 %v2483_v9 }
  0x36   : > { %2370 = vmatpush3.bf16.msra.mxu0 %v2483_v9  ;;  %2450 = vmatpush3.bf16.msra.mxu1 %v2483_v9 }
  0x39   : > { %2372 = vmatmul.mubr.bf16.vlgmr.msra.gmra.mxu0 %v2485_v11  ;;  %2404 = vmatmul.mubr.bf16.vlgmr.msra.gmra.mxu1 %v2501_v13 }
  0x3a   : > { %2375 = vmatprep.mubr.bf16.mxu0 %v2486_v12  ;;  %2407 = vmatprep.mubr.bf16.mxu1 %v2502_v14 }
  0x41   : > { %2376 = vmatmul.mubr.bf16.gmra.mxu0 %v2487_v15  ;;  %2408 = vmatmul.mubr.bf16.gmra.mxu1 %v2503_v17 }
  0x42   : > { %2379 = vmatprep.mubr.bf16.mxu0 %v2488_v16  ;;  %2411 = vmatprep.mubr.bf16.mxu1 %v2504_v18 }
  0x49   : > { %2380 = vmatmul.mubr.bf16.gmra.mxu0 %v2489_v19  ;;  %2412 = vmatmul.mubr.bf16.gmra.mxu1 %v2505_v20 }
  0x4a   : > { %2383 = vmatprep.mubr.bf16.mxu0 %v2490_v21  ;;  %2415 = vmatprep.mubr.bf16.mxu1 %v2506_v22 }
  0x51   : > { %2384 = vmatmul.mubr.bf16.gmra.mxu0 %v2491_v23  ;;  %2416 = vmatmul.mubr.bf16.gmra.mxu1 %v2507_v24 }
  0x52   : > { %2387 = vmatprep.mubr.bf16.mxu0 %v2492_v25  ;;  %2419 = vmatprep.mubr.bf16.mxu1 %v2508_v26 }
  0x59   : > { %2388 = vmatmul.mubr.bf16.gmra.mxu0 %v2493_v27  ;;  %2420 = vmatmul.mubr.bf16.gmra.mxu1 %v2509_v28 }
  0x5a   : > { %2391 = vmatprep.mubr.bf16.mxu0 %v2494_v29  ;;  %2423 = vmatprep.mubr.bf16.mxu1 %v2510_v30 }
  0x61   : > { %2392 = vmatmul.mubr.bf16.gmra.mxu0 %v2495_v31  ;;  %2424 = vmatmul.mubr.bf16.gmra.mxu1 %v2511_v32 }
  0x62   : > { %2395 = vmatprep.mubr.bf16.mxu0 %v2496_v33  ;;  %2427 = vmatprep.mubr.bf16.mxu1 %v2512_v34 }
  0x69   : > { %2396 = vmatmul.mubr.bf16.gmra.mxu0 %v2497_v35  ;;  %2428 = vmatmul.mubr.bf16.gmra.mxu1 %v2513_v36 }
  0x6a   : > { %2399 = vmatprep.mubr.bf16.mxu0 %v2498_v37  ;;  %2431 = vmatprep.mubr.bf16.mxu1 %v2514_v38 }
  0x71   : > { %2400 = vmatmul.mubr.bf16.gmra.mxu0 %v2499_v39  ;;  %2432 = vmatmul.mubr.bf16.gmra.mxu1 %v2515_v40 }
  0xf9   : > { %v2373_v41 = vpop.f32.mrf.mxu0  ;;  %v2712_v42 = vpop.f32.mrf.mxu1 }
  0xfa   : > { %857 = vst [vmem:[#allocation2 + $0xd8] sm:$0xff] %v2373_v41  ;;  %889 = vst [vmem:[#allocation2 + $0x100] sm:$0xff] %v2712_v42  ;;  %v994_v54 = vmul.f32 %v2373_v41, %v2373_v41 }
  0xfb   : > { %v599_v43 = vpop.f32.mrf.mxu0  ;;  %v2715_v44 = vpop.f32.mrf.mxu1 }
  0xfc   : > { %855 = vst [vmem:[#allocation2 + $0xb0] sm:$0xff] %v599_v43  ;;  %887 = vst [vmem:[#allocation2 + $0x148] sm:$0xff] %v2715_v44  ;;  %v992_v49 = vmul.f32 %v599_v43, %v599_v43 }
  0xfd   : > { %v2374_v45 = vpop.f32.mrf.mxu0  ;;  %v2718_v46 = vpop.f32.mrf.mxu1 }
  0xfe   : > { %858 = vst [vmem:[#allocation2 + $0x18] sm:$0xff] %v2374_v45  ;;  %890 = vst [vmem:[#allocation2 + $0xc8] sm:$0xff] %v2718_v46  ;;  %v995_v59 = vmul.f32 %v2374_v45, %v2374_v45 }
  0xff   : > { %v602_v47 = vpop.f32.mrf.mxu0  ;;  %v2721_v48 = vpop.f32.mrf.mxu1 }
 0x100   : > { %856 = vst [vmem:[#allocation2 + $0x1b0] sm:$0xff] %v602_v47  ;;  %v920_v50 = vadd.f32 %v602_v47, %v599_v43  ;;  %v993_v51 = vmul.f32 %v602_v47, %v602_v47  ;;  %888 = vst [vmem:[#allocation2 + $0x1d0] sm:$0xff] %v2721_v48 }
 0x101   : > { %v2377_v52 = vpop.f32.mrf.mxu0  ;;  %v2724_v53 = vpop.f32.mrf.mxu1 }
 0x102   : > { %v921_v55 = vadd.f32 %v2373_v41, %v920_v50  ;;  %v1056_v56 = vadd.f32 %v993_v51, %v992_v49  ;;  %861 = vst [vmem:[#allocation2 + $0x130] sm:$0xff] %v2377_v52  ;;  %893 = vst [vmem:[#allocation2 + $0x20] sm:$0xff] %v2724_v53  ;;  %v998_v10 = vmul.f32 %v2377_v52, %v2377_v52 }
 0x103   : > { %v615_v57 = vpop.f32.mrf.mxu0  ;;  %v2727_v58 = vpop.f32.mrf.mxu1 }
 0x104   : > { %v1057_v60 = vadd.f32 %v1056_v56, %v994_v54  ;;  %859 = vst [vmem:[#allocation2 + $0x50] sm:$0xff] %v615_v57  ;;  %v922_v61 = vadd.f32 %v2374_v45, %v921_v55  ;;  %891 = vst [vmem:[#allocation2 + $0x40] sm:$0xff] %v2727_v58  ;;  %v996_v1 = vmul.f32 %v615_v57, %v615_v57 }
 0x105   : > { %v2378_v62 = vpop.f32.mrf.mxu0  ;;  %v2730_v63 = vpop.f32.mrf.mxu1 }
 0x106   : > { %v923_v0 = vadd.f32 %v922_v61, %v615_v57  ;;  %v1058_v2 = vadd.f32 %v1057_v60, %v995_v59  ;;  %862 = vst [vmem:[#allocation2 + $0x48] sm:$0xff] %v2378_v62  ;;  %894 = vst [vmem:[#allocation2 + $0x128] sm:$0xff] %v2730_v63  ;;  %v999_v15 = vmul.f32 %v2378_v62, %v2378_v62 }
 0x107   : > { %v618_v3 = vpop.f32.mrf.mxu0  ;;  %v2733_v4 = vpop.f32.mrf.mxu1 }
 0x108   : > { %v1059_v5 = vadd.f32 %v1058_v2, %v996_v1  ;;  %860 = vst [vmem:[#allocation2 + $0x168] sm:$0xff] %v618_v3  ;;  %v924_v6 = vadd.f32 %v923_v0, %v618_v3  ;;  %v997_v7 = vmul.f32 %v618_v3, %v618_v3  ;;  %892 = vst [vmem:[#allocation2 + $0x1f8] sm:$0xff] %v2733_v4 }
 0x109   : > { %v2381_v8 = vpop.f32.mrf.mxu0  ;;  %v2736_v9 = vpop.f32.mrf.mxu1 }
 0x10a   : > { %v925_v11 = vadd.f32 %v2377_v52, %v924_v6  ;;  %v1060_v12 = vadd.f32 %v1059_v5, %v997_v7  ;;  %865 = vst [vmem:[#allocation2 + $0x118] sm:$0xff] %v2381_v8  ;;  %897 = vst [vmem:[#allocation2 + $0xe8] sm:$0xff] %v2736_v9  ;;  %v1002_v30 = vmul.f32 %v2381_v8, %v2381_v8 }
 0x10b   : > { %v631_v13 = vpop.f32.mrf.mxu0  ;;  %v2739_v14 = vpop.f32.mrf.mxu1 }
 0x10c   : > { %v1061_v16 = vadd.f32 %v1060_v12, %v998_v10  ;;  %863 = vst [vmem:[#allocation2 + $0x180] sm:$0xff] %v631_v13  ;;  %v926_v17 = vadd.f32 %v2378_v62, %v925_v11  ;;  %895 = vst [vmem:[#allocation2 + $0x1a0] sm:$0xff] %v2739_v14  ;;  %v1000_v21 = vmul.f32 %v631_v13, %v631_v13 }
 0x10d   : > { %v2382_v18 = vpop.f32.mrf.mxu0  ;;  %v2742_v19 = vpop.f32.mrf.mxu1 }
 0x10e   : > { %v927_v20 = vadd.f32 %v926_v17, %v631_v13  ;;  %v1062_v22 = vadd.f32 %v1061_v16, %v999_v15  ;;  %866 = vst [vmem:[#allocation2 + $0x98] sm:$0xff] %v2382_v18  ;;  %898 = vst [vmem:[#allocation2 + $0x78] sm:$0xff] %v2742_v19  ;;  %v1003_v35 = vmul.f32 %v2382_v18, %v2382_v18 }
 0x10f   : > { %v634_v23 = vpop.f32.mrf.mxu0  ;;  %v2745_v24 = vpop.f32.mrf.mxu1 }
 0x110   : > { %v1063_v25 = vadd.f32 %v1062_v22, %v1000_v21  ;;  %864 = vst [vmem:[#allocation2 + $0x110] sm:$0xff] %v634_v23  ;;  %v928_v26 = vadd.f32 %v927_v20, %v634_v23  ;;  %v1001_v27 = vmul.f32 %v634_v23, %v634_v23  ;;  %896 = vst [vmem:[#allocation2 + $0x1f0] sm:$0xff] %v2745_v24 }
 0x111   : > { %v2385_v28 = vpop.f32.mrf.mxu0  ;;  %v2748_v29 = vpop.f32.mrf.mxu1 }
 0x112   : > { %v929_v31 = vadd.f32 %v2381_v8, %v928_v26  ;;  %v1064_v32 = vadd.f32 %v1063_v25, %v1001_v27  ;;  %869 = vst [vmem:[#allocation2 + $0x108] sm:$0xff] %v2385_v28  ;;  %901 = vst [vmem:[#allocation2 + $0x1d8] sm:$0xff] %v2748_v29  ;;  %v1006_v55 = vmul.f32 %v2385_v28, %v2385_v28 }
 0x113   : > { %v647_v33 = vpop.f32.mrf.mxu0  ;;  %v2751_v34 = vpop.f32.mrf.mxu1 }
 0x114   : > { %v1065_v36 = vadd.f32 %v1064_v32, %v1002_v30  ;;  %867 = vst [vmem:[#allocation2 + $0x120] sm:$0xff] %v647_v33  ;;  %v930_v37 = vadd.f32 %v2382_v18, %v929_v31  ;;  %899 = vst [vmem:[#allocation2 + $0x70] sm:$0xff] %v2751_v34  ;;  %v1004_v41 = vmul.f32 %v647_v33, %v647_v33 }
 0x115   : > { %v2386_v38 = vpop.f32.mrf.mxu0  ;;  %v2754_v39 = vpop.f32.mrf.mxu1 }
 0x116   : > { %v931_v40 = vadd.f32 %v930_v37, %v647_v33  ;;  %v1066_v43 = vadd.f32 %v1065_v36, %v1003_v35  ;;  %870 = vst [vmem:[#allocation2 + $0x60] sm:$0xff] %v2386_v38  ;;  %902 = vst [vmem:[#allocation2 + $0xd0] sm:$0xff] %v2754_v39  ;;  %v1007_v61 = vmul.f32 %v2386_v38, %v2386_v38 }
 0x117   : > { %v650_v45 = vpop.f32.mrf.mxu0  ;;  %v2757_v47 = vpop.f32.mrf.mxu1 }
 0x118   : > { %v1067_v49 = vadd.f32 %v1066_v43, %v1004_v41  ;;  %868 = vst [vmem:[#allocation2 + $0x150] sm:$0xff] %v650_v45  ;;  %v932_v50 = vadd.f32 %v931_v40, %v650_v45  ;;  %v1005_v51 = vmul.f32 %v650_v45, %v650_v45  ;;  %900 = vst [vmem:[#allocation2 + $0x90] sm:$0xff] %v2757_v47 }
 0x119   : > { %v2389_v52 = vpop.f32.mrf.mxu0  ;;  %v2760_v54 = vpop.f32.mrf.mxu1 }
 0x11a   : > { %v933_v56 = vadd.f32 %v2385_v28, %v932_v50  ;;  %v1068_v57 = vadd.f32 %v1067_v49, %v1005_v51  ;;  %873 = vst [vmem:[#allocation2 + $0x138] sm:$0xff] %v2389_v52  ;;  %905 = vst [vmem:[#allocation2 + $0xa8] sm:$0xff] %v2760_v54  ;;  %v1010_v16 = vmul.f32 %v2389_v52, %v2389_v52 }
 0x11b   : > { %v663_v59 = vpop.f32.mrf.mxu0  ;;  %v2763_v60 = vpop.f32.mrf.mxu1 }
 0x11c   : > { %v1069_v62 = vadd.f32 %v1068_v57, %v1006_v55  ;;  %871 = vst [vmem:[#allocation2 + $0xe0] sm:$0xff] %v663_v59  ;;  %v934_v0 = vadd.f32 %v2386_v38, %v933_v56  ;;  %903 = vst [vmem:[#allocation2 + $0xb8] sm:$0xff] %v2763_v60  ;;  %v1008_v5 = vmul.f32 %v663_v59, %v663_v59 }
 0x11d   : > { %v2390_v1 = vpop.f32.mrf.mxu0  ;;  %v2766_v2 = vpop.f32.mrf.mxu1 }
 0x11e   : > { %v935_v3 = vadd.f32 %v934_v0, %v663_v59  ;;  %v1070_v6 = vadd.f32 %v1069_v62, %v1007_v61  ;;  %874 = vst [vmem:[#allocation2 + $0x140] sm:$0xff] %v2390_v1  ;;  %906 = vst [vmem:[#allocation2 + $0x1c8] sm:$0xff] %v2766_v2  ;;  %v1011_v22 = vmul.f32 %v2390_v1, %v2390_v1 }
 0x11f   : > { %v666_v7 = vpop.f32.mrf.mxu0  ;;  %v2769_v8 = vpop.f32.mrf.mxu1 }
 0x120   : > { %v1071_v10 = vadd.f32 %v1070_v6, %v1008_v5  ;;  %872 = vst [vmem:[#allocation2 + $0x188] sm:$0xff] %v666_v7  ;;  %v936_v11 = vadd.f32 %v935_v3, %v666_v7  ;;  %v1009_v12 = vmul.f32 %v666_v7, %v666_v7  ;;  %904 = vst [vmem:[#allocation2 + $0x88] sm:$0xff] %v2769_v8 }
 0x121   : > { %v2393_v13 = vpop.f32.mrf.mxu0  ;;  %v2772_v15 = vpop.f32.mrf.mxu1 }
 0x122   : > { %v937_v17 = vadd.f32 %v2389_v52, %v936_v11  ;;  %v1072_v18 = vadd.f32 %v1071_v10, %v1009_v12  ;;  %877 = vst [vmem:[#allocation2 + $0x1b8] sm:$0xff] %v2393_v13  ;;  %909 = vst [vmem:[#allocation2 + $0x68] sm:$0xff] %v2772_v15  ;;  %v1014_v41 = vmul.f32 %v2393_v13, %v2393_v13 }
 0x123   : > { %v679_v20 = vpop.f32.mrf.mxu0  ;;  %v2775_v21 = vpop.f32.mrf.mxu1 }
 0x124   : > { %v1073_v23 = vadd.f32 %v1072_v18, %v1010_v16  ;;  %875 = vst [vmem:[#allocation2 + $0x80] sm:$0xff] %v679_v20  ;;  %v938_v25 = vadd.f32 %v2390_v1, %v937_v17  ;;  %907 = vst [vmem:[#allocation2 + $0x170] sm:$0xff] %v2775_v21  ;;  %v1012_v30 = vmul.f32 %v679_v20, %v679_v20 }
 0x125   : > { %v2394_v26 = vpop.f32.mrf.mxu0  ;;  %v2778_v27 = vpop.f32.mrf.mxu1 }
 0x126   : > { %v939_v28 = vadd.f32 %v938_v25, %v679_v20  ;;  %v1074_v31 = vadd.f32 %v1073_v23, %v1011_v22  ;;  %878 = vst [vmem:[#allocation2 + $0x28] sm:$0xff] %v2394_v26  ;;  %910 = vst [vmem:[#allocation2 + $0x190] sm:$0xff] %v2778_v27  ;;  %v1015_v51 = vmul.f32 %v2394_v26, %v2394_v26 }
 0x127   : > { %v682_v32 = vpop.f32.mrf.mxu0  ;;  %v2781_v33 = vpop.f32.mrf.mxu1 }
 0x128   : > { %v1075_v35 = vadd.f32 %v1074_v31, %v1012_v30  ;;  %876 = vst [vmem:[#allocation2 + $0x1a8] sm:$0xff] %v682_v32  ;;  %v940_v36 = vadd.f32 %v939_v28, %v682_v32  ;;  %v1013_v37 = vmul.f32 %v682_v32, %v682_v32  ;;  %908 = vst [vmem:[#allocation2 + $0x178] sm:$0xff] %v2781_v33 }
 0x129   : > { %v2397_v38 = vpop.f32.mrf.mxu0  ;;  %v2784_v40 = vpop.f32.mrf.mxu1 }
 0x12a   : > { %v941_v43 = vadd.f32 %v2393_v13, %v940_v36  ;;  %v1076_v45 = vadd.f32 %v1075_v35, %v1013_v37  ;;  %881 = vst [vmem:[#allocation2 + $0x160] sm:$0xff] %v2397_v38  ;;  %913 = vst [vmem:[#allocation2 + $0xc0] sm:$0xff] %v2784_v40  ;;  %v1018_v11 = vmul.f32 %v2397_v38, %v2397_v38 }
 0x12b   : > { %v695_v49 = vpop.f32.mrf.mxu0  ;;  %v2787_v50 = vpop.f32.mrf.mxu1 }
 0x12c   : > { %v1077_v52 = vadd.f32 %v1076_v45, %v1014_v41  ;;  %879 = vst [vmem:[#allocation2 + $0x1e8] sm:$0xff] %v695_v49  ;;  %v942_v55 = vadd.f32 %v2394_v26, %v941_v43  ;;  %911 = vst [vmem:[#allocation2 + $0x198] sm:$0xff] %v2787_v50  ;;  %v1016_v61 = vmul.f32 %v695_v49, %v695_v49 }
 0x12d   : > { %v2398_v56 = vpop.f32.mrf.mxu0  ;;  %v2790_v57 = vpop.f32.mrf.mxu1 }
 0x12e   : > { %v943_v59 = vadd.f32 %v942_v55, %v695_v49  ;;  %v1078_v62 = vadd.f32 %v1077_v52, %v1015_v51  ;;  %882 = vst [vmem:[#allocation2 + $0x30] sm:$0xff] %v2398_v56  ;;  %914 = vst [vmem:[#allocation2 + $0x1c0] sm:$0xff] %v2790_v57  ;;  %v1019_v18 = vmul.f32 %v2398_v56, %v2398_v56 }
 0x12f   : > { %v698_v0 = vpop.f32.mrf.mxu0  ;;  %v2793_v1 = vpop.f32.mrf.mxu1  ;;  %v1024_v52 = vmul.f32 %v2715_v44, %v2715_v44 }
 0x130   : > { %v1079_v3 = vadd.f32 %v1078_v62, %v1016_v61  ;;  %880 = vst [vmem:[#allocation2 + $0xf8] sm:$0xff] %v698_v0  ;;  %v944_v5 = vadd.f32 %v943_v59, %v698_v0  ;;  %v1017_v6 = vmul.f32 %v698_v0, %v698_v0  ;;  %912 = vst [vmem:[#allocation2 + $0x38] sm:$0xff] %v2793_v1 }
 0x131   : > { %v2401_v7 = vpop.f32.mrf.mxu0  ;;  %v2796_v10 = vpop.f32.mrf.mxu1  ;;  %v1025_v61 = vmul.f32 %v2721_v48, %v2721_v48  ;;  %v1026_v0 = vmul.f32 %v2712_v42, %v2712_v42 }
 0x132   : > { %v945_v12 = vadd.f32 %v2397_v38, %v944_v5  ;;  %v1080_v13 = vadd.f32 %v1079_v3, %v1017_v6  ;;  %885 = vst [vmem:[#allocation2 + $0xf0] sm:$0xff] %v2401_v7  ;;  %917 = vst [vmem:[#allocation2 + $0x58] sm:$0xff] %v2796_v10  ;;  %v1022_v38 = vmul.f32 %v2401_v7, %v2401_v7 }
 0x133   : > { %v711_v16 = vpop.f32.mrf.mxu0  ;;  %v2799_v17 = vpop.f32.mrf.mxu1  ;;  %v1027_v6 = vmul.f32 %v2718_v46, %v2718_v46 }
 0x134   : > { %v1081_v20 = vadd.f32 %v1080_v13, %v1018_v11  ;;  %883 = vst [vmem:[#allocation2 + $0x1e0] sm:$0xff] %v711_v16  ;;  %v946_v22 = vadd.f32 %v2398_v56, %v945_v12  ;;  %915 = vst [vmem:[#allocation2 + $0x158] sm:$0xff] %v2799_v17  ;;  %v1020_v28 = vmul.f32 %v711_v16, %v711_v16 }
 0x135   : > { %v2402_v23 = vpop.f32.mrf.mxu0  ;;  %v2802_v25 = vpop.f32.mrf.mxu1  ;;  %v1028_v12 = vmul.f32 %v2727_v58, %v2727_v58 }
 0x136   : > { %v947_v26 = vadd.f32 %v946_v22, %v711_v16  ;;  %v1082_v30 = vadd.f32 %v1081_v20, %v1019_v18  ;;  %886 = vst [vmem:[#allocation2 + $0x8] sm:$0xff] %v2402_v23  ;;  %918 = vst [vmem:[#allocation2 + $0xa0] sm:$0xff] %v2802_v25  ;;  %v1023_v45 = vmul.f32 %v2402_v23, %v2402_v23 }
 0x137   : > { %v714_v31 = vpop.f32.mrf.mxu0  ;;  %v2805_v32 = vpop.f32.mrf.mxu1  ;;  %v1029_v18 = vmul.f32 %v2733_v4, %v2733_v4 }
 0x138   : > { %v1083_v35 = vadd.f32 %v1082_v30, %v1020_v28  ;;  %884 = vst [vmem:[#allocation2] sm:$0xff] %v714_v31  ;;  %v948_v36 = vadd.f32 %v947_v26, %v714_v31  ;;  %v1021_v37 = vmul.f32 %v714_v31, %v714_v31  ;;  %916 = vst [vmem:[#allocation2 + $0x10] sm:$0xff] %v2805_v32 }
 0x139   : > { %v1032_v28 = vmul.f32 %v2739_v14, %v2739_v14 }
 0x13a   : > { %v949_v41 = vadd.f32 %v2401_v7, %v948_v36  ;;  %v1084_v43 = vadd.f32 %v1083_v35, %v1021_v37  ;;  %v1033_v35 = vmul.f32 %v2745_v24, %v2745_v24 }
 0x13c   : > { %v950_v49 = vadd.f32 %v2402_v23, %v949_v41  ;;  %v1085_v51 = vadd.f32 %v1084_v43, %v1022_v38  ;;  %v1036_v43 = vmul.f32 %v2751_v34, %v2751_v34 }
 0x13e   : > { %v1086_v55 = vadd.f32 %v1085_v51, %v1023_v45  ;;  %v951_v56 = vadd.f32 %v950_v49, %v2715_v44  ;;  %v1037_v51 = vmul.f32 %v2757_v47, %v2757_v47 }
 0x140   : > { %v952_v59 = vadd.f32 %v951_v56, %v2721_v48  ;;  %v1087_v62 = vadd.f32 %v1086_v55, %v1024_v52 }
 0x142   : > { %v953_v3 = vadd.f32 %v2712_v42, %v952_v59  ;;  %v1088_v5 = vadd.f32 %v1087_v62, %v1025_v61  ;;  %v1030_v42 = vmul.f32 %v2724_v53, %v2724_v53  ;;  %v1040_v61 = vmul.f32 %v2763_v60, %v2763_v60 }
 0x144   : > { %v1089_v7 = vadd.f32 %v1088_v5, %v1026_v0  ;;  %v954_v11 = vadd.f32 %v2718_v46, %v953_v3  ;;  %v1031_v46 = vmul.f32 %v2730_v63, %v2730_v63  ;;  %v1041_v3 = vmul.f32 %v2769_v8, %v2769_v8 }
 0x146   : > { %v955_v44 = vadd.f32 %v954_v11, %v2727_v58  ;;  %v1090_v13 = vadd.f32 %v1089_v7, %v1027_v6 }
 0x148   : > { %v1091_v48 = vadd.f32 %v1090_v13, %v1028_v12  ;;  %v956_v16 = vadd.f32 %v955_v44, %v2733_v4  ;;  %v1044_v44 = vmul.f32 %v2775_v21, %v2775_v21 }
 0x14a   : > { %v957_v20 = vadd.f32 %v2724_v53, %v956_v16  ;;  %v1092_v22 = vadd.f32 %v1091_v48, %v1029_v18  ;;  %v1034_v53 = vmul.f32 %v2736_v9, %v2736_v9  ;;  %v1045_v48 = vmul.f32 %v2781_v33, %v2781_v33 }
 0x14c   : > { %v1093_v23 = vadd.f32 %v1092_v22, %v1030_v42  ;;  %v958_v26 = vadd.f32 %v2730_v63, %v957_v20  ;;  %v1035_v63 = vmul.f32 %v2742_v19, %v2742_v19  ;;  %v1048_v22 = vmul.f32 %v2787_v50, %v2787_v50 }
 0x14e   : > { %v959_v58 = vadd.f32 %v958_v26, %v2739_v14  ;;  %v1094_v30 = vadd.f32 %v1093_v23, %v1031_v46  ;;  %v1049_v26 = vmul.f32 %v2793_v1, %v2793_v1 }
 0x150   : > { %v1095_v31 = vadd.f32 %v1094_v30, %v1032_v28  ;;  %v960_v4 = vadd.f32 %v959_v58, %v2745_v24 }
 0x152   : > { %v961_v36 = vadd.f32 %v2736_v9, %v960_v4  ;;  %v1096_v37 = vadd.f32 %v1095_v31, %v1033_v35  ;;  %v1038_v9 = vmul.f32 %v2748_v29, %v2748_v29  ;;  %v1052_v4 = vmul.f32 %v2799_v17, %v2799_v17 }
 0x154   : > { %v1097_v38 = vadd.f32 %v1096_v37, %v1034_v53  ;;  %v962_v41 = vadd.f32 %v2742_v19, %v961_v36  ;;  %v1039_v19 = vmul.f32 %v2754_v39, %v2754_v39  ;;  %v1053_v36 = vmul.f32 %v2805_v32, %v2805_v32 }
 0x156   : > { %v963_v14 = vadd.f32 %v962_v41, %v2751_v34  ;;  %v1098_v45 = vadd.f32 %v1097_v38, %v1035_v63 }
 0x158   : > { %v1099_v49 = vadd.f32 %v1098_v45, %v1036_v43  ;;  %v964_v24 = vadd.f32 %v963_v14, %v2757_v47 }
 0x15a   : > { %v965_v52 = vadd.f32 %v2748_v29, %v964_v24  ;;  %v1100_v55 = vadd.f32 %v1099_v49, %v1037_v51  ;;  %v1042_v29 = vmul.f32 %v2760_v54, %v2760_v54 }
 0x15c   : > { %v1101_v56 = vadd.f32 %v1100_v55, %v1038_v9  ;;  %v966_v59 = vadd.f32 %v2754_v39, %v965_v52  ;;  %v1043_v39 = vmul.f32 %v2766_v2, %v2766_v2  ;;  %v919_v55 = vld [vmem:[#allocation3] sm:$0x1] }
 0x15e   : > { %v967_v34 = vadd.f32 %v966_v59, %v2763_v60  ;;  %v1102_v62 = vadd.f32 %v1101_v56, %v1039_v19  ;;  %v991_v56 = vld [vmem:[#allocation4] sm:$0x1] }
 0x160   : > { %v1103_v0 = vadd.f32 %v1102_v62, %v1040_v61  ;;  %v968_v47 = vadd.f32 %v967_v34, %v2769_v8 }
 0x162   : > { %v969_v5 = vadd.f32 %v2760_v54, %v968_v47  ;;  %v1104_v6 = vadd.f32 %v1103_v0, %v1041_v3  ;;  %v1046_v54 = vmul.f32 %v2772_v15, %v2772_v15 }
 0x164   : > { %v1105_v7 = vadd.f32 %v1104_v6, %v1042_v29  ;;  %v970_v11 = vadd.f32 %v2766_v2, %v969_v5  ;;  %v1047_v2 = vmul.f32 %v2778_v27, %v2778_v27 }
 0x166   : > { %v971_v60 = vadd.f32 %v970_v11, %v2775_v21  ;;  %v1106_v12 = vadd.f32 %v1105_v7, %v1043_v39 }
 0x168   : > { %v1107_v13 = vadd.f32 %v1106_v12, %v1044_v44  ;;  %v972_v8 = vadd.f32 %v971_v60, %v2781_v33 }
 0x16a   : > { %v973_v16 = vadd.f32 %v2772_v15, %v972_v8  ;;  %v1108_v18 = vadd.f32 %v1107_v13, %v1045_v48  ;;  %v1050_v15 = vmul.f32 %v2784_v40, %v2784_v40 }
 0x16c   : > { %v1109_v42 = vadd.f32 %v1108_v18, %v1046_v54  ;;  %v974_v20 = vadd.f32 %v2778_v27, %v973_v16  ;;  %v1051_v27 = vmul.f32 %v2790_v57, %v2790_v57 }
 0x16e   : > { %v975_v21 = vadd.f32 %v974_v20, %v2787_v50  ;;  %v1110_v46 = vadd.f32 %v1109_v42, %v1047_v2 }
 0x170   : > { %v1111_v23 = vadd.f32 %v1110_v46, %v1048_v22  ;;  %v976_v33 = vadd.f32 %v975_v21, %v2793_v1 }
 0x172   : > { %v977_v58 = vadd.f32 %v2784_v40, %v976_v33  ;;  %v1112_v28 = vadd.f32 %v1111_v23, %v1049_v26  ;;  %v1054_v40 = vmul.f32 %v2796_v10, %v2796_v10 }
 0x174   : > { %v1113_v30 = vadd.f32 %v1112_v28, %v1050_v15  ;;  %v978_v31 = vadd.f32 %v2790_v57, %v977_v58  ;;  %v1055_v57 = vmul.f32 %v2802_v25, %v2802_v25 }
 0x176   : > { %v979_v50 = vadd.f32 %v978_v31, %v2799_v17  ;;  %v1114_v35 = vadd.f32 %v1113_v30, %v1051_v27 }
 0x178   : > { %v1115_v53 = vadd.f32 %v1114_v35, %v1052_v4  ;;  %v980_v1 = vadd.f32 %v979_v50, %v2805_v32 }
 0x17a   : > { %v981_v37 = vadd.f32 %v2796_v10, %v980_v1  ;;  %v1116_v63 = vadd.f32 %v1115_v53, %v1053_v36 }
 0x17c   : > { %v982_v38 = vadd.f32 %v2802_v25, %v981_v37  ;;  %v1117_v41 = vadd.f32 %v1116_v63, %v1054_v40 }
 0x17e   : > { %v983_v17 = vrot.slane %v982_v38, 4  ;;  %v1118_v14 = vadd.f32 %v1117_v41, %v1055_v57 }
 0x180   : > { %v984_v43 = vadd.f32 %v983_v17, %v982_v38  ;;  %v1119_v45 = vrot.slane %v1118_v14, 4 }
 0x182   : > { %v985_v49 = vrot.slane %v984_v43, 2  ;;  %v1120_v24 = vadd.f32 %v1119_v45, %v1118_v14 }
 0x184   : > { %v986_v51 = vadd.f32 %v985_v49, %v984_v43  ;;  %v1121_v32 = vrot.slane %v1120_v24, 2 }
 0x186   : > { %v987_v9 = vrot.slane %v986_v51, 1  ;;  %v1122_v52 = vadd.f32 %v1121_v32, %v1120_v24 }
 0x188   : > { %v988_v19 = vadd.f32 %v987_v9, %v986_v51  ;;  %v1123_v10 = vrot.slane %v1122_v52, 1 }
 0x18a   : > { %v989_v59 = vadd.f32 %v988_v19, %v919_v55  ;;  %v1124_v34 = vadd.f32 %v1123_v10, %v1122_v52 }
 0x18c   : > { %990 = vst [vmem:[#allocation3] sm:$0x1] %v989_v59  ;;  %v1125_v61 = vadd.f32 %v1124_v34, %v991_v56 }
 0x18e   : > { %1126 = vst [vmem:[#allocation4] sm:$0x1] %v1125_v61 }
 0x18f PF: > { %1128 = sbr.rel (!%p234_p4) target bundleno = 435 (0x1b3), region = 48  ;;  %v1136_v39 = vld [vmem:[%s3152_s2] sm:$0x1] (%p234_p4) }
 0x190   : > { %v1141_v60 = vld [vmem:[%s3153_s3] sm:$0x1] (%p234_p4) }
 0x193   : > { %v1129_v25 = vld [vmem:[#allocation3] sm:$0x1] (%p234_p4) }
 0x194   : > { %v1130_v0 = vmul.f32 0.001953125, %v1129_v25 }
 0x195   : > { %v1131_v62 = vld [vmem:[#allocation4] sm:$0x1] }
 0x196   : > { %v1132_v47 = vmul.f32 0.001953125, %v1131_v62  ;;  %v1133_v3 = vmul.f32 %v1130_v0, %v1130_v0 }
 0x198   : > { %v1134_v29 = vsub.f32 %v1132_v47, %v1133_v3 }
 0x19a   : > { %v1135_v5 = vmax.f32 %v1134_v29, 0.0 }
 0x19c   : > { %v1137_v6 = vadd.f32 1e-05, %v1135_v5 }
 0x19e   : > { %2516 = vrsqrt.f32 %v1137_v6 }
 0x1ab   : > { %v2517_v7 = vpop.eup %2516 }
 0x1ac   : > { %v1139_v11 = vmul.f32 %v2517_v7, %v1136_v39 }
 0x1ae   : > { %1140 = vst [vmem:[#allocation5] sm:$0x1] %v1139_v11  ;;  %v1142_v44 = vmul.f32 %v1139_v11, %v1130_v0 }
 0x1b0   : > { %v1143_v12 = vsub.f32 %v1141_v60, %v1142_v44 }
 0x1b2   : > { %1144 = vst [vmem:[#allocation6] sm:$0x1] %v1143_v12 }
 0x1b3 PF: > { %p1988_p6 = scmp.ne.s32.totalorder %s2532_s15, 1 }
 0x1b5   : > { %1148 = sbr.rel (%p1988_p6) target bundleno = 537 (0x219), region = 52 }
 0x1ba   : > { %v1150_v13 = vld [vmem:[#allocation2 + $0xb0] sm:$0xff]  ;;  %v2913_v48 = vld [vmem:[#allocation5] ss:$0 sm:$0xff]  ;;  %v2917_v18 = vld [vmem:[#allocation6] ss:$0 sm:$0xff] }
 0x1bb   : > { %v1151_v8 = vld [vmem:[#allocation2 + $0x1b0] sm:$0xff]  ;;  %v1221_v54 = vmul.f32 %v2913_v48, %v1150_v13  ;;  %v1152_v2 = vld [vmem:[#allocation2 + $0xd8] sm:$0xff]  ;;  %v1155_v46 = vld [vmem:[#allocation2 + $0x168] sm:$0xff] }
 0x1bc   : > { %v1222_v16 = vmul.f32 %v2913_v48, %v1151_v8  ;;  %v1153_v42 = vld [vmem:[#allocation2 + $0x18] sm:$0xff]  ;;  %v1223_v20 = vmul.f32 %v2913_v48, %v1152_v2  ;;  %v1154_v22 = vld [vmem:[#allocation2 + $0x50] sm:$0xff]  ;;  %v1226_v58 = vmul.f32 %v2913_v48, %v1155_v46  ;;  %v1157_v28 = vld [vmem:[#allocation2 + $0x48] sm:$0xff] }
 0x1bd   : > { %v1224_v21 = vmul.f32 %v2913_v48, %v1153_v42  ;;  %v1156_v23 = vld [vmem:[#allocation2 + $0x130] sm:$0xff]  ;;  %v1292_v33 = vadd.f32 %v2917_v18, %v1221_v54  ;;  %v1225_v15 = vmul.f32 %v2913_v48, %v1154_v22  ;;  %v1228_v50 = vmul.f32 %v2913_v48, %v1157_v28  ;;  %v1158_v14 = vld [vmem:[#allocation2 + $0x180] sm:$0xff]  ;;  %v1160_v45 = vld [vmem:[#allocation2 + $0x118] sm:$0xff] }
 0x1be   : > { %v1293_v26 = vadd.f32 %v2917_v18, %v1222_v16  ;;  %v1294_v27 = vadd.f32 %v2917_v18, %v1223_v20  ;;  %v1227_v31 = vmul.f32 %v2913_v48, %v1156_v23  ;;  %v1297_v63 = vadd.f32 %v2917_v18, %v1226_v58  ;;  %v1159_v43 = vld [vmem:[#allocation2 + $0x110] sm:$0xff]  ;;  %v1161_v52 = vld [vmem:[#allocation2 + $0x98] sm:$0xff]  ;;  %v1162_v59 = vld [vmem:[#allocation2 + $0x120] sm:$0xff] }
 0x1bf   : > { %v1295_v30 = vadd.f32 %v2917_v18, %v1224_v21  ;;  %vm1356_vm0 = vcmp.ge.f32.partialorder %v1292_v33, 0.0  ;;  %v1420_v4 = vmul.f32 0.2, %v1292_v33  ;;  %v1296_v37 = vadd.f32 %v2917_v18, %v1225_v15  ;;  %v1163_v34 = vld [vmem:[#allocation2 + $0x150] sm:$0xff]  ;;  %v1164_v11 = vld [vmem:[#allocation2 + $0x108] sm:$0xff]  ;;  %v1165_v42 = vld [vmem:[#allocation2 + $0x60] sm:$0xff] }
 0x1c0   : > { %vm1357_vm1 = vcmp.ge.f32.partialorder %v1293_v26, 0.0  ;;  %v1421_v35 = vmul.f32 0.2, %v1293_v26  ;;  %vm1358_vm2 = vcmp.ge.f32.partialorder %v1294_v27, 0.0  ;;  %v1422_v53 = vmul.f32 0.2, %v1294_v27 }
 0x1c1   : > { %vm1359_vm3 = vcmp.ge.f32.partialorder %v1295_v30, 0.0  ;;  %v1423_v1 = vmul.f32 0.2, %v1295_v30  ;;  %v1484_v36 = vsel %vm1356_vm0, %v1292_v33, %v1420_v4  ;;  %v1298_v17 = vadd.f32 %v2917_v18, %v1227_v31  ;;  %v1166_v23 = vld [vmem:[#allocation2 + $0xe0] sm:$0xff]  ;;  %v1167_v33 = vld [vmem:[#allocation2 + $0x188] sm:$0xff]  ;;  %v1168_v31 = vld [vmem:[#allocation2 + $0x138] sm:$0xff] }
 0x1c2   : > { %v1485_v40 = vsel %vm1357_vm1, %v1293_v26, %v1421_v35  ;;  %v1486_v38 = vsel %vm1358_vm2, %v1294_v27, %v1422_v53  ;;  %vm1360_vm4 = vcmp.ge.f32.partialorder %v1296_v37, 0.0  ;;  %vm1361_vm5 = vcmp.ge.f32.partialorder %v1297_v63, 0.0 }
 0x1c3   : > { %v2127_v57 = vpack.c.bf16 %v1485_v40, %v1484_v36  ;;  %v1487_v41 = vsel %vm1359_vm3, %v1295_v30, %v1423_v1  ;;  %v1424_v24 = vmul.f32 0.2, %v1296_v37  ;;  %v1425_v51 = vmul.f32 0.2, %v1297_v63  ;;  %v1169_v1 = vld [vmem:[#allocation2 + $0x140] sm:$0xff] }
 0x1c4   : > { %v2132_v49 = vpack.c.bf16 %v1487_v41, %v1486_v38  ;;  %v1299_v32 = vadd.f32 %v2917_v18, %v1228_v50  ;;  %vm1362_vm6 = vcmp.ge.f32.partialorder %v1298_v17, 0.0  ;;  %v1426_v9 = vmul.f32 0.2, %v1298_v17 }
 0x1c5   : > { %2128 = vst [vmem:[%s3154_s4] sm:$0xff] %v2127_v57   ;;  %v1488_v55 = vsel %vm1360_vm4, %v1296_v37, %v1424_v24  ;;  %v1229_v19 = vmul.f32 %v2913_v48, %v1158_v14  ;;  %v1230_v10 = vmul.f32 %v2913_v48, %v1159_v43  ;;  %v1231_v56 = vmul.f32 %v2913_v48, %v1160_v45 }
 0x1c6   : > { %2284 = vst [vmem:[%s3154_s4 + $0x8] sm:$0xff] %v2132_v49   ;;  %v1489_v61 = vsel %vm1361_vm5, %v1297_v63, %v1425_v51  ;;  %vm1363_vm7 = vcmp.ge.f32.partialorder %v1299_v32, 0.0  ;;  %v1427_v25 = vmul.f32 0.2, %v1299_v32  ;;  %v1490_v62 = vsel %vm1362_vm6, %v1298_v17, %v1426_v9  ;;  %v1170_v17 = vld [vmem:[#allocation2 + $0x80] sm:$0xff]  ;;  %v1171_v49 = vld [vmem:[#allocation2 + $0x1a8] sm:$0xff] }
 0x1c7   : > { %v2137_v0 = vpack.c.bf16 %v1489_v61, %v1488_v55  ;;  %v1300_v47 = vadd.f32 %v2917_v18, %v1229_v19  ;;  %v1301_v3 = vadd.f32 %v2917_v18, %v1230_v10  ;;  %v1232_v29 = vmul.f32 %v2913_v48, %v1161_v52  ;;  %v1172_v19 = vld [vmem:[#allocation2 + $0x1b8] sm:$0xff]  ;;  %v1173_v61 = vld [vmem:[#allocation2 + $0x28] sm:$0xff] }
 0x1c8   : > { %v1491_v5 = vsel %vm1363_vm7, %v1299_v32, %v1427_v25  ;;  %v1302_v6 = vadd.f32 %v2917_v18, %v1231_v56  ;;  %v1233_v39 = vmul.f32 %v2913_v48, %v1162_v59  ;;  %v1234_v7 = vmul.f32 %v2913_v48, %v1163_v34  ;;  %v1174_v25 = vld [vmem:[#allocation2 + $0x1e8] sm:$0xff] }
 0x1c9   : > { %2285 = vst [vmem:[%s3154_s4 + $0x10] sm:$0xff] %v2137_v0   ;;  %v2142_v60 = vpack.c.bf16 %v1491_v5, %v1490_v62  ;;  %vm1364_vm8 = vcmp.ge.f32.partialorder %v1300_v47, 0.0  ;;  %vm1365_vm9 = vcmp.ge.f32.partialorder %v1301_v3, 0.0  ;;  %v1428_v44 = vmul.f32 0.2, %v1300_v47  ;;  %v1175_v62 = vld [vmem:[#allocation2 + $0xf8] sm:$0xff] }
 0x1ca   : > { %v1429_v12 = vmul.f32 0.2, %v1301_v3  ;;  %v1303_v13 = vadd.f32 %v2917_v18, %v1232_v29  ;;  %vm1366_vm10 = vcmp.ge.f32.partialorder %v1302_v6, 0.0  ;;  %v1430_v8 = vmul.f32 0.2, %v1302_v6 }
 0x1cb   : > { %2286 = vst [vmem:[%s3154_s4 + $0x18] sm:$0xff] %v2142_v60   ;;  %v1492_v54 = vsel %vm1364_vm8, %v1300_v47, %v1428_v44  ;;  %v1304_v16 = vadd.f32 %v2917_v18, %v1233_v39  ;;  %v1305_v2 = vadd.f32 %v2917_v18, %v1234_v7  ;;  %v1235_v20 = vmul.f32 %v2913_v48, %v1164_v11  ;;  %v1176_v44 = vld [vmem:[#allocation2 + $0x160] sm:$0xff] }
 0x1cc   : > { %v1493_v21 = vsel %vm1365_vm9, %v1301_v3, %v1429_v12  ;;  %vm1367_vm11 = vcmp.ge.f32.partialorder %v1303_v13, 0.0  ;;  %v1431_v22 = vmul.f32 0.2, %v1303_v13  ;;  %v1494_v46 = vsel %vm1366_vm10, %v1302_v6, %v1430_v8 }
 0x1cd   : > { %v2147_v26 = vpack.c.bf16 %v1493_v21, %v1492_v54  ;;  %vm1368_vm12 = vcmp.ge.f32.partialorder %v1304_v16, 0.0  ;;  %vm1369_vm13 = vcmp.ge.f32.partialorder %v1305_v2, 0.0  ;;  %v1432_v15 = vmul.f32 0.2, %v1304_v16 }
 0x1ce   : > { %v1495_v58 = vsel %vm1367_vm11, %v1303_v13, %v1431_v22  ;;  %v1433_v28 = vmul.f32 0.2, %v1305_v2  ;;  %v1236_v27 = vmul.f32 %v2913_v48, %v1165_v42  ;;  %v1306_v30 = vadd.f32 %v2917_v18, %v1235_v20  ;;  %v1177_v22 = vld [vmem:[#allocation2 + $0x30] sm:$0xff] }
 0x1cf   : > { %2287 = vst [vmem:[%s3154_s4 + $0x20] sm:$0xff] %v2147_v26   ;;  %v2152_v50 = vpack.c.bf16 %v1495_v58, %v1494_v46  ;;  %v1496_v4 = vsel %vm1368_vm12, %v1304_v16, %v1432_v15  ;;  %v1237_v35 = vmul.f32 %v2913_v48, %v1166_v23  ;;  %v1238_v53 = vmul.f32 %v2913_v48, %v1167_v33  ;;  %v1178_v26 = vld [vmem:[#allocation2 + $0x1e0] sm:$0xff] }
 0x1d0   : > { %v1497_v36 = vsel %vm1369_vm13, %v1305_v2, %v1433_v28  ;;  %v1307_v40 = vadd.f32 %v2917_v18, %v1236_v27  ;;  %vm1370_vm14 = vcmp.ge.f32.partialorder %v1306_v30, 0.0  ;;  %v1434_v37 = vmul.f32 0.2, %v1306_v30  ;;  %v1179_v15 = vld [vmem:[#allocation2] sm:$0xff] }
 0x1d1   : > { %2288 = vst [vmem:[%s3154_s4 + $0x28] sm:$0xff] %v2152_v50   ;;  %v2157_v63 = vpack.c.bf16 %v1497_v36, %v1496_v4  ;;  %v1308_v57 = vadd.f32 %v2917_v18, %v1237_v35  ;;  %v1309_v38 = vadd.f32 %v2917_v18, %v1238_v53  ;;  %v1239_v41 = vmul.f32 %v2913_v48, %v1168_v31  ;;  %v1180_v36 = vld [vmem:[#allocation2 + $0xf0] sm:$0xff] }
 0x1d2   : > { %vm1371_vm15 = vcmp.ge.f32.partialorder %v1307_v40, 0.0  ;;  %v1435_v14 = vmul.f32 0.2, %v1307_v40  ;;  %v1498_v43 = vsel %vm1370_vm14, %v1306_v30, %v1434_v37  ;;  %v1240_v45 = vmul.f32 %v2913_v48, %v1169_v1 }
 0x1d3   : > { %2289 = vst [vmem:[%s3154_s4 + $0x30] sm:$0xff] %v2157_v63   ;;  %vm1372_vm0 = vcmp.ge.f32.partialorder %v1308_v57, 0.0  ;;  %vm1373_vm1 = vcmp.ge.f32.partialorder %v1309_v38, 0.0  ;;  %v1436_v24 = vmul.f32 0.2, %v1308_v57  ;;  %v1310_v9 = vadd.f32 %v2917_v18, %v1239_v41 }
 0x1d4   : > { %v1437_v51 = vmul.f32 0.2, %v1309_v38  ;;  %v1499_v32 = vsel %vm1371_vm15, %v1307_v40, %v1435_v14  ;;  %v1311_v52 = vadd.f32 %v2917_v18, %v1240_v45  ;;  %v1241_v55 = vmul.f32 %v2913_v48, %v1170_v17 }
 0x1d5   : > { %v2162_v10 = vpack.c.bf16 %v1499_v32, %v1498_v43  ;;  %v1500_v56 = vsel %vm1372_vm0, %v1308_v57, %v1436_v24  ;;  %v1242_v34 = vmul.f32 %v2913_v48, %v1171_v49  ;;  %vm1374_vm2 = vcmp.ge.f32.partialorder %v1310_v9, 0.0  ;;  %v1182_v24 = vld [vmem:[#allocation2 + $0x148] sm:$0xff] }
 0x1d6   : > { %v1501_v59 = vsel %vm1373_vm1, %v1309_v38, %v1437_v51  ;;  %vm1375_vm3 = vcmp.ge.f32.partialorder %v1311_v52, 0.0  ;;  %v1438_v47 = vmul.f32 0.2, %v1310_v9  ;;  %v1439_v3 = vmul.f32 0.2, %v1311_v52  ;;  %v1181_v38 = vld [vmem:[#allocation2 + $0x8] sm:$0xff] }
 0x1d7   : > { %v2167_v0 = vpack.c.bf16 %v1501_v59, %v1500_v56  ;;  %2290 = vst [vmem:[%s3154_s4 + $0x38] sm:$0xff] %v2162_v10   ;;  %v1312_v29 = vadd.f32 %v2917_v18, %v1241_v55  ;;  %v1313_v5 = vadd.f32 %v2917_v18, %v1242_v34  ;;  %v1243_v6 = vmul.f32 %v2913_v48, %v1172_v19 }
 0x1d8   : > { %v1502_v39 = vsel %vm1374_vm2, %v1310_v9, %v1438_v47  ;;  %v1244_v7 = vmul.f32 %v2913_v48, %v1173_v61  ;;  %v1245_v11 = vmul.f32 %v2913_v48, %v1174_v25  ;;  %v1246_v60 = vmul.f32 %v2913_v48, %v1175_v62  ;;  %v1184_v25 = vld [vmem:[#allocation2 + $0x100] sm:$0xff]  ;;  %v1185_v62 = vld [vmem:[#allocation2 + $0xc8] sm:$0xff] }
 0x1d9   : > { %2291 = vst [vmem:[%s3154_s4 + $0x40] sm:$0xff] %v2167_v0   ;;  %v1503_v12 = vsel %vm1375_vm3, %v1311_v52, %v1439_v3  ;;  %vm1376_vm4 = vcmp.ge.f32.partialorder %v1312_v29, 0.0  ;;  %vm1377_vm5 = vcmp.ge.f32.partialorder %v1313_v5, 0.0  ;;  %v1440_v13 = vmul.f32 0.2, %v1312_v29  ;;  %v1183_v52 = vld [vmem:[#allocation2 + $0x1d0] sm:$0xff] }
 0x1da   : > { %v2172_v8 = vpack.c.bf16 %v1503_v12, %v1502_v39  ;;  %v1441_v54 = vmul.f32 0.2, %v1313_v5  ;;  %v1314_v16 = vadd.f32 %v2917_v18, %v1243_v6  ;;  %v1315_v2 = vadd.f32 %v2917_v18, %v1244_v7  ;;  %v1187_v12 = vld [vmem:[#allocation2 + $0x1f8] sm:$0xff] }
 0x1db   : > { %v1504_v42 = vsel %vm1376_vm4, %v1312_v29, %v1440_v13  ;;  %v1316_v20 = vadd.f32 %v2917_v18, %v1245_v11  ;;  %v1317_v21 = vadd.f32 %v2917_v18, %v1246_v60  ;;  %v1247_v46 = vmul.f32 %v2913_v48, %v1176_v44  ;;  %v1186_v29 = vld [vmem:[#allocation2 + $0x40] sm:$0xff] }
 0x1dc   : > { %2292 = vst [vmem:[%s3154_s4 + $0x48] sm:$0xff] %v2172_v8   ;;  %v1505_v23 = vsel %vm1377_vm5, %v1313_v5, %v1441_v54  ;;  %vm1378_vm6 = vcmp.ge.f32.partialorder %v1314_v16, 0.0  ;;  %vm1379_vm7 = vcmp.ge.f32.partialorder %v1315_v2, 0.0  ;;  %v1442_v33 = vmul.f32 0.2, %v1314_v16 }
 0x1dd   : > { %v2177_v58 = vpack.c.bf16 %v1505_v23, %v1504_v42  ;;  %v1443_v28 = vmul.f32 0.2, %v1315_v2  ;;  %vm1380_vm8 = vcmp.ge.f32.partialorder %v1316_v20, 0.0  ;;  %vm1381_vm9 = vcmp.ge.f32.partialorder %v1317_v21, 0.0 }
 0x1de   : > { %v1506_v27 = vsel %vm1378_vm6, %v1314_v16, %v1442_v33  ;;  %v1444_v30 = vmul.f32 0.2, %v1316_v20  ;;  %v1445_v31 = vmul.f32 0.2, %v1317_v21  ;;  %v1248_v50 = vmul.f32 %v2913_v48, %v1177_v22  ;;  %v1188_v16 = vld [vmem:[#allocation2 + $0x20] sm:$0xff]  ;;  %v1189_v33 = vld [vmem:[#allocation2 + $0x128] sm:$0xff] }
 0x1df   : > { %2293 = vst [vmem:[%s3154_s4 + $0x50] sm:$0xff] %v2177_v58   ;;  %v1507_v4 = vsel %vm1379_vm7, %v1315_v2, %v1443_v28  ;;  %v1318_v35 = vadd.f32 %v2917_v18, %v1247_v46  ;;  %v1249_v53 = vmul.f32 %v2913_v48, %v1178_v26  ;;  %v1250_v1 = vmul.f32 %v2913_v48, %v1179_v15 }
 0x1e0   : > { %v2182_v40 = vpack.c.bf16 %v1507_v4, %v1506_v27  ;;  %v1508_v37 = vsel %vm1380_vm8, %v1316_v20, %v1444_v30  ;;  %v1509_v63 = vsel %vm1381_vm9, %v1317_v21, %v1445_v31  ;;  %v1319_v57 = vadd.f32 %v2917_v18, %v1248_v50  ;;  %v1190_v31 = vld [vmem:[#allocation2 + $0x1a0] sm:$0xff] }
 0x1e1   : > { %v2187_v41 = vpack.c.bf16 %v1509_v63, %v1508_v37  ;;  %vm1382_vm10 = vcmp.ge.f32.partialorder %v1318_v35, 0.0  ;;  %v1446_v17 = vmul.f32 0.2, %v1318_v35  ;;  %v1320_v14 = vadd.f32 %v2917_v18, %v1249_v53  ;;  %v1191_v53 = vld [vmem:[#allocation2 + $0x1f0] sm:$0xff] }
 0x1e2   : > { %2294 = vst [vmem:[%s3154_s4 + $0x58] sm:$0xff] %v2182_v40   ;;  %vm1383_vm11 = vcmp.ge.f32.partialorder %v1319_v57, 0.0  ;;  %v1447_v43 = vmul.f32 0.2, %v1319_v57  ;;  %v1321_v45 = vadd.f32 %v2917_v18, %v1250_v1  ;;  %v1251_v49 = vmul.f32 %v2913_v48, %v1180_v36 }
 0x1e3   : > { %2295 = vst [vmem:[%s3154_s4 + $0x60] sm:$0xff] %v2187_v41   ;;  %v1510_v51 = vsel %vm1382_vm10, %v1318_v35, %v1446_v17  ;;  %vm1384_vm12 = vcmp.ge.f32.partialorder %v1320_v14, 0.0  ;;  %v1448_v32 = vmul.f32 0.2, %v1320_v14  ;;  %v1252_v9 = vmul.f32 %v2913_v48, %v1181_v38  ;;  %v1192_v41 = vld [vmem:[#allocation2 + $0xe8] sm:$0xff]  ;;  %v1193_v17 = vld [vmem:[#allocation2 + $0x78] sm:$0xff] }
 0x1e4   : > { %v1511_v55 = vsel %vm1383_vm11, %v1319_v57, %v1447_v43  ;;  %vm1385_vm13 = vcmp.ge.f32.partialorder %v1321_v45, 0.0  ;;  %v1449_v19 = vmul.f32 0.2, %v1321_v45  ;;  %v1322_v10 = vadd.f32 %v2917_v18, %v1251_v49  ;;  %v1194_v49 = vld [vmem:[#allocation2 + $0x70] sm:$0xff] }
 0x1e5   : > { %v2192_v56 = vpack.c.bf16 %v1511_v55, %v1510_v51  ;;  %v1512_v59 = vsel %vm1384_vm12, %v1320_v14, %v1448_v32  ;;  %v1323_v34 = vadd.f32 %v2917_v18, %v1252_v9  ;;  %v1253_v61 = vmul.f32 %v2913_v48, %v1182_v24 }
 0x1e6   : > { %v1513_v0 = vsel %vm1385_vm13, %v1321_v45, %v1449_v19  ;;  %vm1386_vm14 = vcmp.ge.f32.partialorder %v1322_v10, 0.0  ;;  %v1450_v47 = vmul.f32 0.2, %v1322_v10  ;;  %v1254_v3 = vmul.f32 %v2913_v48, %v1183_v52 }
 0x1e7   : > { %2296 = vst [vmem:[%s3154_s4 + $0x68] sm:$0xff] %v2192_v56   ;;  %v2197_v5 = vpack.c.bf16 %v1513_v0, %v1512_v59  ;;  %vm1387_vm15 = vcmp.ge.f32.partialorder %v1323_v34, 0.0  ;;  %v1451_v6 = vmul.f32 0.2, %v1323_v34  ;;  %v1324_v39 = vadd.f32 %v2917_v18, %v1253_v61  ;;  %v1196_v61 = vld [vmem:[#allocation2 + $0x1d8] sm:$0xff] }
 0x1e8   : > { %v1514_v7 = vsel %vm1386_vm14, %v1322_v10, %v1450_v47  ;;  %v1325_v11 = vadd.f32 %v2917_v18, %v1254_v3  ;;  %v1255_v60 = vmul.f32 %v2913_v48, %v1184_v25  ;;  %v1256_v44 = vmul.f32 %v2913_v48, %v1185_v62  ;;  %v1195_v10 = vld [vmem:[#allocation2 + $0x90] sm:$0xff] }
 0x1e9   : > { %2297 = vst [vmem:[%s3154_s4 + $0x70] sm:$0xff] %v2197_v5   ;;  %v1515_v13 = vsel %vm1387_vm15, %v1323_v34, %v1451_v6  ;;  %vm1388_vm0 = vcmp.ge.f32.partialorder %v1324_v39, 0.0  ;;  %v1452_v8 = vmul.f32 0.2, %v1324_v39  ;;  %v1257_v54 = vmul.f32 %v2913_v48, %v1186_v29  ;;  %v1197_v6 = vld [vmem:[#allocation2 + $0xd0] sm:$0xff] }
 0x1ea   : > { %v2202_v2 = vpack.c.bf16 %v1515_v13, %v1514_v7  ;;  %vm1389_vm1 = vcmp.ge.f32.partialorder %v1325_v11, 0.0  ;;  %v1453_v42 = vmul.f32 0.2, %v1325_v11  ;;  %v1326_v20 = vadd.f32 %v2917_v18, %v1255_v60  ;;  %v1198_v13 = vld [vmem:[#allocation2 + $0xb8] sm:$0xff] }
 0x1eb   : > { %v1516_v21 = vsel %vm1388_vm0, %v1324_v39, %v1452_v8  ;;  %v1327_v22 = vadd.f32 %v2917_v18, %v1256_v44  ;;  %v1258_v46 = vmul.f32 %v2913_v48, %v1187_v12  ;;  %v1328_v23 = vadd.f32 %v2917_v18, %v1257_v54 }
 0x1ec   : > { %2298 = vst [vmem:[%s3154_s4 + $0x78] sm:$0xff] %v2202_v2   ;;  %v1517_v26 = vsel %vm1389_vm1, %v1325_v11, %v1453_v42  ;;  %vm1390_vm2 = vcmp.ge.f32.partialorder %v1326_v20, 0.0  ;;  %v1454_v15 = vmul.f32 0.2, %v1326_v20  ;;  %v1259_v58 = vmul.f32 %v2913_v48, %v1188_v16  ;;  %v1199_v2 = vld [vmem:[#allocation2 + $0x88] sm:$0xff] }
 0x1ed   : > { %v2207_v28 = vpack.c.bf16 %v1517_v26, %v1516_v21  ;;  %vm1391_vm3 = vcmp.ge.f32.partialorder %v1327_v22, 0.0  ;;  %v1455_v27 = vmul.f32 0.2, %v1327_v22  ;;  %v1329_v30 = vadd.f32 %v2917_v18, %v1258_v46  ;;  %v1200_v26 = vld [vmem:[#allocation2 + $0xa8] sm:$0xff] }
 0x1ee   : > { %v1518_v50 = vsel %vm1390_vm2, %v1326_v20, %v1454_v15  ;;  %vm1392_vm4 = vcmp.ge.f32.partialorder %v1328_v23, 0.0  ;;  %v1456_v4 = vmul.f32 0.2, %v1328_v23  ;;  %v1260_v35 = vmul.f32 %v2913_v48, %v1189_v33  ;;  %v1201_v15 = vld [vmem:[#allocation2 + $0x1c8] sm:$0xff] }
 0x1ef   : > { %2299 = vst [vmem:[%s3154_s4 + $0x80] sm:$0xff] %v2207_v28   ;;  %v1519_v1 = vsel %vm1391_vm3, %v1327_v22, %v1455_v27  ;;  %vm1393_vm5 = vcmp.ge.f32.partialorder %v1329_v30, 0.0  ;;  %v1457_v36 = vmul.f32 0.2, %v1329_v30  ;;  %v1330_v40 = vadd.f32 %v2917_v18, %v1259_v58 }
 0x1f0   : > { %v2212_v37 = vpack.c.bf16 %v1519_v1, %v1518_v50  ;;  %v1520_v63 = vsel %vm1392_vm4, %v1328_v23, %v1456_v4  ;;  %v1331_v57 = vadd.f32 %v2917_v18, %v1260_v35  ;;  %v1261_v38 = vmul.f32 %v2913_v48, %v1190_v31 }
 0x1f1   : > { %v1521_v14 = vsel %vm1393_vm5, %v1329_v30, %v1457_v36  ;;  %vm1394_vm6 = vcmp.ge.f32.partialorder %v1330_v40, 0.0  ;;  %v1458_v43 = vmul.f32 0.2, %v1330_v40  ;;  %v1262_v45 = vmul.f32 %v2913_v48, %v1191_v53  ;;  %v1202_v30 = vld [vmem:[#allocation2 + $0x170] sm:$0xff] }
 0x1f2   : > { %2300 = vst [vmem:[%s3154_s4 + $0x88] sm:$0xff] %v2212_v37   ;;  %v2217_v24 = vpack.c.bf16 %v1521_v14, %v1520_v63  ;;  %vm1395_vm7 = vcmp.ge.f32.partialorder %v1331_v57, 0.0  ;;  %v1459_v51 = vmul.f32 0.2, %v1331_v57  ;;  %v1332_v32 = vadd.f32 %v2917_v18, %v1261_v38  ;;  %v1204_v38 = vld [vmem:[#allocation2 + $0x68] sm:$0xff] }
 0x1f3   : > { %v1522_v9 = vsel %vm1394_vm6, %v1330_v40, %v1458_v43  ;;  %v1333_v52 = vadd.f32 %v2917_v18, %v1262_v45  ;;  %v1263_v55 = vmul.f32 %v2913_v48, %v1192_v41  ;;  %v1264_v19 = vmul.f32 %v2913_v48, %v1193_v17  ;;  %v1203_v40 = vld [vmem:[#allocation2 + $0x178] sm:$0xff] }
 0x1f4   : > { %2301 = vst [vmem:[%s3154_s4 + $0x90] sm:$0xff] %v2217_v24   ;;  %v1523_v56 = vsel %vm1395_vm7, %v1331_v57, %v1459_v51  ;;  %vm1396_vm8 = vcmp.ge.f32.partialorder %v1332_v32, 0.0  ;;  %v1460_v59 = vmul.f32 0.2, %v1332_v32  ;;  %v1265_v34 = vmul.f32 %v2913_v48, %v1194_v49  ;;  %v1205_v51 = vld [vmem:[#allocation2 + $0x190] sm:$0xff] }
 0x1f5   : > { %v2222_v25 = vpack.c.bf16 %v1523_v56, %v1522_v9  ;;  %vm1397_vm9 = vcmp.ge.f32.partialorder %v1333_v52, 0.0  ;;  %v1461_v62 = vmul.f32 0.2, %v1333_v52  ;;  %v1334_v0 = vadd.f32 %v2917_v18, %v1263_v55  ;;  %v1206_v56 = vld [vmem:[#allocation2 + $0x198] sm:$0xff] }
 0x1f6   : > { %v1524_v47 = vsel %vm1396_vm8, %v1332_v32, %v1460_v59  ;;  %v1335_v3 = vadd.f32 %v2917_v18, %v1264_v19  ;;  %v1266_v29 = vmul.f32 %v2913_v48, %v1195_v10  ;;  %v1336_v5 = vadd.f32 %v2917_v18, %v1265_v34 }
 0x1f7   : > { %2302 = vst [vmem:[%s3154_s4 + $0x98] sm:$0xff] %v2222_v25   ;;  %v1525_v39 = vsel %vm1397_vm9, %v1333_v52, %v1461_v62  ;;  %vm1398_vm10 = vcmp.ge.f32.partialorder %v1334_v0, 0.0  ;;  %v1462_v7 = vmul.f32 0.2, %v1334_v0  ;;  %v1267_v11 = vmul.f32 %v2913_v48, %v1196_v61  ;;  %v1207_v25 = vld [vmem:[#allocation2 + $0x38] sm:$0xff] }
 0x1f8   : > { %v2227_v60 = vpack.c.bf16 %v1525_v39, %v1524_v47  ;;  %vm1399_vm11 = vcmp.ge.f32.partialorder %v1335_v3, 0.0  ;;  %v1463_v44 = vmul.f32 0.2, %v1335_v3  ;;  %v1337_v12 = vadd.f32 %v2917_v18, %v1266_v29  ;;  %v1208_v39 = vld [vmem:[#allocation2 + $0xc0] sm:$0xff] }
 0x1f9   : > { %v1526_v8 = vsel %vm1398_vm10, %v1334_v0, %v1462_v7  ;;  %vm1400_vm12 = vcmp.ge.f32.partialorder %v1336_v5, 0.0  ;;  %v1464_v54 = vmul.f32 0.2, %v1336_v5  ;;  %v1268_v16 = vmul.f32 %v2913_v48, %v1197_v6  ;;  %v1209_v7 = vld [vmem:[#allocation2 + $0x1c0] sm:$0xff] }
 0x1fa   : > { %2303 = vst [vmem:[%s3154_s4 + $0xa0] sm:$0xff] %v2227_v60   ;;  %v1527_v42 = vsel %vm1399_vm11, %v1335_v3, %v1463_v44  ;;  %vm1401_vm13 = vcmp.ge.f32.partialorder %v1337_v12, 0.0  ;;  %v1465_v20 = vmul.f32 0.2, %v1337_v12  ;;  %v1338_v21 = vadd.f32 %v2917_v18, %v1267_v11 }
 0x1fb   : > { %v2232_v22 = vpack.c.bf16 %v1527_v42, %v1526_v8  ;;  %v1528_v46 = vsel %vm1400_vm12, %v1336_v5, %v1464_v54  ;;  %v1339_v23 = vadd.f32 %v2917_v18, %v1268_v16  ;;  %v1269_v33 = vmul.f32 %v2913_v48, %v1198_v13 }
 0x1fc   : > { %v1529_v58 = vsel %vm1401_vm13, %v1337_v12, %v1465_v20  ;;  %vm1402_vm14 = vcmp.ge.f32.partialorder %v1338_v21, 0.0  ;;  %v1466_v28 = vmul.f32 0.2, %v1338_v21  ;;  %v1270_v27 = vmul.f32 %v2913_v48, %v1199_v2  ;;  %v1210_v12 = vld [vmem:[#allocation2 + $0x158] sm:$0xff] }
 0x1fd   : > { %2304 = vst [vmem:[%s3154_s4 + $0xa8] sm:$0xff] %v2232_v22   ;;  %v2237_v31 = vpack.c.bf16 %v1529_v58, %v1528_v46  ;;  %vm1403_vm15 = vcmp.ge.f32.partialorder %v1339_v23, 0.0  ;;  %v1467_v50 = vmul.f32 0.2, %v1339_v23  ;;  %v1340_v4 = vadd.f32 %v2917_v18, %v1269_v33  ;;  %v1212_v33 = vld [vmem:[#allocation2 + $0x58] sm:$0xff] }
 0x1fe   : > { %v1530_v35 = vsel %vm1402_vm14, %v1338_v21, %v1466_v28  ;;  %v1341_v53 = vadd.f32 %v2917_v18, %v1270_v27  ;;  %v1271_v1 = vmul.f32 %v2913_v48, %v1200_v26  ;;  %v1272_v36 = vmul.f32 %v2913_v48, %v1201_v15  ;;  %v1211_v21 = vld [vmem:[#allocation2 + $0x10] sm:$0xff] }
 0x1ff   : > { %2305 = vst [vmem:[%s3154_s4 + $0xb0] sm:$0xff] %v2237_v31   ;;  %v1531_v37 = vsel %vm1403_vm15, %v1339_v23, %v1467_v50  ;;  %vm1404_vm0 = vcmp.ge.f32.partialorder %v1340_v4, 0.0  ;;  %v1468_v63 = vmul.f32 0.2, %v1340_v4  ;;  %v1273_v57 = vmul.f32 %v2913_v48, %v1202_v30  ;;  %v1213_v50 = vld [vmem:[#allocation2 + $0xa0] sm:$0xff] }
 0x200   : > { %v2242_v41 = vpack.c.bf16 %v1531_v37, %v1530_v35  ;;  %vm1405_vm1 = vcmp.ge.f32.partialorder %v1341_v53, 0.0  ;;  %v1469_v17 = vmul.f32 0.2, %v1341_v53  ;;  %v1342_v14 = vadd.f32 %v2917_v18, %v1271_v1 }
 0x201   : > { %v1532_v43 = vsel %vm1404_vm0, %v1340_v4, %v1468_v63  ;;  %v1343_v45 = vadd.f32 %v2917_v18, %v1272_v36  ;;  %v1274_v49 = vmul.f32 %v2913_v48, %v1203_v40  ;;  %v1344_v24 = vadd.f32 %v2917_v18, %v1273_v57 }
 0x202   : > { %2306 = vst [vmem:[%s3154_s4 + $0xb8] sm:$0xff] %v2242_v41   ;;  %v1533_v32 = vsel %vm1405_vm1, %v1341_v53, %v1469_v17  ;;  %vm1406_vm2 = vcmp.ge.f32.partialorder %v1342_v14, 0.0  ;;  %v1470_v9 = vmul.f32 0.2, %v1342_v14  ;;  %v1275_v52 = vmul.f32 %v2913_v48, %v1204_v38 }
 0x203   : > { %v2247_v55 = vpack.c.bf16 %v1533_v32, %v1532_v43  ;;  %vm1407_vm3 = vcmp.ge.f32.partialorder %v1343_v45, 0.0  ;;  %v1471_v19 = vmul.f32 0.2, %v1343_v45  ;;  %v1345_v10 = vadd.f32 %v2917_v18, %v1274_v49 }
 0x204   : > { %v1534_v59 = vsel %vm1406_vm2, %v1342_v14, %v1470_v9  ;;  %vm1408_vm4 = vcmp.ge.f32.partialorder %v1344_v24, 0.0  ;;  %v1472_v34 = vmul.f32 0.2, %v1344_v24  ;;  %v1276_v61 = vmul.f32 %v2913_v48, %v1205_v51 }
 0x205   : > { %2307 = vst [vmem:[%s3154_s4 + $0xc0] sm:$0xff] %v2247_v55   ;;  %v1535_v62 = vsel %vm1407_vm3, %v1343_v45, %v1471_v19  ;;  %vm1409_vm5 = vcmp.ge.f32.partialorder %v1345_v10, 0.0  ;;  %v1473_v0 = vmul.f32 0.2, %v1345_v10  ;;  %v1346_v47 = vadd.f32 %v2917_v18, %v1275_v52 }
 0x206   : > { %v2252_v3 = vpack.c.bf16 %v1535_v62, %v1534_v59  ;;  %v1536_v29 = vsel %vm1408_vm4, %v1344_v24, %v1472_v34  ;;  %v1347_v5 = vadd.f32 %v2917_v18, %v1276_v61  ;;  %v1277_v6 = vmul.f32 %v2913_v48, %v1206_v56 }
 0x207   : > { %v1537_v11 = vsel %vm1409_vm5, %v1345_v10, %v1473_v0  ;;  %vm1410_vm6 = vcmp.ge.f32.partialorder %v1346_v47, 0.0  ;;  %v1474_v60 = vmul.f32 0.2, %v1346_v47  ;;  %v1278_v44 = vmul.f32 %v2913_v48, %v1207_v25 }
 0x208   : > { %2308 = vst [vmem:[%s3154_s4 + $0xc8] sm:$0xff] %v2252_v3   ;;  %v2257_v13 = vpack.c.bf16 %v1537_v11, %v1536_v29  ;;  %vm1411_vm7 = vcmp.ge.f32.partialorder %v1347_v5, 0.0  ;;  %v1475_v8 = vmul.f32 0.2, %v1347_v5  ;;  %v1348_v54 = vadd.f32 %v2917_v18, %v1277_v6 }
 0x209   : > { %v1538_v16 = vsel %vm1410_vm6, %v1346_v47, %v1474_v60  ;;  %v1349_v2 = vadd.f32 %v2917_v18, %v1278_v44  ;;  %v1279_v42 = vmul.f32 %v2913_v48, %v1208_v39  ;;  %v1280_v20 = vmul.f32 %v2913_v48, %v1209_v7 }
 0x20a   : > { %2309 = vst [vmem:[%s3154_s4 + $0xd0] sm:$0xff] %v2257_v13   ;;  %v1539_v22 = vsel %vm1411_vm7, %v1347_v5, %v1475_v8  ;;  %vm1412_vm8 = vcmp.ge.f32.partialorder %v1348_v54, 0.0  ;;  %v1476_v46 = vmul.f32 0.2, %v1348_v54  ;;  %v1281_v23 = vmul.f32 %v2913_v48, %v1210_v12 }
 0x20b   : > { %v2262_v26 = vpack.c.bf16 %v1539_v22, %v1538_v16  ;;  %vm1413_vm9 = vcmp.ge.f32.partialorder %v1349_v2, 0.0  ;;  %v1477_v15 = vmul.f32 0.2, %v1349_v2  ;;  %v1350_v58 = vadd.f32 %v2917_v18, %v1279_v42 }
 0x20c   : > { %v1540_v28 = vsel %vm1412_vm8, %v1348_v54, %v1476_v46  ;;  %v1351_v27 = vadd.f32 %v2917_v18, %v1280_v20  ;;  %v1282_v30 = vmul.f32 %v2913_v48, %v1211_v21  ;;  %v1352_v31 = vadd.f32 %v2917_v18, %v1281_v23 }
 0x20d   : > { %2310 = vst [vmem:[%s3154_s4 + $0xd8] sm:$0xff] %v2262_v26   ;;  %v1541_v4 = vsel %vm1413_vm9, %v1349_v2, %v1477_v15  ;;  %vm1414_vm10 = vcmp.ge.f32.partialorder %v1350_v58, 0.0  ;;  %v1478_v35 = vmul.f32 0.2, %v1350_v58  ;;  %v1283_v53 = vmul.f32 %v2913_v48, %v1212_v33 }
 0x20e   : > { %v2267_v1 = vpack.c.bf16 %v1541_v4, %v1540_v28  ;;  %vm1415_vm11 = vcmp.ge.f32.partialorder %v1351_v27, 0.0  ;;  %v1479_v36 = vmul.f32 0.2, %v1351_v27  ;;  %v1353_v40 = vadd.f32 %v2917_v18, %v1282_v30 }
 0x20f   : > { %v1542_v37 = vsel %vm1414_vm10, %v1350_v58, %v1478_v35  ;;  %vm1416_vm12 = vcmp.ge.f32.partialorder %v1352_v31, 0.0  ;;  %v1480_v63 = vmul.f32 0.2, %v1352_v31  ;;  %v1284_v57 = vmul.f32 %v2913_v48, %v1213_v50 }
 0x210   : > { %2311 = vst [vmem:[%s3154_s4 + $0xe0] sm:$0xff] %v2267_v1   ;;  %v1543_v38 = vsel %vm1415_vm11, %v1351_v27, %v1479_v36  ;;  %vm1417_vm13 = vcmp.ge.f32.partialorder %v1353_v40, 0.0  ;;  %v1481_v41 = vmul.f32 0.2, %v1353_v40  ;;  %v1354_v17 = vadd.f32 %v2917_v18, %v1283_v53 }
 0x211   : > { %v2272_v14 = vpack.c.bf16 %v1543_v38, %v1542_v37  ;;  %v1544_v43 = vsel %vm1416_vm12, %v1352_v31, %v1480_v63  ;;  %v1355_v45 = vadd.f32 %v2917_v18, %v1284_v57 }
 0x212   : > { %v1545_v49 = vsel %vm1417_vm13, %v1353_v40, %v1481_v41  ;;  %vm1418_vm14 = vcmp.ge.f32.partialorder %v1354_v17, 0.0  ;;  %v1482_v24 = vmul.f32 0.2, %v1354_v17 }
 0x213   : > { %2312 = vst [vmem:[%s3154_s4 + $0xe8] sm:$0xff] %v2272_v14   ;;  %v2277_v48 = vpack.c.bf16 %v1545_v49, %v1544_v43  ;;  %vm1419_vm15 = vcmp.ge.f32.partialorder %v1355_v45, 0.0  ;;  %v1483_v51 = vmul.f32 0.2, %v1355_v45 }
 0x214   : > { %v1546_v32 = vsel %vm1418_vm14, %v1354_v17, %v1482_v24 }
 0x215   : > { %2313 = vst [vmem:[%s3154_s4 + $0xf0] sm:$0xff] %v2277_v48   ;;  %v1547_v9 = vsel %vm1419_vm15, %v1355_v45, %v1483_v51 }
 0x216   : > { %v2282_v52 = vpack.c.bf16 %v1547_v9, %v1546_v32 }
 0x218   : > { %2314 = vst [vmem:[%s3154_s4 + $0xf8] sm:$0xff] %v2282_v52  }
 0x219 PF: > { %s14_s17 = sadd.s32 1, %s2540_s17   ;;  %s3155_s15 = smov %s2536_s16 }
 0x21a   : > { %p11_p7 = scmp.ge.s32.totalorder %s14_s17, 4   ;;  %s3156_s16 = smov %s3158_s18 }
 0x21c   :  { %13 = sbr.rel (!%p11_p7) target bundleno = 2 (0x2), region = 84 }

// kernel: discriminator_forward.7
= control target key start
LH: loop header
LB: loop body
LE: loop exit
PB: predicated region body
PF: predicated region fallthrough
CT: control target
= control target key end

     0   :  { %s1259_s15 = smov 0   ;;  %s1261_s16 = smov 0   ;;  %s1481_s0 = inlined_call_operand.vmem [shape: bf16[128,256], index: 0, kind: input, shape index: {}]   ;;  %s1482_s1 = inlined_call_operand.vmem [shape: bf16[256,128], index: 1, kind: input, shape index: {}]   ;;  %s1483_s2 = inlined_call_operand.vmem [shape: f32[1,128], index: 2, kind: input, shape index: {}]   ;;  %s1484_s3 = inlined_call_operand.vmem [shape: f32[1,128], index: 3, kind: input, shape index: {}]   ;;  %s1485_s4 = inlined_call_operand.vmem [shape: bf16[128,128], index: 4, kind: output, shape index: {}]  }
   0x1   :  { %s1263_s17 = smov 0  }
   0x2 LB: > { %s26_s18 = sadd.s32 1, %s1227_s16  ;;  %p940_p0 = scmp.ge.s32.totalorder %s1231_s17, 1  ;;  %s1231_s17 = sphi %s1263_s17, %s14_s17   ;;  %s1227_s16 = sphi %s1261_s16, %s1487_s16   ;;  %s1223_s15 = sphi %s1259_s15, %s1486_s15  }
   0x3   : > { %p28_p1 = scmp.ge.s32.totalorder %s26_s18, 2  ;;  %p186_p2 = scmp.lt.s32.totalorder %s1231_s17, 3 }
   0x5   : > { %s1489_s18 = smov (%p28_p1, %s26_s18), 0  ;;  %p187_p3 = pnand %p940_p0, %p186_p2 }
   0x6   : > { %p237_p4 = scmp.eq.s32.totalorder (!%p187_p3), %s1223_s15, 0 }
   0x7   : > { %190 = sbr.rel (%p187_p3) target bundleno = 390 (0x186), region = 36 }
   0xc   : > { %242 = sbr.rel (!%p237_p4) target bundleno = 17 (0x11), region = 40  ;;  %v1233_v0 = vmov (%p237_p4), 0.0  }
   0xd   : > { %243 = vst [vmem:[#allocation3] sm:$0x1] (%p237_p4), %v1233_v0  ;;  %244 = vst [vmem:[#allocation4] sm:$0x1] (%p237_p4), %v1233_v0 }
  0x11 PF: > { %p942_p5 = scmp.ne.s32.totalorder %s1223_s15, 0 }
  0x13   : > { %247 = sbr.rel (%p942_p5) target bundleno = 317 (0x13d), region = 44 }
  0x18   : > { %v1167_v1 = vld [vmem:[%s1482_s1 + $0x78] sm:$0xff]   ;;  %v1169_v3 = vld [vmem:[%s1482_s1 + $0x70] sm:$0xff]   ;;  %v1171_v5 = vld [vmem:[%s1482_s1 + $0x68] sm:$0xff]  }
  0x19   : > { %v1168_v2 = vld [vmem:[%s1482_s1 + $0x38] sm:$0xff]   ;;  %1062 = vmatprep.subr.bf16.mxu0 %v1167_v1  ;;  %1126 = vmatprep.subr.bf16.mxu1 %v1167_v1  ;;  %v1170_v4 = vld [vmem:[%s1482_s1 + $0x30] sm:$0xff]   ;;  %v1172_v6 = vld [vmem:[%s1482_s1 + $0x28] sm:$0xff]  }
  0x1a   : > { %1063 = vmatpush3.bf16.msra.mxu0 %v1168_v2  ;;  %1134 = vmatpush3.bf16.msra.mxu1 %v1168_v2  ;;  %v1173_v7 = vld [vmem:[%s1482_s1 + $0x60] sm:$0xff]   ;;  %v1175_v9 = vld [vmem:[%s1482_s1 + $0x58] sm:$0xff]   ;;  %v1177_v11 = vld [vmem:[%s1482_s1 + $0x50] sm:$0xff]  }
  0x1b   : > { %1064 = vmatprep.subr.bf16.mxu0 %v1169_v3  ;;  %1127 = vmatprep.subr.bf16.mxu1 %v1169_v3  ;;  %v1174_v8 = vld [vmem:[%s1482_s1 + $0x20] sm:$0xff]   ;;  %v1176_v10 = vld [vmem:[%s1482_s1 + $0x18] sm:$0xff]   ;;  %v1178_v13 = vld [vmem:[%s1482_s1 + $0x10] sm:$0xff]  }
  0x1c   : > { %v1185_v12 = vld [vmem:[%s1481_s0 + $0x4] ss:$8 sps:$4 sm:$0xff]   ;;  %v1183_v19 = vld [vmem:[%s1481_s0] ss:$8 sps:$4 sm:$0xff]   ;;  %v1186_v21 = vld [vmem:[%s1481_s0 + $0x14] ss:$8 sps:$4 sm:$0xff]  }
  0x1d   : > { %v1191_v14 = vld [vmem:[%s1481_s0 + $0x44] ss:$8 sps:$4 sm:$0xff]   ;;  %504 = vmatprep.mubr.bf16.mxu0 %v1185_v12  ;;  %v1189_v20 = vld [vmem:[%s1481_s0 + $0x40] ss:$8 sps:$4 sm:$0xff]   ;;  %v1195_v22 = vld [vmem:[%s1481_s0 + $0x54] ss:$8 sps:$4 sm:$0xff]  }
  0x1e   : > { %1065 = vmatpush3.bf16.msra.mxu0 %v1170_v4  ;;  %1135 = vmatpush3.bf16.msra.mxu1 %v1170_v4  ;;  %v1179_v15 = vld [vmem:[%s1482_s1 + $0x48] sm:$0xff]   ;;  %v1181_v17 = vld [vmem:[%s1482_s1 + $0x40] sm:$0xff]   ;;  %v1188_v23 = vld [vmem:[%s1481_s0 + $0x10] ss:$8 sps:$4 sm:$0xff]  }
  0x1f   : > { %1066 = vmatprep.subr.bf16.mxu0 %v1171_v5  ;;  %1128 = vmatprep.subr.bf16.mxu1 %v1171_v5  ;;  %v1180_v16 = vld [vmem:[%s1482_s1 + $0x8] sm:$0xff]   ;;  %v1182_v18 = vld [vmem:[%s1482_s1] sm:$0xff]   ;;  %v1197_v24 = vld [vmem:[%s1481_s0 + $0x50] ss:$8 sps:$4 sm:$0xff]  }
  0x20   : > { %536 = vmatprep.mubr.bf16.mxu1 %v1191_v14  ;;  %v1192_v25 = vld [vmem:[%s1481_s0 + $0x24] ss:$8 sps:$4 sm:$0xff]   ;;  %v1194_v27 = vld [vmem:[%s1481_s0 + $0x20] ss:$8 sps:$4 sm:$0xff]   ;;  %v1198_v29 = vld [vmem:[%s1481_s0 + $0x34] ss:$8 sps:$4 sm:$0xff]  }
  0x21   : > { %v1201_v26 = vld [vmem:[%s1481_s0 + $0x64] ss:$8 sps:$4 sm:$0xff]   ;;  %v1203_v28 = vld [vmem:[%s1481_s0 + $0x60] ss:$8 sps:$4 sm:$0xff]   ;;  %v1204_v30 = vld [vmem:[%s1481_s0 + $0x74] ss:$8 sps:$4 sm:$0xff]  }
  0x22   : > { %1067 = vmatpush3.bf16.msra.mxu0 %v1172_v6  ;;  %1136 = vmatpush3.bf16.msra.mxu1 %v1172_v6  ;;  %v1200_v31 = vld [vmem:[%s1481_s0 + $0x30] ss:$8 sps:$4 sm:$0xff]  }
  0x23   : > { %1068 = vmatprep.subr.bf16.mxu0 %v1173_v7  ;;  %1129 = vmatprep.subr.bf16.mxu1 %v1173_v7  ;;  %v1206_v32 = vld [vmem:[%s1481_s0 + $0x70] ss:$8 sps:$4 sm:$0xff]  }
  0x26   : > { %1069 = vmatpush3.bf16.msra.mxu0 %v1174_v8  ;;  %1137 = vmatpush3.bf16.msra.mxu1 %v1174_v8 }
  0x27   : > { %1070 = vmatprep.subr.bf16.mxu0 %v1175_v9  ;;  %1130 = vmatprep.subr.bf16.mxu1 %v1175_v9 }
  0x2a   : > { %1071 = vmatpush3.bf16.msra.mxu0 %v1176_v10  ;;  %1138 = vmatpush3.bf16.msra.mxu1 %v1176_v10 }
  0x2b   : > { %1072 = vmatprep.subr.bf16.mxu0 %v1177_v11  ;;  %1131 = vmatprep.subr.bf16.mxu1 %v1177_v11 }
  0x2e   : > { %1073 = vmatpush3.bf16.msra.mxu0 %v1178_v13  ;;  %1139 = vmatpush3.bf16.msra.mxu1 %v1178_v13 }
  0x2f   : > { %1074 = vmatprep.subr.bf16.mxu0 %v1179_v15  ;;  %1132 = vmatprep.subr.bf16.mxu1 %v1179_v15 }
  0x32   : > { %1075 = vmatpush3.bf16.msra.mxu0 %v1180_v16  ;;  %1140 = vmatpush3.bf16.msra.mxu1 %v1180_v16 }
  0x33   : > { %1076 = vmatprep.subr.bf16.mxu0 %v1181_v17  ;;  %1133 = vmatprep.subr.bf16.mxu1 %v1181_v17 }
  0x36   : > { %1077 = vmatpush3.bf16.msra.mxu0 %v1182_v18  ;;  %1141 = vmatpush3.bf16.msra.mxu1 %v1182_v18 }
  0x39   : > { %505 = vmatmul.mubr.bf16.vlgmr.msra.gmra.mxu0 %v1183_v19  ;;  %537 = vmatmul.mubr.bf16.vlgmr.msra.gmra.mxu1 %v1189_v20 }
  0x3a   : > { %512 = vmatprep.mubr.bf16.mxu0 %v1186_v21  ;;  %544 = vmatprep.mubr.bf16.mxu1 %v1195_v22 }
  0x41   : > { %513 = vmatmul.mubr.bf16.gmra.mxu0 %v1188_v23  ;;  %545 = vmatmul.mubr.bf16.gmra.mxu1 %v1197_v24 }
  0x42   : > { %520 = vmatprep.mubr.bf16.mxu0 %v1192_v25  ;;  %552 = vmatprep.mubr.bf16.mxu1 %v1201_v26 }
  0x49   : > { %521 = vmatmul.mubr.bf16.gmra.mxu0 %v1194_v27  ;;  %553 = vmatmul.mubr.bf16.gmra.mxu1 %v1203_v28 }
  0x4a   : > { %528 = vmatprep.mubr.bf16.mxu0 %v1198_v29  ;;  %560 = vmatprep.mubr.bf16.mxu1 %v1204_v30 }
  0x51   : > { %529 = vmatmul.mubr.bf16.gmra.mxu0 %v1200_v31  ;;  %561 = vmatmul.mubr.bf16.gmra.mxu1 %v1206_v32 }
  0xf9   : > { %v1078_v33 = vpop.f32.mrf.mxu0  ;;  %v1102_v34 = vpop.f32.mrf.mxu1 }
  0xfb   : > { %v1079_v35 = vpop.f32.mrf.mxu0  ;;  %v1103_v36 = vpop.f32.mrf.mxu1 }
  0xfc   : > { %v1080_v37 = vadd.f32 %v1079_v35, %v1078_v33  ;;  %v1379_v38 = vadd.f32 %v1103_v36, %v1102_v34 }
  0xfd   : > { %v1081_v39 = vpop.f32.mrf.mxu0  ;;  %v1105_v40 = vpop.f32.mrf.mxu1 }
  0xfe   : > { %570 = vst [vmem:[#allocation2 + $0x30] sm:$0xff] %v1080_v37  ;;  %578 = vst [vmem:[#allocation2 + $0x40] sm:$0xff] %v1379_v38  ;;  %v611_v0 = vmul.f32 %v1080_v37, %v1080_v37 }
  0xff   : > { %v1082_v41 = vpop.f32.mrf.mxu0  ;;  %v1106_v42 = vpop.f32.mrf.mxu1 }
 0x100   : > { %v1083_v43 = vadd.f32 %v1082_v41, %v1081_v39  ;;  %v1382_v44 = vadd.f32 %v1106_v42, %v1105_v40  ;;  %v619_v39 = vmul.f32 %v1379_v38, %v1379_v38 }
 0x101   : > { %v1084_v45 = vpop.f32.mrf.mxu0  ;;  %v1108_v46 = vpop.f32.mrf.mxu1 }
 0x102   : > { %571 = vst [vmem:[#allocation2] sm:$0xff] %v1083_v43  ;;  %579 = vst [vmem:[#allocation2 + $0x20] sm:$0xff] %v1382_v44  ;;  %v612_v59 = vmul.f32 %v1083_v43, %v1083_v43  ;;  %v587_v4 = vadd.f32 %v1083_v43, %v1080_v37  ;;  %v620_v42 = vmul.f32 %v1382_v44, %v1382_v44 }
 0x103   : > { %v1085_v47 = vpop.f32.mrf.mxu0  ;;  %v1109_v48 = vpop.f32.mrf.mxu1 }
 0x104   : > { %v1086_v49 = vadd.f32 %v1085_v47, %v1084_v45  ;;  %v1385_v50 = vadd.f32 %v1109_v48, %v1108_v46  ;;  %v627_v5 = vadd.f32 %v612_v59, %v611_v0 }
 0x105   : > { %v1087_v51 = vpop.f32.mrf.mxu0  ;;  %v1111_v52 = vpop.f32.mrf.mxu1 }
 0x106   : > { %572 = vst [vmem:[#allocation2 + $0x58] sm:$0xff] %v1086_v49  ;;  %580 = vst [vmem:[#allocation2 + $0x10] sm:$0xff] %v1385_v50  ;;  %v613_v1 = vmul.f32 %v1086_v49, %v1086_v49  ;;  %v588_v9 = vadd.f32 %v1086_v49, %v587_v4  ;;  %v621_v46 = vmul.f32 %v1385_v50, %v1385_v50 }
 0x107   : > { %v1088_v53 = vpop.f32.mrf.mxu0  ;;  %v1112_v54 = vpop.f32.mrf.mxu1 }
 0x108   : > { %v1089_v55 = vadd.f32 %v1088_v53, %v1087_v51  ;;  %v1388_v56 = vadd.f32 %v1112_v54, %v1111_v52  ;;  %v628_v12 = vadd.f32 %v627_v5, %v613_v1 }
 0x109   : > { %v1090_v57 = vpop.f32.mrf.mxu0  ;;  %v1114_v58 = vpop.f32.mrf.mxu1 }
 0x10a   : > { %573 = vst [vmem:[#allocation2 + $0x18] sm:$0xff] %v1089_v55  ;;  %581 = vst [vmem:[#allocation2 + $0x38] sm:$0xff] %v1388_v56  ;;  %v614_v6 = vmul.f32 %v1089_v55, %v1089_v55  ;;  %v589_v15 = vadd.f32 %v1089_v55, %v588_v9  ;;  %v622_v49 = vmul.f32 %v1388_v56, %v1388_v56 }
 0x10b   : > { %v1091_v60 = vpop.f32.mrf.mxu0  ;;  %v1115_v61 = vpop.f32.mrf.mxu1 }
 0x10c   : > { %v1092_v62 = vadd.f32 %v1091_v60, %v1090_v57  ;;  %v1116_v63 = vadd.f32 %v1115_v61, %v1114_v58  ;;  %v629_v17 = vadd.f32 %v628_v12, %v614_v6 }
 0x10d   : > { %v1093_v2 = vpop.f32.mrf.mxu0  ;;  %v1117_v3 = vpop.f32.mrf.mxu1 }
 0x10e   : > { %574 = vst [vmem:[#allocation2 + $0x50] sm:$0xff] %v1092_v62  ;;  %582 = vst [vmem:[#allocation2 + $0x60] sm:$0xff] %v1116_v63  ;;  %v615_v16 = vmul.f32 %v1092_v62, %v1092_v62  ;;  %v590_v20 = vadd.f32 %v1092_v62, %v589_v15 }
 0x10f   : > { %v1094_v7 = vpop.f32.mrf.mxu0  ;;  %v1118_v8 = vpop.f32.mrf.mxu1 }
 0x110   : > { %v1095_v10 = vadd.f32 %v1094_v7, %v1093_v2  ;;  %v1119_v11 = vadd.f32 %v1118_v8, %v1117_v3  ;;  %v630_v26 = vadd.f32 %v629_v17, %v615_v16  ;;  %v586_v8 = vld [vmem:[#allocation3] sm:$0x1] }
 0x111   : > { %v1096_v13 = vpop.f32.mrf.mxu0  ;;  %v1120_v14 = vpop.f32.mrf.mxu1 }
 0x112   : > { %575 = vst [vmem:[#allocation2 + $0x68] sm:$0xff] %v1095_v10  ;;  %583 = vst [vmem:[#allocation2 + $0x70] sm:$0xff] %v1119_v11  ;;  %v616_v21 = vmul.f32 %v1095_v10, %v1095_v10  ;;  %v591_v27 = vadd.f32 %v1095_v10, %v590_v20  ;;  %v624_v57 = vmul.f32 %v1119_v11, %v1119_v11 }
 0x113   : > { %v1097_v18 = vpop.f32.mrf.mxu0  ;;  %v1121_v19 = vpop.f32.mrf.mxu1 }
 0x114   : > { %v1098_v22 = vadd.f32 %v1097_v18, %v1096_v13  ;;  %v1122_v23 = vadd.f32 %v1121_v19, %v1120_v14  ;;  %v631_v31 = vadd.f32 %v630_v26, %v616_v21 }
 0x115   : > { %v1099_v24 = vpop.f32.mrf.mxu0  ;;  %v1123_v25 = vpop.f32.mrf.mxu1 }
 0x116   : > { %576 = vst [vmem:[#allocation2 + $0x8] sm:$0xff] %v1098_v22  ;;  %v617_v28 = vmul.f32 %v1098_v22, %v1098_v22  ;;  %584 = vst [vmem:[#allocation2 + $0x78] sm:$0xff] %v1122_v23  ;;  %v592_v32 = vadd.f32 %v1098_v22, %v591_v27  ;;  %v625_v60 = vmul.f32 %v1122_v23, %v1122_v23 }
 0x117   : > { %v1100_v29 = vpop.f32.mrf.mxu0  ;;  %v1124_v30 = vpop.f32.mrf.mxu1 }
 0x118   : > { %v1101_v33 = vadd.f32 %v1100_v29, %v1099_v24  ;;  %v1125_v34 = vadd.f32 %v1124_v30, %v1123_v25  ;;  %v632_v35 = vadd.f32 %v631_v31, %v617_v28 }
 0x11a   : > { %577 = vst [vmem:[#allocation2 + $0x48] sm:$0xff] %v1101_v33  ;;  %v593_v36 = vadd.f32 %v1101_v33, %v592_v32  ;;  %v618_v37 = vmul.f32 %v1101_v33, %v1101_v33  ;;  %585 = vst [vmem:[#allocation2 + $0x28] sm:$0xff] %v1125_v34  ;;  %v626_v0 = vmul.f32 %v1125_v34, %v1125_v34 }
 0x11c   : > { %v594_v40 = vadd.f32 %v1379_v38, %v593_v36  ;;  %v633_v41 = vadd.f32 %v632_v35, %v618_v37  ;;  %v623_v38 = vmul.f32 %v1116_v63, %v1116_v63 }
 0x11e   : > { %v595_v43 = vadd.f32 %v1382_v44, %v594_v40  ;;  %v634_v45 = vadd.f32 %v633_v41, %v619_v39 }
 0x120   : > { %v635_v47 = vadd.f32 %v634_v45, %v620_v42  ;;  %v596_v48 = vadd.f32 %v1385_v50, %v595_v43 }
 0x122   : > { %v597_v51 = vadd.f32 %v1388_v56, %v596_v48  ;;  %v636_v52 = vadd.f32 %v635_v47, %v621_v46 }
 0x124   : > { %v598_v53 = vadd.f32 %v1116_v63, %v597_v51  ;;  %v637_v54 = vadd.f32 %v636_v52, %v622_v49 }
 0x126   : > { %v599_v55 = vadd.f32 %v1119_v11, %v598_v53  ;;  %v638_v58 = vadd.f32 %v637_v54, %v623_v38  ;;  %v610_v11 = vld [vmem:[#allocation4] sm:$0x1] }
 0x128   : > { %v639_v44 = vadd.f32 %v638_v58, %v624_v57  ;;  %v600_v59 = vadd.f32 %v1122_v23, %v599_v55 }
 0x12a   : > { %v640_v61 = vadd.f32 %v639_v44, %v625_v60  ;;  %v601_v62 = vadd.f32 %v1125_v34, %v600_v59 }
 0x12c   : > { %v602_v1 = vrot.slane %v601_v62, 4  ;;  %v641_v50 = vadd.f32 %v640_v61, %v626_v0 }
 0x12e   : > { %v603_v2 = vadd.f32 %v602_v1, %v601_v62  ;;  %v642_v3 = vrot.slane %v641_v50, 4 }
 0x130   : > { %v604_v4 = vrot.slane %v603_v2, 2  ;;  %v643_v5 = vadd.f32 %v642_v3, %v641_v50 }
 0x132   : > { %v605_v56 = vadd.f32 %v604_v4, %v603_v2  ;;  %v644_v6 = vrot.slane %v643_v5, 2 }
 0x134   : > { %v606_v7 = vrot.slane %v605_v56, 1  ;;  %v645_v63 = vadd.f32 %v644_v6, %v643_v5 }
 0x136   : > { %v607_v9 = vadd.f32 %v606_v7, %v605_v56  ;;  %v646_v10 = vrot.slane %v645_v63, 1 }
 0x138   : > { %v608_v12 = vadd.f32 %v607_v9, %v586_v8  ;;  %v647_v13 = vadd.f32 %v646_v10, %v645_v63 }
 0x13a   : > { %609 = vst [vmem:[#allocation3] sm:$0x1] %v608_v12  ;;  %v648_v14 = vadd.f32 %v647_v13, %v610_v11 }
 0x13c   : > { %649 = vst [vmem:[#allocation4] sm:$0x1] %v648_v14 }
 0x13d PF: > { %651 = sbr.rel (!%p237_p4) target bundleno = 353 (0x161), region = 48  ;;  %v659_v23 = vld [vmem:[%s1483_s2] sm:$0x1] (%p237_p4) }
 0x13e   : > { %v664_v26 = vld [vmem:[%s1484_s3] sm:$0x1] (%p237_p4) }
 0x141   : > { %v652_v15 = vld [vmem:[#allocation3] sm:$0x1] (%p237_p4) }
 0x142   : > { %v653_v17 = vmul.f32 0.0078125, %v652_v15 }
 0x143   : > { %v654_v16 = vld [vmem:[#allocation4] sm:$0x1] }
 0x144   : > { %v655_v18 = vmul.f32 0.0078125, %v654_v16  ;;  %v656_v19 = vmul.f32 %v653_v17, %v653_v17 }
 0x146   : > { %v657_v20 = vsub.f32 %v655_v18, %v656_v19 }
 0x148   : > { %v658_v21 = vmax.f32 %v657_v20, 0.0 }
 0x14a   : > { %v660_v22 = vadd.f32 1e-05, %v658_v21 }
 0x14c   : > { %1207 = vrsqrt.f32 %v660_v22 }
 0x159   : > { %v1208_v24 = vpop.eup %1207 }
 0x15a   : > { %v662_v25 = vmul.f32 %v1208_v24, %v659_v23 }
 0x15c   : > { %663 = vst [vmem:[#allocation5] sm:$0x1] %v662_v25  ;;  %v665_v27 = vmul.f32 %v662_v25, %v653_v17 }
 0x15e   : > { %v666_v28 = vsub.f32 %v664_v26, %v665_v27 }
 0x160   : > { %667 = vst [vmem:[#allocation6] sm:$0x1] %v666_v28 }
 0x161 PF: > { %p975_p6 = scmp.ne.s32.totalorder %s1223_s15, 1 }
 0x163   : > { %671 = sbr.rel (%p975_p6) target bundleno = 390 (0x186), region = 52 }
 0x168   : > { %v673_v29 = vld [vmem:[#allocation2 + $0x30] sm:$0xff]  ;;  %v674_v30 = vld [vmem:[#allocation2] sm:$0xff]  ;;  %v675_v35 = vld [vmem:[#allocation2 + $0x58] sm:$0xff] }
 0x169   : > { %v1412_v31 = vld [vmem:[#allocation5] ss:$0 sm:$0xff]  ;;  %v1416_v34 = vld [vmem:[#allocation6] ss:$0 sm:$0xff]  ;;  %v676_v36 = vld [vmem:[#allocation2 + $0x18] sm:$0xff] }
 0x16a   : > { %v696_v32 = vmul.f32 %v1412_v31, %v673_v29  ;;  %v697_v33 = vmul.f32 %v1412_v31, %v674_v30  ;;  %v698_v37 = vmul.f32 %v1412_v31, %v675_v35  ;;  %v699_v39 = vmul.f32 %v1412_v31, %v676_v36  ;;  %v677_v40 = vld [vmem:[#allocation2 + $0x50] sm:$0xff]  ;;  %v678_v41 = vld [vmem:[#allocation2 + $0x68] sm:$0xff]  ;;  %v681_v50 = vld [vmem:[#allocation2 + $0x40] sm:$0xff] }
 0x16b   : > { %v679_v42 = vld [vmem:[#allocation2 + $0x8] sm:$0xff]  ;;  %v700_v46 = vmul.f32 %v1412_v31, %v677_v40  ;;  %v701_v47 = vmul.f32 %v1412_v31, %v678_v41  ;;  %v682_v2 = vld [vmem:[#allocation2 + $0x20] sm:$0xff]  ;;  %v683_v3 = vld [vmem:[#allocation2 + $0x10] sm:$0xff]  ;;  %v704_v9 = vmul.f32 %v1412_v31, %v681_v50 }
 0x16c   : > { %v719_v43 = vadd.f32 %v1416_v34, %v696_v32  ;;  %v720_v45 = vadd.f32 %v1416_v34, %v697_v33  ;;  %v680_v48 = vld [vmem:[#allocation2 + $0x48] sm:$0xff]  ;;  %v721_v49 = vadd.f32 %v1416_v34, %v698_v37  ;;  %v722_v51 = vadd.f32 %v1416_v34, %v699_v39  ;;  %v684_v63 = vld [vmem:[#allocation2 + $0x38] sm:$0xff]  ;;  %v685_v12 = vld [vmem:[#allocation2 + $0x60] sm:$0xff] }
 0x16d   : > { %v702_v52 = vmul.f32 %v1412_v31, %v679_v42  ;;  %v703_v38 = vmul.f32 %v1412_v31, %v680_v48  ;;  %v723_v59 = vadd.f32 %v1416_v34, %v700_v46  ;;  %v724_v60 = vadd.f32 %v1416_v34, %v701_v47  ;;  %v686_v13 = vld [vmem:[#allocation2 + $0x70] sm:$0xff]  ;;  %v687_v25 = vld [vmem:[#allocation2 + $0x78] sm:$0xff]  ;;  %v688_v36 = vld [vmem:[#allocation2 + $0x28] sm:$0xff] }
 0x16e   : > { %vm735_vm0 = vcmp.ge.f32.partialorder %v719_v43, 0.0  ;;  %vm736_vm1 = vcmp.ge.f32.partialorder %v720_v45, 0.0  ;;  %v751_v53 = vmul.f32 0.2, %v719_v43  ;;  %v752_v54 = vmul.f32 0.2, %v720_v45 }
 0x16f   : > { %vm737_vm2 = vcmp.ge.f32.partialorder %v721_v49, 0.0  ;;  %vm738_vm3 = vcmp.ge.f32.partialorder %v722_v51, 0.0  ;;  %v753_v55 = vmul.f32 0.2, %v721_v49  ;;  %v754_v57 = vmul.f32 0.2, %v722_v51 }
 0x170   : > { %v767_v58 = vsel %vm735_vm0, %v719_v43, %v751_v53  ;;  %v768_v44 = vsel %vm736_vm1, %v720_v45, %v752_v54  ;;  %v725_v1 = vadd.f32 %v1416_v34, %v702_v52  ;;  %vm739_vm4 = vcmp.ge.f32.partialorder %v723_v59, 0.0 }
 0x171   : > { %v1018_v61 = vpack.c.bf16 %v768_v44, %v767_v58  ;;  %v769_v62 = vsel %vm737_vm2, %v721_v49, %v753_v55  ;;  %v770_v0 = vsel %vm738_vm3, %v722_v51, %v754_v57  ;;  %vm740_vm5 = vcmp.ge.f32.partialorder %v724_v60, 0.0 }
 0x172   : > { %v1023_v4 = vpack.c.bf16 %v770_v0, %v769_v62  ;;  %v755_v5 = vmul.f32 0.2, %v723_v59  ;;  %v756_v56 = vmul.f32 0.2, %v724_v60  ;;  %v726_v6 = vadd.f32 %v1416_v34, %v703_v38 }
 0x173   : > { %1019 = vst [vmem:[%s1485_s4] sm:$0xff] %v1018_v61   ;;  %vm741_vm6 = vcmp.ge.f32.partialorder %v725_v1, 0.0  ;;  %v757_v7 = vmul.f32 0.2, %v725_v1  ;;  %v705_v10 = vmul.f32 %v1412_v31, %v682_v2  ;;  %v706_v11 = vmul.f32 %v1412_v31, %v683_v3 }
 0x174   : > { %1055 = vst [vmem:[%s1485_s4 + $0x8] sm:$0xff] %v1023_v4   ;;  %v771_v8 = vsel %vm739_vm4, %v723_v59, %v755_v5  ;;  %v772_v14 = vsel %vm740_vm5, %v724_v60, %v756_v56  ;;  %vm742_vm7 = vcmp.ge.f32.partialorder %v726_v6, 0.0  ;;  %v758_v15 = vmul.f32 0.2, %v726_v6 }
 0x175   : > { %v773_v16 = vsel %vm741_vm6, %v725_v1, %v757_v7  ;;  %v1028_v17 = vpack.c.bf16 %v772_v14, %v771_v8  ;;  %v727_v18 = vadd.f32 %v1416_v34, %v704_v9  ;;  %v728_v19 = vadd.f32 %v1416_v34, %v705_v10 }
 0x176   : > { %v707_v20 = vmul.f32 %v1412_v31, %v684_v63  ;;  %v774_v21 = vsel %vm742_vm7, %v726_v6, %v758_v15  ;;  %v729_v22 = vadd.f32 %v1416_v34, %v706_v11  ;;  %v708_v23 = vmul.f32 %v1412_v31, %v685_v12 }
 0x177   : > { %v709_v24 = vmul.f32 %v1412_v31, %v686_v13  ;;  %1056 = vst [vmem:[%s1485_s4 + $0x10] sm:$0xff] %v1028_v17   ;;  %v1033_v26 = vpack.c.bf16 %v774_v21, %v773_v16  ;;  %vm743_vm8 = vcmp.ge.f32.partialorder %v727_v18, 0.0  ;;  %vm744_vm9 = vcmp.ge.f32.partialorder %v728_v19, 0.0 }
 0x178   : > { %v759_v27 = vmul.f32 0.2, %v727_v18  ;;  %v760_v28 = vmul.f32 0.2, %v728_v19  ;;  %v730_v29 = vadd.f32 %v1416_v34, %v707_v20  ;;  %vm745_vm10 = vcmp.ge.f32.partialorder %v729_v22, 0.0 }
 0x179   : > { %v761_v30 = vmul.f32 0.2, %v729_v22  ;;  %1057 = vst [vmem:[%s1485_s4 + $0x18] sm:$0xff] %v1033_v26   ;;  %v731_v33 = vadd.f32 %v1416_v34, %v708_v23  ;;  %v732_v35 = vadd.f32 %v1416_v34, %v709_v24  ;;  %v710_v37 = vmul.f32 %v1412_v31, %v687_v25 }
 0x17a   : > { %v775_v32 = vsel %vm743_vm8, %v727_v18, %v759_v27  ;;  %v776_v39 = vsel %vm744_vm9, %v728_v19, %v760_v28  ;;  %vm746_vm11 = vcmp.ge.f32.partialorder %v730_v29, 0.0  ;;  %v762_v40 = vmul.f32 0.2, %v730_v29 }
 0x17b   : > { %v777_v41 = vsel %vm745_vm10, %v729_v22, %v761_v30  ;;  %v1038_v42 = vpack.c.bf16 %v776_v39, %v775_v32  ;;  %vm747_vm12 = vcmp.ge.f32.partialorder %v731_v33, 0.0  ;;  %vm748_vm13 = vcmp.ge.f32.partialorder %v732_v35, 0.0 }
 0x17c   : > { %v763_v43 = vmul.f32 0.2, %v731_v33  ;;  %v778_v45 = vsel %vm746_vm11, %v730_v29, %v762_v40  ;;  %v764_v46 = vmul.f32 0.2, %v732_v35  ;;  %v711_v47 = vmul.f32 %v1412_v31, %v688_v36 }
 0x17d   : > { %v733_v48 = vadd.f32 %v1416_v34, %v710_v37  ;;  %1058 = vst [vmem:[%s1485_s4 + $0x20] sm:$0xff] %v1038_v42   ;;  %v1043_v49 = vpack.c.bf16 %v778_v45, %v777_v41 }
 0x17e   : > { %v779_v51 = vsel %vm747_vm12, %v731_v33, %v763_v43  ;;  %v780_v52 = vsel %vm748_vm13, %v732_v35, %v764_v46  ;;  %v734_v38 = vadd.f32 %v1416_v34, %v711_v47 }
 0x17f   : > { %vm749_vm14 = vcmp.ge.f32.partialorder %v733_v48, 0.0  ;;  %v765_v53 = vmul.f32 0.2, %v733_v48  ;;  %1059 = vst [vmem:[%s1485_s4 + $0x28] sm:$0xff] %v1043_v49   ;;  %v1048_v54 = vpack.c.bf16 %v780_v52, %v779_v51 }
 0x180   : > { %vm750_vm15 = vcmp.ge.f32.partialorder %v734_v38, 0.0  ;;  %v766_v31 = vmul.f32 0.2, %v734_v38 }
 0x181   : > { %v781_v55 = vsel %vm749_vm14, %v733_v48, %v765_v53  ;;  %1060 = vst [vmem:[%s1485_s4 + $0x30] sm:$0xff] %v1048_v54  }
 0x182   : > { %v782_v57 = vsel %vm750_vm15, %v734_v38, %v766_v31 }
 0x183   : > { %v1053_v58 = vpack.c.bf16 %v782_v57, %v781_v55 }
 0x185   : > { %1061 = vst [vmem:[%s1485_s4 + $0x38] sm:$0xff] %v1053_v58  }
 0x186 PF: > { %s14_s17 = sadd.s32 1, %s1231_s17   ;;  %s1486_s15 = smov %s1227_s16 }
 0x187   : > { %p11_p7 = scmp.ge.s32.totalorder %s14_s17, 4   ;;  %s1487_s16 = smov %s1489_s18 }
 0x189   :  { %13 = sbr.rel (!%p11_p7) target bundleno = 2 (0x2), region = 84 }

// kernel: discriminator_forward.9
= control target key start
LH: loop header
LB: loop body
LE: loop exit
PB: predicated region body
PF: predicated region fallthrough
CT: control target
= control target key end

     0   :  { %v21_v0 = vlaneseq  ;;  %v179_v1 = vmov 1983009808   ;;  %vm135_vm0 = vcmask 1041408   ;;  %vm167_vm1 = vcmask 1024   ;;  %s220_s1 = inlined_call_operand.vmem [shape: f32[1,1024], index: 1, kind: input, shape index: {}]   ;;  %s221_s2 = inlined_call_operand.<no memory space> [shape: f32[1,1], index: 2, kind: input, shape index: {}]   ;;  %s222_s0 = inlined_call_operand.vmem [shape: bf16[2,1024], index: 0, kind: input, shape index: {}]   ;;  %s223_s3 = inlined_call_operand.vmem [shape: f32[2,1], index: 3, kind: output, shape index: {}]  }
   0x1   :  { %v56_v2 = vunpack.c.l.s4 %v179_v1  ;;  %v8_v3 = vstv %s221_s2  ;;  %v19_v5 = vld [vmem:[%s220_s1] sm:$0xff] }
   0x2   :  { %v22_v4 = vshrl.u32 %v21_v0, 7  ;;  %9 = vst [vmem:[#allocation2] sm:$0x1] %v8_v3  ;;  %v16_v19 = vld [vmem:[%s222_s0] sm:$0xff] }
   0x3   :  { %v57_v6 = vunpack.c.0.s8 %v56_v2  ;;  %v17_v29 = vunpack.c.l.bf16 %v16_v19  ;;  %v18_v32 = vunpack.c.h.bf16 %v16_v19 }
   0x4   :  { %v23_v7 = vsub.s32 0, %v22_v4  ;;  %v27_v8 = vsub.s32 1, %v22_v4  ;;  %v31_v9 = vsub.s32 2, %v22_v4  ;;  %v35_v10 = vsub.s32 3, %v22_v4 }
   0x5   :  { %v39_v11 = vsub.s32 4, %v22_v4  ;;  %v43_v12 = vsub.s32 5, %v22_v4  ;;  %v47_v13 = vsub.s32 6, %v22_v4  ;;  %v51_v14 = vsub.s32 7, %v22_v4 }
   0x6   :  { %v24_v15 = vrot.slane %v19_v5, %v23_v7  ;;  %v28_v16 = vrot.slane %v19_v5, %v27_v8  ;;  %v32_v17 = vrot.slane %v19_v5, %v31_v9  ;;  %v36_v18 = vrot.slane %v19_v5, %v35_v10 }
   0x7   :  { %v40_v20 = vrot.slane %v19_v5, %v39_v11  ;;  %v44_v21 = vrot.slane %v19_v5, %v43_v12  ;;  %v48_v22 = vrot.slane %v19_v5, %v47_v13  ;;  %v52_v23 = vrot.slane %v19_v5, %v51_v14 }
   0x8   :  { %v53_v24 = vcombine.low %v24_v15, %v28_v16  ;;  %v54_v25 = vcombine.low %v32_v17, %v36_v18  ;;  %v60_v26 = vsub.s32 %v57_v6, %v22_v4 }
   0x9   :  { %v70_v27 = vcombine.low %v40_v20, %v44_v21  ;;  %v71_v28 = vcombine.low %v48_v22, %v52_v23  ;;  %v173_v0 = vld [vmem:[#allocation2] ss:$0 sm:$0xff] }
   0xa   :  { %v61_v30 = vrot.slane %v53_v24, %v60_v26  ;;  %v68_v31 = vrot.slane %v54_v25, %v60_v26 }
   0xb   :  { %v78_v33 = vrot.slane %v70_v27, %v60_v26  ;;  %v85_v34 = vrot.slane %v71_v28, %v60_v26 }
   0xc   :  { %v69_v35 = vcombine.low %v61_v30, %v68_v31 }
   0xd   :  { %v86_v36 = vcombine.low %v78_v33, %v85_v34 }
   0xe   :  { %v89_v37 = vmul.f32 %v69_v35, %v17_v29 }
   0xf   :  { %v90_v38 = vmul.f32 %v86_v36, %v18_v32 }
  0x10   :  { %v93_v39 = vcombine.high %v89_v37, %v89_v37  ;;  %v100_v40 = vrot.slane %v89_v37, %v60_v26 }
  0x11   :  { %v110_v41 = vcombine.high %v90_v38, %v90_v38  ;;  %v117_v44 = vrot.slane %v90_v38, %v60_v26 }
  0x12   :  { %v107_v42 = vrot.slane %v93_v39, %v60_v26  ;;  %v108_v43 = vcombine.high %v100_v40, %v100_v40  ;;  %v136_v45 = vsel %vm135_vm0, %v100_v40, 0.0 }
  0x13   :  { %v124_v50 = vrot.slane %v110_v41, %v60_v26  ;;  %v125_v51 = vcombine.high %v117_v44, %v117_v44  ;;  %v143_v54 = vsel %vm135_vm0, %v117_v44, 0.0 }
  0x14   :  { %v109_v46 = vcombine.high %v107_v42, %v107_v42  ;;  %v137_v47 = vsel %vm135_vm0, %v108_v43, 0.0  ;;  %v139_v48 = vsel %vm135_vm0, %v107_v42, 0.0 }
  0x15   :  { %v138_v49 = vadd.f32 %v137_v47, %v136_v45  ;;  %v126_v56 = vcombine.high %v124_v50, %v124_v50  ;;  %v145_v57 = vsel %vm135_vm0, %v125_v51, 0.0  ;;  %v147_v59 = vsel %vm135_vm0, %v124_v50, 0.0 }
  0x16   :  { %v141_v52 = vsel %vm135_vm0, %v109_v46, 0.0 }
  0x17   :  { %v140_v53 = vadd.f32 %v139_v48, %v138_v49  ;;  %v149_v61 = vsel %vm135_vm0, %v126_v56, 0.0 }
  0x19   :  { %v142_v55 = vadd.f32 %v141_v52, %v140_v53 }
  0x1b   :  { %v144_v58 = vadd.f32 %v143_v54, %v142_v55 }
  0x1d   :  { %v146_v60 = vadd.f32 %v145_v57, %v144_v58 }
  0x1f   :  { %v148_v62 = vadd.f32 %v147_v59, %v146_v60 }
  0x21   :  { %v150_v63 = vadd.f32 %v149_v61, %v148_v62 }
  0x23   :  { %151 = vadd.xlane.f32.xlu0 %v150_v63 }
  0xac   :  { %v152_v1 = vpop.xlane.xlu0 %151 }
  0xad   :  { %v160_v2 = vadd.f32 %v173_v0, %v152_v1 }
  0xaf   :  { %v161_v3 = vsub.f32 0.0, %v160_v2 }
  0xb1   :  { %v162_v4 = vmul.f32 1.442695, %v161_v3 }
  0xb3   :  { %175 = vpow2.f32 %v162_v4 }
  0xc0   :  { %v176_v5 = vpop.eup %175 }
  0xc1   :  { %v164_v6 = vadd.f32 1.0, %v176_v5 }
  0xc3   :  { %177 = vrcp.f32 %v164_v6 }
  0xd0   :  { %v178_v7 = vpop.eup %177 }
  0xd1   :  { %168 = vst.msk [vmem:[%s223_s3] sm:$0x3] %vm167_vm1, %v178_v7 }

// kernel: discriminator_forward.8
= control target key start
LH: loop header
LB: loop body
LE: loop exit
PB: predicated region body
PF: predicated region fallthrough
CT: control target
= control target key end

     0   :  { %s1088_s15 = smov 0   ;;  %s1090_s16 = smov 0   ;;  %s1256_s0 = inlined_call_operand.vmem [shape: bf16[32,512], index: 0, kind: input, shape index: {}]   ;;  %s1257_s1 = inlined_call_operand.vmem [shape: bf16[512,128], index: 1, kind: input, shape index: {}]   ;;  %s1258_s2 = inlined_call_operand.vmem [shape: f32[1,128], index: 2, kind: input, shape index: {}]   ;;  %s1259_s3 = inlined_call_operand.vmem [shape: f32[1,128], index: 3, kind: input, shape index: {}]   ;;  %s1260_s4 = inlined_call_operand.vmem [shape: bf16[32,128], index: 4, kind: output, shape index: {}]  }
   0x1   :  { %s1092_s17 = smov 0  }
   0x2 LB: > { %s26_s18 = sadd.s32 1, %s1056_s16  ;;  %p841_p0 = scmp.ge.s32.totalorder %s1060_s17, 1  ;;  %s1060_s17 = sphi %s1092_s17, %s14_s17   ;;  %s1056_s16 = sphi %s1090_s16, %s1262_s16   ;;  %s1052_s15 = sphi %s1088_s15, %s1261_s15  }
   0x3   : > { %p28_p1 = scmp.ge.s32.totalorder %s26_s18, 2  ;;  %p186_p2 = scmp.lt.s32.totalorder %s1060_s17, 3 }
   0x5   : > { %s1264_s18 = smov (%p28_p1, %s26_s18), 0  ;;  %p187_p3 = pnand %p841_p0, %p186_p2 }
   0x6   : > { %p237_p4 = scmp.eq.s32.totalorder (!%p187_p3), %s1052_s15, 0 }
   0x7   : > { %190 = sbr.rel (%p187_p3) target bundleno = 345 (0x159), region = 36 }
   0xc   : > { %242 = sbr.rel (!%p237_p4) target bundleno = 17 (0x11), region = 40  ;;  %v1062_v0 = vmov (%p237_p4), 0.0  }
   0xd   : > { %243 = vst [vmem:[#allocation3] sm:$0x1] (%p237_p4), %v1062_v0  ;;  %244 = vst [vmem:[#allocation4] sm:$0x1] (%p237_p4), %v1062_v0 }
  0x11 PF: > { %p843_p5 = scmp.ne.s32.totalorder %s1052_s15, 0 }
  0x13   : > { %247 = sbr.rel (%p843_p5) target bundleno = 289 (0x121), region = 44 }
  0x18   : > { %v992_v1 = vld [vmem:[%s1257_s1 + $0x78] sm:$0xff]   ;;  %v996_v5 = vld [vmem:[%s1257_s1 + $0x70] sm:$0xff]   ;;  %v1000_v9 = vld [vmem:[%s1257_s1 + $0x68] sm:$0xff]  }
  0x19   : > { %v993_v2 = vld [vmem:[%s1257_s1 + $0xf8] sm:$0xff]   ;;  %911 = vmatprep.subr.bf16.mxu0 %v992_v1  ;;  %v997_v6 = vld [vmem:[%s1257_s1 + $0xf0] sm:$0xff]   ;;  %v1001_v10 = vld [vmem:[%s1257_s1 + $0xe8] sm:$0xff]  }
  0x1a   : > { %v994_v3 = vld [vmem:[%s1257_s1 + $0x38] sm:$0xff]   ;;  %939 = vmatprep.subr.bf16.mxu1 %v993_v2  ;;  %v998_v7 = vld [vmem:[%s1257_s1 + $0x30] sm:$0xff]   ;;  %v1002_v11 = vld [vmem:[%s1257_s1 + $0x28] sm:$0xff]  }
  0x1b   : > { %v995_v4 = vld [vmem:[%s1257_s1 + $0xb8] sm:$0xff]   ;;  %912 = vmatpush3.bf16.msra.mxu0 %v994_v3  ;;  %v999_v8 = vld [vmem:[%s1257_s1 + $0xb0] sm:$0xff]   ;;  %v1003_v12 = vld [vmem:[%s1257_s1 + $0xa8] sm:$0xff]  }
  0x1c   : > { %940 = vmatpush3.bf16.msra.mxu1 %v995_v4  ;;  %913 = vmatprep.subr.bf16.mxu0 %v996_v5  ;;  %v1004_v13 = vld [vmem:[%s1257_s1 + $0x60] sm:$0xff]   ;;  %v1008_v17 = vld [vmem:[%s1257_s1 + $0x58] sm:$0xff]   ;;  %v1012_v21 = vld [vmem:[%s1257_s1 + $0x50] sm:$0xff]  }
  0x1d   : > { %941 = vmatprep.subr.bf16.mxu1 %v997_v6  ;;  %v1005_v14 = vld [vmem:[%s1257_s1 + $0xe0] sm:$0xff]   ;;  %v1009_v18 = vld [vmem:[%s1257_s1 + $0xd8] sm:$0xff]   ;;  %v1013_v22 = vld [vmem:[%s1257_s1 + $0xd0] sm:$0xff]  }
  0x1e   : > { %v1006_v15 = vld [vmem:[%s1257_s1 + $0x20] sm:$0xff]   ;;  %v1010_v19 = vld [vmem:[%s1257_s1 + $0x18] sm:$0xff]   ;;  %v1014_v23 = vld [vmem:[%s1257_s1 + $0x10] sm:$0xff]  }
  0x1f   : > { %914 = vmatpush3.bf16.msra.mxu0 %v998_v7  ;;  %v1007_v16 = vld [vmem:[%s1257_s1 + $0xa0] sm:$0xff]   ;;  %v1011_v20 = vld [vmem:[%s1257_s1 + $0x98] sm:$0xff]   ;;  %v1015_v24 = vld [vmem:[%s1257_s1 + $0x90] sm:$0xff]  }
  0x20   : > { %942 = vmatpush3.bf16.msra.mxu1 %v999_v8  ;;  %915 = vmatprep.subr.bf16.mxu0 %v1000_v9  ;;  %v1016_v25 = vld [vmem:[%s1257_s1 + $0x48] sm:$0xff]   ;;  %v1020_v29 = vld [vmem:[%s1257_s1 + $0x40] sm:$0xff]  }
  0x21   : > { %943 = vmatprep.subr.bf16.mxu1 %v1001_v10  ;;  %v1017_v26 = vld [vmem:[%s1257_s1 + $0xc8] sm:$0xff]   ;;  %v1021_v30 = vld [vmem:[%s1257_s1 + $0xc0] sm:$0xff]  }
  0x22   : > { %v1018_v27 = vld [vmem:[%s1257_s1 + $0x8] sm:$0xff]   ;;  %v1022_v31 = vld [vmem:[%s1257_s1] sm:$0xff]  }
  0x23   : > { %916 = vmatpush3.bf16.msra.mxu0 %v1002_v11  ;;  %v1019_v28 = vld [vmem:[%s1257_s1 + $0x88] sm:$0xff]   ;;  %v1023_v32 = vld [vmem:[%s1257_s1 + $0x80] sm:$0xff]  }
  0x24   : > { %944 = vmatpush3.bf16.msra.mxu1 %v1003_v12  ;;  %917 = vmatprep.subr.bf16.mxu0 %v1004_v13  ;;  %v1024_v33 = vld [vmem:[%s1256_s0] ss:$16 sps:$4 sm:$0xff]   ;;  %v1026_v34 = vld [vmem:[%s1256_s0 + $0x4] ss:$16 sps:$4 sm:$0xff]   ;;  %v1027_v35 = vld [vmem:[%s1256_s0 + $0x8] ss:$16 sps:$4 sm:$0xff]  }
  0x25   : > { %945 = vmatprep.subr.bf16.mxu1 %v1005_v14  ;;  %v1029_v36 = vld [vmem:[%s1256_s0 + $0xc] ss:$16 sps:$4 sm:$0xff]   ;;  %584 = vmatprep.mubr.bf16.mxu0 %v1026_v34  ;;  %v1030_v37 = vld [vmem:[%s1256_s0 + $0x24] ss:$16 sps:$4 sm:$0xff]   ;;  %v1034_v39 = vld [vmem:[%s1256_s0 + $0x20] ss:$16 sps:$4 sm:$0xff]  }
  0x26   : > { %633 = vmatprep.mubr.bf16.mxu1 %v1029_v36  ;;  %v1032_v38 = vld [vmem:[%s1256_s0 + $0x2c] ss:$16 sps:$4 sm:$0xff]   ;;  %v1035_v40 = vld [vmem:[%s1256_s0 + $0x28] ss:$16 sps:$4 sm:$0xff]  }
  0x27   : > { %918 = vmatpush3.bf16.msra.mxu0 %v1006_v15 }
  0x28   : > { %946 = vmatpush3.bf16.msra.mxu1 %v1007_v16  ;;  %919 = vmatprep.subr.bf16.mxu0 %v1008_v17 }
  0x29   : > { %947 = vmatprep.subr.bf16.mxu1 %v1009_v18 }
  0x2b   : > { %920 = vmatpush3.bf16.msra.mxu0 %v1010_v19 }
  0x2c   : > { %948 = vmatpush3.bf16.msra.mxu1 %v1011_v20  ;;  %921 = vmatprep.subr.bf16.mxu0 %v1012_v21 }
  0x2d   : > { %949 = vmatprep.subr.bf16.mxu1 %v1013_v22 }
  0x2f   : > { %922 = vmatpush3.bf16.msra.mxu0 %v1014_v23 }
  0x30   : > { %950 = vmatpush3.bf16.msra.mxu1 %v1015_v24  ;;  %923 = vmatprep.subr.bf16.mxu0 %v1016_v25  ;;  %v655_v24 = vld [vmem:[#allocation3] sm:$0x1] }
  0x31   : > { %951 = vmatprep.subr.bf16.mxu1 %v1017_v26 }
  0x33   : > { %924 = vmatpush3.bf16.msra.mxu0 %v1018_v27  ;;  %v667_v27 = vld [vmem:[#allocation4] sm:$0x1] }
  0x34   : > { %952 = vmatpush3.bf16.msra.mxu1 %v1019_v28  ;;  %925 = vmatprep.subr.bf16.mxu0 %v1020_v29 }
  0x35   : > { %953 = vmatprep.subr.bf16.mxu1 %v1021_v30 }
  0x37   : > { %926 = vmatpush3.bf16.msra.mxu0 %v1022_v31 }
  0x38   : > { %954 = vmatpush3.bf16.msra.mxu1 %v1023_v32 }
  0x3a   : > { %585 = vmatmul.mubr.bf16.vlgmr.msra.gmra.mxu0 %v1024_v33 }
  0x3b   : > { %634 = vmatmul.mubr.bf16.vlgmr.msra.gmra.mxu1 %v1027_v35  ;;  %592 = vmatprep.mubr.bf16.mxu0 %v1030_v37 }
  0x3c   : > { %641 = vmatprep.mubr.bf16.mxu1 %v1032_v38 }
  0x42   : > { %593 = vmatmul.mubr.bf16.gmra.mxu0 %v1034_v39 }
  0x43   : > { %642 = vmatmul.mubr.bf16.gmra.mxu1 %v1035_v40 }
  0xfa   : > { %v927_v41 = vpop.f32.mrf.mxu0 }
  0xfb   : > { %v955_v42 = vpop.f32.mrf.mxu1 }
  0xfc   : > { %v928_v43 = vpop.f32.mrf.mxu0 }
  0xfd   : > { %v929_v44 = vadd.f32 %v928_v43, %v927_v41  ;;  %v956_v45 = vpop.f32.mrf.mxu1 }
  0xfe   : > { %v957_v46 = vadd.f32 %v956_v45, %v955_v42  ;;  %v930_v47 = vpop.f32.mrf.mxu0 }
  0xff   : > { %v958_v48 = vpop.f32.mrf.mxu1 }
 0x100   : > { %v636_v49 = vadd.f32 %v957_v46, %v929_v44  ;;  %v931_v50 = vpop.f32.mrf.mxu0 }
 0x101   : > { %v932_v51 = vadd.f32 %v931_v50, %v930_v47  ;;  %v959_v52 = vpop.f32.mrf.mxu1 }
 0x102   : > { %651 = vst [vmem:[#allocation2 + $0x10] sm:$0xff] %v636_v49  ;;  %v960_v53 = vadd.f32 %v959_v52, %v958_v48  ;;  %v933_v54 = vpop.f32.mrf.mxu0  ;;  %v668_v4 = vmul.f32 %v636_v49, %v636_v49 }
 0x103   : > { %v961_v55 = vpop.f32.mrf.mxu1 }
 0x104   : > { %v639_v56 = vadd.f32 %v960_v53, %v932_v51  ;;  %v934_v57 = vpop.f32.mrf.mxu0 }
 0x105   : > { %v935_v58 = vadd.f32 %v934_v57, %v933_v54  ;;  %v962_v59 = vpop.f32.mrf.mxu1 }
 0x106   : > { %652 = vst [vmem:[#allocation2] sm:$0xff] %v639_v56  ;;  %v963_v60 = vadd.f32 %v962_v59, %v961_v55  ;;  %v936_v61 = vpop.f32.mrf.mxu0  ;;  %v669_v63 = vmul.f32 %v639_v56, %v639_v56  ;;  %v656_v5 = vadd.f32 %v639_v56, %v636_v49 }
 0x107   : > { %v964_v62 = vpop.f32.mrf.mxu1 }
 0x108   : > { %v644_v0 = vadd.f32 %v963_v60, %v935_v58  ;;  %v937_v1 = vpop.f32.mrf.mxu0  ;;  %v672_v8 = vadd.f32 %v669_v63, %v668_v4 }
 0x109   : > { %v938_v2 = vadd.f32 %v937_v1, %v936_v61  ;;  %v965_v3 = vpop.f32.mrf.mxu1 }
 0x10a   : > { %653 = vst [vmem:[#allocation2 + $0x18] sm:$0xff] %v644_v0  ;;  %v670_v6 = vmul.f32 %v644_v0, %v644_v0  ;;  %v966_v7 = vadd.f32 %v965_v3, %v964_v62  ;;  %v657_v9 = vadd.f32 %v656_v5, %v644_v0 }
 0x10c   : > { %v647_v10 = vadd.f32 %v966_v7, %v938_v2  ;;  %v673_v11 = vadd.f32 %v672_v8, %v670_v6 }
 0x10e   : > { %654 = vst [vmem:[#allocation2 + $0x8] sm:$0xff] %v647_v10  ;;  %v658_v12 = vadd.f32 %v657_v9, %v647_v10  ;;  %v671_v13 = vmul.f32 %v647_v10, %v647_v10 }
 0x110   : > { %v659_v14 = vrot.slane %v658_v12, 4  ;;  %v674_v15 = vadd.f32 %v673_v11, %v671_v13 }
 0x112   : > { %v660_v16 = vadd.f32 %v659_v14, %v658_v12  ;;  %v675_v17 = vrot.slane %v674_v15, 4 }
 0x114   : > { %v661_v18 = vrot.slane %v660_v16, 2  ;;  %v676_v19 = vadd.f32 %v675_v17, %v674_v15 }
 0x116   : > { %v662_v20 = vadd.f32 %v661_v18, %v660_v16  ;;  %v677_v21 = vrot.slane %v676_v19, 2 }
 0x118   : > { %v663_v22 = vrot.slane %v662_v20, 1  ;;  %v678_v23 = vadd.f32 %v677_v21, %v676_v19 }
 0x11a   : > { %v664_v25 = vadd.f32 %v663_v22, %v662_v20  ;;  %v679_v26 = vrot.slane %v678_v23, 1 }
 0x11c   : > { %v665_v28 = vadd.f32 %v664_v25, %v655_v24  ;;  %v680_v29 = vadd.f32 %v679_v26, %v678_v23 }
 0x11e   : > { %666 = vst [vmem:[#allocation3] sm:$0x1] %v665_v28  ;;  %v681_v30 = vadd.f32 %v680_v29, %v667_v27 }
 0x120   : > { %682 = vst [vmem:[#allocation4] sm:$0x1] %v681_v30 }
 0x121 PF: > { %684 = sbr.rel (!%p237_p4) target bundleno = 325 (0x145), region = 48  ;;  %v692_v39 = vld [vmem:[%s1258_s2] sm:$0x1] (%p237_p4) }
 0x122   : > { %v697_v42 = vld [vmem:[%s1259_s3] sm:$0x1] (%p237_p4) }
 0x125   : > { %v685_v31 = vld [vmem:[#allocation3] sm:$0x1] (%p237_p4) }
 0x126   : > { %v686_v33 = vmul.f32 0.03125, %v685_v31 }
 0x127   : > { %v687_v32 = vld [vmem:[#allocation4] sm:$0x1] }
 0x128   : > { %v688_v34 = vmul.f32 0.03125, %v687_v32  ;;  %v689_v35 = vmul.f32 %v686_v33, %v686_v33 }
 0x12a   : > { %v690_v36 = vsub.f32 %v688_v34, %v689_v35 }
 0x12c   : > { %v691_v37 = vmax.f32 %v690_v36, 0.0 }
 0x12e   : > { %v693_v38 = vadd.f32 1e-05, %v691_v37 }
 0x130   : > { %1036 = vrsqrt.f32 %v693_v38 }
 0x13d   : > { %v1037_v40 = vpop.eup %1036 }
 0x13e   : > { %v695_v41 = vmul.f32 %v1037_v40, %v692_v39 }
 0x140   : > { %696 = vst [vmem:[#allocation5] sm:$0x1] %v695_v41  ;;  %v698_v43 = vmul.f32 %v695_v41, %v686_v33 }
 0x142   : > { %v699_v44 = vsub.f32 %v697_v42, %v698_v43 }
 0x144   : > { %700 = vst [vmem:[#allocation6] sm:$0x1] %v699_v44 }
 0x145 PF: > { %p884_p6 = scmp.ne.s32.totalorder %s1052_s15, 1 }
 0x147   : > { %704 = sbr.rel (%p884_p6) target bundleno = 345 (0x159), region = 52 }
 0x14c   : > { %v706_v45 = vld [vmem:[#allocation2 + $0x10] sm:$0xff]  ;;  %v707_v46 = vld [vmem:[#allocation2] sm:$0xff]  ;;  %v708_v51 = vld [vmem:[#allocation2 + $0x18] sm:$0xff] }
 0x14d   : > { %v885_v47 = vld [vmem:[#allocation5] ss:$0 sm:$0xff]  ;;  %v886_v50 = vld [vmem:[#allocation6] ss:$0 sm:$0xff]  ;;  %v709_v52 = vld [vmem:[#allocation2 + $0x8] sm:$0xff] }
 0x14e   : > { %v717_v48 = vmul.f32 %v885_v47, %v706_v45  ;;  %v718_v49 = vmul.f32 %v885_v47, %v707_v46  ;;  %v719_v53 = vmul.f32 %v885_v47, %v708_v51  ;;  %v720_v54 = vmul.f32 %v885_v47, %v709_v52 }
 0x150   : > { %v728_v55 = vadd.f32 %v886_v50, %v717_v48  ;;  %v729_v56 = vadd.f32 %v886_v50, %v718_v49  ;;  %v730_v57 = vadd.f32 %v886_v50, %v719_v53  ;;  %v731_v58 = vadd.f32 %v886_v50, %v720_v54 }
 0x152   : > { %vm732_vm0 = vcmp.ge.f32.partialorder %v728_v55, 0.0  ;;  %vm733_vm1 = vcmp.ge.f32.partialorder %v729_v56, 0.0  ;;  %v736_v59 = vmul.f32 0.2, %v728_v55  ;;  %v737_v60 = vmul.f32 0.2, %v729_v56 }
 0x153   : > { %vm734_vm2 = vcmp.ge.f32.partialorder %v730_v57, 0.0  ;;  %vm735_vm3 = vcmp.ge.f32.partialorder %v731_v58, 0.0  ;;  %v738_v61 = vmul.f32 0.2, %v730_v57  ;;  %v739_v62 = vmul.f32 0.2, %v731_v58 }
 0x154   : > { %v740_v63 = vsel %vm732_vm0, %v728_v55, %v736_v59  ;;  %v741_v0 = vsel %vm733_vm1, %v729_v56, %v737_v60 }
 0x155   : > { %v903_v1 = vpack.c.bf16 %v741_v0, %v740_v63  ;;  %v742_v2 = vsel %vm734_vm2, %v730_v57, %v738_v61  ;;  %v743_v3 = vsel %vm735_vm3, %v731_v58, %v739_v62 }
 0x156   : > { %v908_v4 = vpack.c.bf16 %v743_v3, %v742_v2 }
 0x157   : > { %904 = vst [vmem:[%s1260_s4] sm:$0xff] %v903_v1  }
 0x158   : > { %910 = vst [vmem:[%s1260_s4 + $0x8] sm:$0xff] %v908_v4  }
 0x159 PF: > { %s14_s17 = sadd.s32 1, %s1060_s17   ;;  %s1261_s15 = smov %s1056_s16 }
 0x15a   : > { %p11_p7 = scmp.ge.s32.totalorder %s14_s17, 4   ;;  %s1262_s16 = smov %s1264_s18 }
 0x15c   :  { %13 = sbr.rel (!%p11_p7) target bundleno = 2 (0x2), region = 84 }

</bundles_post_ra>
